<compile_context>
chip_gen: v7x
topology: tpu7x:2x2x1
jax: 0.10.0
libtpu: 0.0.40
codegen_flags: <defaults>
</compile_context>

<pallas_src>
import jax
import jax.numpy as jnp
import numpy as np
from jax import lax
from jax.experimental import pallas as pl
from jax.experimental.pallas import tpu as pltpu

NUM_CLASSES = 10


# ------------------------------------------------------------------ fused kernel
def _lenet_fused_kernel(xq_ref, w1_ref, b1_ref, w2_ref, b2_ref,
                        w3_ref, b3_ref, w4_ref, b4_ref, o_ref):
    """Bt samples per grid step.  xq_ref: (1, 2, 14*Bt, 28), rows = (row r, sample b)."""
    Bt = o_ref.shape[0]          # samples per grid step
    R = 12 * Bt                  # pooled-height rows x batch

    # ---- conv1 (5x5, 1->10) + bias + ReLU + fused 2x2 max-pool ---------------
    # xq[p, r*Bt + b, :] = x[b, 2r + p, :], so each kernel-row tap is one
    # contiguous (aligned) sublane slice; both output-row parities are stacked
    # along M so each tap is a single fat matmul.
    acc = jnp.zeros((2 * R, 256), jnp.float32)
    for ki in range(5):
        s0, s1 = ki, ki + 1                                       # abs row offsets
        x_even = xq_ref[0, s0 % 2, pl.ds((s0 // 2) * Bt, R), :]   # (R, 28) bf16
        x_odd = xq_ref[0, s1 % 2, pl.ds((s1 // 2) * Bt, R), :]    # (R, 28) bf16
        lhs = jnp.concatenate([x_even, x_odd], axis=0)            # (2R, 28)
        acc = acc + jnp.dot(lhs, w1_ref[ki], preferred_element_type=jnp.float32)
    y1 = jnp.maximum(acc + b1_ref[...], 0.0)
    # NOTE: columns 120:128 and 248:256 are bias-free ReLU(0) filler, never read.
    ph = jnp.maximum(y1[0:R, :], y1[R:2 * R, :])          # pool over H -> (R, 256)
    # Column layout is (w%2)*128 + (w//2)*10 + co, i.e. the two width parities
    # live in the two 128-lane slabs (assumes <=12 pooled widths per slab, true
    # for 28x28 input).  Width pool = elementwise max of the two slabs.
    p2 = jnp.maximum(ph[:, 0:120], ph[:, 128:248])        # (R, 120) f32
    p2 = p2.astype(jnp.bfloat16)

    # ---- conv2 (3x3, 10->20) + bias + ReLU ------------------------------------
    # The 3 kernel-width taps are pre-folded into w2_ref[i] on the host.
    M2 = 10 * Bt
    y2 = jnp.zeros((M2, 200), jnp.float32)
    for i in range(3):
        y2 = y2 + jnp.dot(p2[i * Bt:i * Bt + M2, :], w2_ref[i],
                          preferred_element_type=jnp.float32)
    y2 = jnp.maximum(y2 + b2_ref[...], 0.0).astype(jnp.bfloat16)  # (M2, 200)

    # ---- fc1 (2000 -> 500) + ReLU ---------------------------------------------
    # PyTorch's NCHW flatten permutation is pre-folded into w3 (10, 200, 500);
    # with batch blocking each chunk is a (Bt, 200)@(200, 500) matmul.
    h1 = jnp.zeros((Bt, 500), jnp.float32)
    for h in range(10):
        h1 = h1 + jnp.dot(y2[h * Bt:(h + 1) * Bt, :], w3_ref[h],
                          preferred_element_type=jnp.float32)
    h1 = jnp.maximum(h1 + b3_ref[...], 0.0).astype(jnp.bfloat16)  # (Bt, 500)

    # ---- fc2 (500 -> 10) + log_softmax ----------------------------------------
    logits = jnp.dot(h1, w4_ref[...], preferred_element_type=jnp.float32) + b4_ref[...]
    m = jnp.max(logits, axis=1, keepdims=True)
    lse = m + jnp.log(jnp.sum(jnp.exp(logits - m), axis=1, keepdims=True))
    o_ref[...] = (logits - lse).astype(o_ref.dtype)


# ------------------------------------------------------------------ forward wrapper
def conv_net_forward(x_nchw, prepped, block_batch=16):
    B = x_nchw.shape[0]
    Bt = min(block_batch, B)
    Bp = pl.cdiv(B, Bt) * Bt
    if Bp != B:
        x_nchw = jnp.pad(x_nchw, ((0, Bp - B), (0, 0), (0, 0), (0, 0)))
    nb = Bp // Bt

    # Repack input: xq[g, p, r*Bt + b, :] = x[g*Bt + b, 0, 2r + p, :]  (bf16).
    xq = (x_nchw.reshape(nb, Bt, 14, 2, 28)
                 .transpose(0, 3, 2, 1, 4)
                 .reshape(nb, 2, 14 * Bt, 28)
                 .astype(jnp.bfloat16))

    full3 = lambda g: (0, 0, 0)
    full2 = lambda g: (0, 0)

    out = pl.pallas_call(
        _lenet_fused_kernel,
        out_shape=jax.ShapeDtypeStruct((Bp, NUM_CLASSES), jnp.float32),
        grid=(nb,),
        in_specs=[
            pl.BlockSpec((1, 2, 14 * Bt, 28), lambda g: (g, 0, 0, 0)),  # input block
            pl.BlockSpec((5, 28, 256), full3),                          # conv1 banded (bf16)
            pl.BlockSpec((1, 256), full2),                              # conv1 bias (tiled)
            pl.BlockSpec((3, 120, 200), full3),                         # conv2 row-folded (bf16)
            pl.BlockSpec((1, 200), full2),                              # conv2 bias (tiled)
            pl.BlockSpec((10, 200, 500), full3),                        # fc1 (perm folded, bf16)
            pl.BlockSpec((1, 500), full2),                              # fc1 bias
            pl.BlockSpec((500, NUM_CLASSES), full2),                    # fc2 (transposed, bf16)
            pl.BlockSpec((1, NUM_CLASSES), full2),                      # fc2 bias
        ],
        out_specs=pl.BlockSpec((Bt, NUM_CLASSES), lambda g: (g, 0)),
        compiler_params=pltpu.CompilerParams(
            dimension_semantics=("parallel",),     # shard batch blocks over TCs (v7x)
            vmem_limit_bytes=32 * 1024 * 1024,
        ),
    )(xq, prepped["w1band"], prepped["b1t"], prepped["w2row"], prepped["b2t"],
      prepped["w3r"], prepped["b3"], prepped["w4"], prepped["b4"])
    return out[:B]


# ------------------------------------------------------------------ one-time weight repack (host, outside jit)
def prepare_params(params):
    c1w = np.asarray(params["c1w"], np.float32)   # (10, 1, 5, 5)
    c1b = np.asarray(params["c1b"], np.float32)
    c2w = np.asarray(params["c2w"], np.float32)   # (20, 10, 3, 3)
    c2b = np.asarray(params["c2b"], np.float32)
    f1w = np.asarray(params["f1w"], np.float32)   # (500, 2000)
    f1b = np.asarray(params["f1b"], np.float32)
    f2w = np.asarray(params["f2w"], np.float32)   # (10, 500)
    f2b = np.asarray(params["f2b"], np.float32)

    # conv1 as 5 banded matmuls over full input rows; cols = (w%2)*128 + (w//2)*10 + co.
    w1band = np.zeros((5, 28, 256), np.float32)
    b1t = np.zeros((1, 256), np.float32)
    for w in range(24):
        c0 = (w % 2) * 128 + (w // 2) * 10
        b1t[0, c0:c0 + 10] = c1b
        for ki in range(5):
            for kj in range(5):
                w1band[ki, w + kj, c0:c0 + 10] = c1w[:, 0, ki, kj]

    # conv2 as 3 block-banded matmuls (kernel-width taps j folded into the row
    # placement and SUMMED per kernel-row i): out cols = w*20 + co.
    w2row = np.zeros((3, 120, 200), np.float32)
    for i in range(3):
        for j in range(3):
            blk = c2w[:, :, i, j].T               # (ci, co) = (10, 20)
            for w in range(10):
                w2row[i, (w + j) * 10:(w + j) * 10 + 10,
                      w * 20:(w + 1) * 20] += blk
    b2t = np.tile(c2b, 10).reshape(1, 200)

    # fc1: fold PyTorch's NCHW flatten (feat idx = co*100 + h*10 + w) into the weight:
    # w3r[h, w*20 + co, n] = f1w[n, co*100 + h*10 + w]
    w3r = np.transpose(f1w.reshape(500, 20, 10, 10), (2, 3, 1, 0)).reshape(10, 200, 500)
    b3 = f1b.reshape(1, 500)

    w4 = np.ascontiguousarray(f2w.T)              # (500, 10)
    b4 = f2b.reshape(1, NUM_CLASSES)

    # MXU operands in bf16 (f32 accumulation in-kernel); biases stay f32.
    return {
        "w1band": jnp.asarray(w1band, jnp.bfloat16),
        "b1t": jnp.asarray(b1t),
        "w2row": jnp.asarray(w2row, jnp.bfloat16),
        "b2t": jnp.asarray(b2t),
        "w3r": jnp.asarray(w3r, jnp.bfloat16),
        "b3": jnp.asarray(b3),
        "w4": jnp.asarray(w4, jnp.bfloat16),
        "b4": jnp.asarray(b4),
    }


# ------------------------------------------------------------------ pure-JAX reference (verification only)
def conv_net_reference(x_nchw, params):
    dn = ("NCHW", "OIHW", "NCHW")
    y = lax.conv_general_dilated(x_nchw, params["c1w"], (1, 1), "VALID",
                                 dimension_numbers=dn)
    y = jnp.maximum(y + params["c1b"][None, :, None, None], 0.0)
    y = lax.reduce_window(y, -jnp.inf, lax.max, (1, 1, 2, 2), (1, 1, 2, 2), "VALID")
    y = lax.conv_general_dilated(y, params["c2w"], (1, 1), "VALID",
                                 dimension_numbers=dn)
    y = jnp.maximum(y + params["c2b"][None, :, None, None], 0.0)
    y = y.reshape(y.shape[0], -1)
    y = jnp.maximum(y @ params["f1w"].T + params["f1b"], 0.0)
    logits = y @ params["f2w"].T + params["f2b"]
    return jax.nn.log_softmax(logits, axis=1)


# ------------------------------------------------------------------ params
def init_params(key):
    ks = jax.random.split(key, 8)
    s = 0.05
    return {
        "c1w": s * jax.random.normal(ks[0], (10, 1, 5, 5), jnp.float32),
        "c1b": s * jax.random.normal(ks[1], (10,), jnp.float32),
        "c2w": s * jax.random.normal(ks[2], (20, 10, 3, 3), jnp.float32),
        "c2b": s * jax.random.normal(ks[3], (20,), jnp.float32),
        "f1w": s * jax.random.normal(ks[4], (500, 2000), jnp.float32),
        "f1b": s * jax.random.normal(ks[5], (500,), jnp.float32),
        "f2w": s * jax.random.normal(ks[6], (NUM_CLASSES, 500), jnp.float32),
        "f2b": s * jax.random.normal(ks[7], (NUM_CLASSES,), jnp.float32),
    }


if __name__ == "__main__":
    key = jax.random.PRNGKey(0)
    k_x, k_p = jax.random.split(key)
    # fc1 expects 2000 = 20 * 10 * 10 features => 28x28 single-channel input.
    # Batch 64 matches the original training script; grid = 4 blocks of 16.
    x = jax.random.normal(k_x, (64, 1, 28, 28), jnp.float32)
    params = init_params(k_p)
    prepped = prepare_params(params)   # one-time weight repack, outside jit

    fwd = jax.jit(conv_net_forward)
    out = jax.block_until_ready(fwd(x, prepped))

    ref = jax.block_until_ready(jax.jit(conv_net_reference)(x, params))
    assert out.shape == (64, NUM_CLASSES)
    # bf16 MXU operands (f32 accumulation) => loosened tolerance vs f32 reference.
    assert jnp.allclose(out, ref, atol=2e-2, rtol=2e-2), "Pallas output mismatch vs reference"
    print("KERNEL_OK")
</pallas_src>

<mosaic_0001>
module attributes {stable_mosaic.version = 11 : i64} {
  func.func @_lenet_fused_kernel(%arg0: i32, %arg1: memref<1x2x224x28xbf16, #tpu.memory_space<vmem>>, %arg2: memref<5x28x256xbf16, #tpu.memory_space<vmem>>, %arg3: memref<1x256xf32, #tpu.memory_space<vmem>>, %arg4: memref<3x120x200xbf16, #tpu.memory_space<vmem>>, %arg5: memref<1x200xf32, #tpu.memory_space<vmem>>, %arg6: memref<10x200x500xbf16, #tpu.memory_space<vmem>>, %arg7: memref<1x500xf32, #tpu.memory_space<vmem>>, %arg8: memref<500x10xbf16, #tpu.memory_space<vmem>>, %arg9: memref<1x10xf32, #tpu.memory_space<vmem>>, %arg10: memref<16x10xf32, #tpu.memory_space<vmem>>) attributes {dimension_semantics = [#tpu.dimension_semantics<parallel>], iteration_bounds = array<i64: 4>, scalar_prefetch = 0 : i64, scratch_operands = 0 : i64, tpu.core_type = #tpu.core_type<tc>, window_params = [{transform_indices = @transform_0, window_bounds = array<i64: 1, 2, 224, 28>}, {pipeline_mode = #tpu.pipeline_mode<synchronous>, transform_indices = @transform_1, window_bounds = array<i64: 5, 28, 256>}, {pipeline_mode = #tpu.pipeline_mode<synchronous>, transform_indices = @transform_2, window_bounds = array<i64: 1, 256>}, {pipeline_mode = #tpu.pipeline_mode<synchronous>, transform_indices = @transform_3, window_bounds = array<i64: 3, 120, 200>}, {pipeline_mode = #tpu.pipeline_mode<synchronous>, transform_indices = @transform_4, window_bounds = array<i64: 1, 200>}, {pipeline_mode = #tpu.pipeline_mode<synchronous>, transform_indices = @transform_5, window_bounds = array<i64: 10, 200, 500>}, {pipeline_mode = #tpu.pipeline_mode<synchronous>, transform_indices = @transform_6, window_bounds = array<i64: 1, 500>}, {pipeline_mode = #tpu.pipeline_mode<synchronous>, transform_indices = @transform_7, window_bounds = array<i64: 500, 10>}, {pipeline_mode = #tpu.pipeline_mode<synchronous>, transform_indices = @transform_8, window_bounds = array<i64: 1, 10>}, {transform_indices = @transform_9, window_bounds = array<i64: 16, 10>}]} {
    %cst = arith.constant 0.000000e+00 : f32
    %0 = vector.broadcast %cst : f32 to vector<384x256xf32>
    %c0 = arith.constant 0 : index
    %c0_0 = arith.constant 0 : index
    %c0_1 = arith.constant 0 : index
    %c0_2 = arith.constant 0 : index
    %1 = vector.load %arg1[%c0, %c0_0, %c0_1, %c0_2] : memref<1x2x224x28xbf16, #tpu.memory_space<vmem>>, vector<1x1x192x28xbf16>
    %2 = vector.shape_cast %1 : vector<1x1x192x28xbf16> to vector<192x28xbf16>
    %c0_3 = arith.constant 0 : index
    %c1 = arith.constant 1 : index
    %c0_4 = arith.constant 0 : index
    %c0_5 = arith.constant 0 : index
    %3 = vector.load %arg1[%c0_3, %c1, %c0_4, %c0_5] : memref<1x2x224x28xbf16, #tpu.memory_space<vmem>>, vector<1x1x192x28xbf16>
    %4 = vector.shape_cast %3 : vector<1x1x192x28xbf16> to vector<192x28xbf16>
    %5 = tpu.concatenate %2, %4 in 0 : vector<192x28xbf16>, vector<192x28xbf16> -> vector<384x28xbf16>
    %c0_6 = arith.constant 0 : index
    %c0_7 = arith.constant 0 : index
    %c0_8 = arith.constant 0 : index
    %6 = vector.load %arg2[%c0_6, %c0_7, %c0_8] : memref<5x28x256xbf16, #tpu.memory_space<vmem>>, vector<1x28x256xbf16>
    %7 = vector.shape_cast %6 : vector<1x28x256xbf16> to vector<28x256xbf16>
    %cst_9 = arith.constant dense<0.000000e+00> : vector<384x256xf32>
    %8 = tpu.matmul %5, %7, %cst_9 {dimension_numbers = #tpu.dot_dimension_numbers<[1], [0], [0], [1], [0, 0, 1, 1], [], []>} : vector<384x28xbf16>, vector<28x256xbf16>, vector<384x256xf32> -> vector<384x256xf32>
    %9 = arith.addf %0, %8 : vector<384x256xf32>
    %c0_10 = arith.constant 0 : index
    %c1_11 = arith.constant 1 : index
    %c0_12 = arith.constant 0 : index
    %c0_13 = arith.constant 0 : index
    %10 = vector.load %arg1[%c0_10, %c1_11, %c0_12, %c0_13] : memref<1x2x224x28xbf16, #tpu.memory_space<vmem>>, vector<1x1x192x28xbf16>
    %11 = vector.shape_cast %10 : vector<1x1x192x28xbf16> to vector<192x28xbf16>
    %c0_14 = arith.constant 0 : index
    %c0_15 = arith.constant 0 : index
    %c16 = arith.constant 16 : index
    %c0_16 = arith.constant 0 : index
    %12 = vector.load %arg1[%c0_14, %c0_15, %c16, %c0_16] : memref<1x2x224x28xbf16, #tpu.memory_space<vmem>>, vector<1x1x192x28xbf16>
    %13 = vector.shape_cast %12 : vector<1x1x192x28xbf16> to vector<192x28xbf16>
    %14 = tpu.concatenate %11, %13 in 0 : vector<192x28xbf16>, vector<192x28xbf16> -> vector<384x28xbf16>
    %c1_17 = arith.constant 1 : index
    %c0_18 = arith.constant 0 : index
    %c0_19 = arith.constant 0 : index
    %15 = vector.load %arg2[%c1_17, %c0_18, %c0_19] : memref<5x28x256xbf16, #tpu.memory_space<vmem>>, vector<1x28x256xbf16>
    %16 = vector.shape_cast %15 : vector<1x28x256xbf16> to vector<28x256xbf16>
    %cst_20 = arith.constant dense<0.000000e+00> : vector<384x256xf32>
    %17 = tpu.matmul %14, %16, %cst_20 {dimension_numbers = #tpu.dot_dimension_numbers<[1], [0], [0], [1], [0, 0, 1, 1], [], []>} : vector<384x28xbf16>, vector<28x256xbf16>, vector<384x256xf32> -> vector<384x256xf32>
    %18 = arith.addf %9, %17 : vector<384x256xf32>
    %c0_21 = arith.constant 0 : index
    %c0_22 = arith.constant 0 : index
    %c16_23 = arith.constant 16 : index
    %c0_24 = arith.constant 0 : index
    %19 = vector.load %arg1[%c0_21, %c0_22, %c16_23, %c0_24] : memref<1x2x224x28xbf16, #tpu.memory_space<vmem>>, vector<1x1x192x28xbf16>
    %20 = vector.shape_cast %19 : vector<1x1x192x28xbf16> to vector<192x28xbf16>
    %c0_25 = arith.constant 0 : index
    %c1_26 = arith.constant 1 : index
    %c16_27 = arith.constant 16 : index
    %c0_28 = arith.constant 0 : index
    %21 = vector.load %arg1[%c0_25, %c1_26, %c16_27, %c0_28] : memref<1x2x224x28xbf16, #tpu.memory_space<vmem>>, vector<1x1x192x28xbf16>
    %22 = vector.shape_cast %21 : vector<1x1x192x28xbf16> to vector<192x28xbf16>
    %23 = tpu.concatenate %20, %22 in 0 : vector<192x28xbf16>, vector<192x28xbf16> -> vector<384x28xbf16>
    %c2 = arith.constant 2 : index
    %c0_29 = arith.constant 0 : index
    %c0_30 = arith.constant 0 : index
    %24 = vector.load %arg2[%c2, %c0_29, %c0_30] : memref<5x28x256xbf16, #tpu.memory_space<vmem>>, vector<1x28x256xbf16>
    %25 = vector.shape_cast %24 : vector<1x28x256xbf16> to vector<28x256xbf16>
    %cst_31 = arith.constant dense<0.000000e+00> : vector<384x256xf32>
    %26 = tpu.matmul %23, %25, %cst_31 {dimension_numbers = #tpu.dot_dimension_numbers<[1], [0], [0], [1], [0, 0, 1, 1], [], []>} : vector<384x28xbf16>, vector<28x256xbf16>, vector<384x256xf32> -> vector<384x256xf32>
    %27 = arith.addf %18, %26 : vector<384x256xf32>
    %c0_32 = arith.constant 0 : index
    %c1_33 = arith.constant 1 : index
    %c16_34 = arith.constant 16 : index
    %c0_35 = arith.constant 0 : index
    %28 = vector.load %arg1[%c0_32, %c1_33, %c16_34, %c0_35] : memref<1x2x224x28xbf16, #tpu.memory_space<vmem>>, vector<1x1x192x28xbf16>
    %29 = vector.shape_cast %28 : vector<1x1x192x28xbf16> to vector<192x28xbf16>
    %c0_36 = arith.constant 0 : index
    %c0_37 = arith.constant 0 : index
    %c32 = arith.constant 32 : index
    %c0_38 = arith.constant 0 : index
    %30 = vector.load %arg1[%c0_36, %c0_37, %c32, %c0_38] : memref<1x2x224x28xbf16, #tpu.memory_space<vmem>>, vector<1x1x192x28xbf16>
    %31 = vector.shape_cast %30 : vector<1x1x192x28xbf16> to vector<192x28xbf16>
    %32 = tpu.concatenate %29, %31 in 0 : vector<192x28xbf16>, vector<192x28xbf16> -> vector<384x28xbf16>
    %c3 = arith.constant 3 : index
    %c0_39 = arith.constant 0 : index
    %c0_40 = arith.constant 0 : index
    %33 = vector.load %arg2[%c3, %c0_39, %c0_40] : memref<5x28x256xbf16, #tpu.memory_space<vmem>>, vector<1x28x256xbf16>
    %34 = vector.shape_cast %33 : vector<1x28x256xbf16> to vector<28x256xbf16>
    %cst_41 = arith.constant dense<0.000000e+00> : vector<384x256xf32>
    %35 = tpu.matmul %32, %34, %cst_41 {dimension_numbers = #tpu.dot_dimension_numbers<[1], [0], [0], [1], [0, 0, 1, 1], [], []>} : vector<384x28xbf16>, vector<28x256xbf16>, vector<384x256xf32> -> vector<384x256xf32>
    %36 = arith.addf %27, %35 : vector<384x256xf32>
    %c0_42 = arith.constant 0 : index
    %c0_43 = arith.constant 0 : index
    %c32_44 = arith.constant 32 : index
    %c0_45 = arith.constant 0 : index
    %37 = vector.load %arg1[%c0_42, %c0_43, %c32_44, %c0_45] : memref<1x2x224x28xbf16, #tpu.memory_space<vmem>>, vector<1x1x192x28xbf16>
    %38 = vector.shape_cast %37 : vector<1x1x192x28xbf16> to vector<192x28xbf16>
    %c0_46 = arith.constant 0 : index
    %c1_47 = arith.constant 1 : index
    %c32_48 = arith.constant 32 : index
    %c0_49 = arith.constant 0 : index
    %39 = vector.load %arg1[%c0_46, %c1_47, %c32_48, %c0_49] : memref<1x2x224x28xbf16, #tpu.memory_space<vmem>>, vector<1x1x192x28xbf16>
    %40 = vector.shape_cast %39 : vector<1x1x192x28xbf16> to vector<192x28xbf16>
    %41 = tpu.concatenate %38, %40 in 0 : vector<192x28xbf16>, vector<192x28xbf16> -> vector<384x28xbf16>
    %c4 = arith.constant 4 : index
    %c0_50 = arith.constant 0 : index
    %c0_51 = arith.constant 0 : index
    %42 = vector.load %arg2[%c4, %c0_50, %c0_51] : memref<5x28x256xbf16, #tpu.memory_space<vmem>>, vector<1x28x256xbf16>
    %43 = vector.shape_cast %42 : vector<1x28x256xbf16> to vector<28x256xbf16>
    %cst_52 = arith.constant dense<0.000000e+00> : vector<384x256xf32>
    %44 = tpu.matmul %41, %43, %cst_52 {dimension_numbers = #tpu.dot_dimension_numbers<[1], [0], [0], [1], [0, 0, 1, 1], [], []>} : vector<384x28xbf16>, vector<28x256xbf16>, vector<384x256xf32> -> vector<384x256xf32>
    %45 = arith.addf %36, %44 : vector<384x256xf32>
    %c0_53 = arith.constant 0 : index
    %c0_54 = arith.constant 0 : index
    %46 = vector.load %arg3[%c0_53, %c0_54] : memref<1x256xf32, #tpu.memory_space<vmem>>, vector<1x256xf32>
    %47 = vector.broadcast %46 : vector<1x256xf32> to vector<384x256xf32>
    %48 = arith.addf %45, %47 : vector<384x256xf32>
    %cst_55 = arith.constant 0.000000e+00 : f32
    %49 = vector.broadcast %cst_55 : f32 to vector<384x256xf32>
    %50 = arith.maximumf %48, %49 : vector<384x256xf32>
    %51 = vector.extract_strided_slice %50 {offsets = [0, 0], sizes = [192, 256], strides = [1, 1]} : vector<384x256xf32> to vector<192x256xf32>
    %52 = vector.extract_strided_slice %50 {offsets = [192, 0], sizes = [192, 256], strides = [1, 1]} : vector<384x256xf32> to vector<192x256xf32>
    %53 = arith.maximumf %51, %52 : vector<192x256xf32>
    %54 = vector.extract_strided_slice %53 {offsets = [0, 0], sizes = [192, 120], strides = [1, 1]} : vector<192x256xf32> to vector<192x120xf32>
    %55 = vector.extract_strided_slice %53 {offsets = [0, 128], sizes = [192, 120], strides = [1, 1]} : vector<192x256xf32> to vector<192x120xf32>
    %56 = arith.maximumf %54, %55 : vector<192x120xf32>
    %57 = arith.truncf %56 : vector<192x120xf32> to vector<192x120xbf16>
    %cst_56 = arith.constant 0.000000e+00 : f32
    %58 = vector.broadcast %cst_56 : f32 to vector<160x200xf32>
    %59 = vector.extract_strided_slice %57 {offsets = [0, 0], sizes = [160, 120], strides = [1, 1]} : vector<192x120xbf16> to vector<160x120xbf16>
    %c0_57 = arith.constant 0 : index
    %c0_58 = arith.constant 0 : index
    %c0_59 = arith.constant 0 : index
    %60 = vector.load %arg4[%c0_57, %c0_58, %c0_59] : memref<3x120x200xbf16, #tpu.memory_space<vmem>>, vector<1x120x200xbf16>
    %61 = vector.shape_cast %60 : vector<1x120x200xbf16> to vector<120x200xbf16>
    %cst_60 = arith.constant dense<0.000000e+00> : vector<160x200xf32>
    %62 = tpu.matmul %59, %61, %cst_60 {dimension_numbers = #tpu.dot_dimension_numbers<[1], [0], [0], [1], [0, 0, 1, 1], [], []>} : vector<160x120xbf16>, vector<120x200xbf16>, vector<160x200xf32> -> vector<160x200xf32>
    %63 = arith.addf %58, %62 : vector<160x200xf32>
    %64 = vector.extract_strided_slice %57 {offsets = [16, 0], sizes = [160, 120], strides = [1, 1]} : vector<192x120xbf16> to vector<160x120xbf16>
    %c1_61 = arith.constant 1 : index
    %c0_62 = arith.constant 0 : index
    %c0_63 = arith.constant 0 : index
    %65 = vector.load %arg4[%c1_61, %c0_62, %c0_63] : memref<3x120x200xbf16, #tpu.memory_space<vmem>>, vector<1x120x200xbf16>
    %66 = vector.shape_cast %65 : vector<1x120x200xbf16> to vector<120x200xbf16>
    %cst_64 = arith.constant dense<0.000000e+00> : vector<160x200xf32>
    %67 = tpu.matmul %64, %66, %cst_64 {dimension_numbers = #tpu.dot_dimension_numbers<[1], [0], [0], [1], [0, 0, 1, 1], [], []>} : vector<160x120xbf16>, vector<120x200xbf16>, vector<160x200xf32> -> vector<160x200xf32>
    %68 = arith.addf %63, %67 : vector<160x200xf32>
    %69 = vector.extract_strided_slice %57 {offsets = [32, 0], sizes = [160, 120], strides = [1, 1]} : vector<192x120xbf16> to vector<160x120xbf16>
    %c2_65 = arith.constant 2 : index
    %c0_66 = arith.constant 0 : index
    %c0_67 = arith.constant 0 : index
    %70 = vector.load %arg4[%c2_65, %c0_66, %c0_67] : memref<3x120x200xbf16, #tpu.memory_space<vmem>>, vector<1x120x200xbf16>
    %71 = vector.shape_cast %70 : vector<1x120x200xbf16> to vector<120x200xbf16>
    %cst_68 = arith.constant dense<0.000000e+00> : vector<160x200xf32>
    %72 = tpu.matmul %69, %71, %cst_68 {dimension_numbers = #tpu.dot_dimension_numbers<[1], [0], [0], [1], [0, 0, 1, 1], [], []>} : vector<160x120xbf16>, vector<120x200xbf16>, vector<160x200xf32> -> vector<160x200xf32>
    %73 = arith.addf %68, %72 : vector<160x200xf32>
    %c0_69 = arith.constant 0 : index
    %c0_70 = arith.constant 0 : index
    %74 = vector.load %arg5[%c0_69, %c0_70] : memref<1x200xf32, #tpu.memory_space<vmem>>, vector<1x200xf32>
    %75 = vector.broadcast %74 : vector<1x200xf32> to vector<160x200xf32>
    %76 = arith.addf %73, %75 : vector<160x200xf32>
    %cst_71 = arith.constant 0.000000e+00 : f32
    %77 = vector.broadcast %cst_71 : f32 to vector<160x200xf32>
    %78 = arith.maximumf %76, %77 : vector<160x200xf32>
    %79 = arith.truncf %78 : vector<160x200xf32> to vector<160x200xbf16>
    %cst_72 = arith.constant 0.000000e+00 : f32
    %80 = vector.broadcast %cst_72 : f32 to vector<16x500xf32>
    %81 = vector.extract_strided_slice %79 {offsets = [0, 0], sizes = [16, 200], strides = [1, 1]} : vector<160x200xbf16> to vector<16x200xbf16>
    %c0_73 = arith.constant 0 : index
    %c0_74 = arith.constant 0 : index
    %c0_75 = arith.constant 0 : index
    %82 = vector.load %arg6[%c0_73, %c0_74, %c0_75] : memref<10x200x500xbf16, #tpu.memory_space<vmem>>, vector<1x200x500xbf16>
    %83 = vector.shape_cast %82 : vector<1x200x500xbf16> to vector<200x500xbf16>
    %cst_76 = arith.constant dense<0.000000e+00> : vector<16x500xf32>
    %84 = tpu.matmul %81, %83, %cst_76 {dimension_numbers = #tpu.dot_dimension_numbers<[1], [0], [0], [1], [0, 0, 1, 1], [], []>} : vector<16x200xbf16>, vector<200x500xbf16>, vector<16x500xf32> -> vector<16x500xf32>
    %85 = arith.addf %80, %84 : vector<16x500xf32>
    %86 = vector.extract_strided_slice %79 {offsets = [16, 0], sizes = [16, 200], strides = [1, 1]} : vector<160x200xbf16> to vector<16x200xbf16>
    %c1_77 = arith.constant 1 : index
    %c0_78 = arith.constant 0 : index
    %c0_79 = arith.constant 0 : index
    %87 = vector.load %arg6[%c1_77, %c0_78, %c0_79] : memref<10x200x500xbf16, #tpu.memory_space<vmem>>, vector<1x200x500xbf16>
    %88 = vector.shape_cast %87 : vector<1x200x500xbf16> to vector<200x500xbf16>
    %cst_80 = arith.constant dense<0.000000e+00> : vector<16x500xf32>
    %89 = tpu.matmul %86, %88, %cst_80 {dimension_numbers = #tpu.dot_dimension_numbers<[1], [0], [0], [1], [0, 0, 1, 1], [], []>} : vector<16x200xbf16>, vector<200x500xbf16>, vector<16x500xf32> -> vector<16x500xf32>
    %90 = arith.addf %85, %89 : vector<16x500xf32>
    %91 = vector.extract_strided_slice %79 {offsets = [32, 0], sizes = [16, 200], strides = [1, 1]} : vector<160x200xbf16> to vector<16x200xbf16>
    %c2_81 = arith.constant 2 : index
    %c0_82 = arith.constant 0 : index
    %c0_83 = arith.constant 0 : index
    %92 = vector.load %arg6[%c2_81, %c0_82, %c0_83] : memref<10x200x500xbf16, #tpu.memory_space<vmem>>, vector<1x200x500xbf16>
    %93 = vector.shape_cast %92 : vector<1x200x500xbf16> to vector<200x500xbf16>
    %cst_84 = arith.constant dense<0.000000e+00> : vector<16x500xf32>
    %94 = tpu.matmul %91, %93, %cst_84 {dimension_numbers = #tpu.dot_dimension_numbers<[1], [0], [0], [1], [0, 0, 1, 1], [], []>} : vector<16x200xbf16>, vector<200x500xbf16>, vector<16x500xf32> -> vector<16x500xf32>
    %95 = arith.addf %90, %94 : vector<16x500xf32>
    %96 = vector.extract_strided_slice %79 {offsets = [48, 0], sizes = [16, 200], strides = [1, 1]} : vector<160x200xbf16> to vector<16x200xbf16>
    %c3_85 = arith.constant 3 : index
    %c0_86 = arith.constant 0 : index
    %c0_87 = arith.constant 0 : index
    %97 = vector.load %arg6[%c3_85, %c0_86, %c0_87] : memref<10x200x500xbf16, #tpu.memory_space<vmem>>, vector<1x200x500xbf16>
    %98 = vector.shape_cast %97 : vector<1x200x500xbf16> to vector<200x500xbf16>
    %cst_88 = arith.constant dense<0.000000e+00> : vector<16x500xf32>
    %99 = tpu.matmul %96, %98, %cst_88 {dimension_numbers = #tpu.dot_dimension_numbers<[1], [0], [0], [1], [0, 0, 1, 1], [], []>} : vector<16x200xbf16>, vector<200x500xbf16>, vector<16x500xf32> -> vector<16x500xf32>
    %100 = arith.addf %95, %99 : vector<16x500xf32>
    %101 = vector.extract_strided_slice %79 {offsets = [64, 0], sizes = [16, 200], strides = [1, 1]} : vector<160x200xbf16> to vector<16x200xbf16>
    %c4_89 = arith.constant 4 : index
    %c0_90 = arith.constant 0 : index
    %c0_91 = arith.constant 0 : index
    %102 = vector.load %arg6[%c4_89, %c0_90, %c0_91] : memref<10x200x500xbf16, #tpu.memory_space<vmem>>, vector<1x200x500xbf16>
    %103 = vector.shape_cast %102 : vector<1x200x500xbf16> to vector<200x500xbf16>
    %cst_92 = arith.constant dense<0.000000e+00> : vector<16x500xf32>
    %104 = tpu.matmul %101, %103, %cst_92 {dimension_numbers = #tpu.dot_dimension_numbers<[1], [0], [0], [1], [0, 0, 1, 1], [], []>} : vector<16x200xbf16>, vector<200x500xbf16>, vector<16x500xf32> -> vector<16x500xf32>
    %105 = arith.addf %100, %104 : vector<16x500xf32>
    %106 = vector.extract_strided_slice %79 {offsets = [80, 0], sizes = [16, 200], strides = [1, 1]} : vector<160x200xbf16> to vector<16x200xbf16>
    %c5 = arith.constant 5 : index
    %c0_93 = arith.constant 0 : index
    %c0_94 = arith.constant 0 : index
    %107 = vector.load %arg6[%c5, %c0_93, %c0_94] : memref<10x200x500xbf16, #tpu.memory_space<vmem>>, vector<1x200x500xbf16>
    %108 = vector.shape_cast %107 : vector<1x200x500xbf16> to vector<200x500xbf16>
    %cst_95 = arith.constant dense<0.000000e+00> : vector<16x500xf32>
    %109 = tpu.matmul %106, %108, %cst_95 {dimension_numbers = #tpu.dot_dimension_numbers<[1], [0], [0], [1], [0, 0, 1, 1], [], []>} : vector<16x200xbf16>, vector<200x500xbf16>, vector<16x500xf32> -> vector<16x500xf32>
    %110 = arith.addf %105, %109 : vector<16x500xf32>
    %111 = vector.extract_strided_slice %79 {offsets = [96, 0], sizes = [16, 200], strides = [1, 1]} : vector<160x200xbf16> to vector<16x200xbf16>
    %c6 = arith.constant 6 : index
    %c0_96 = arith.constant 0 : index
    %c0_97 = arith.constant 0 : index
    %112 = vector.load %arg6[%c6, %c0_96, %c0_97] : memref<10x200x500xbf16, #tpu.memory_space<vmem>>, vector<1x200x500xbf16>
    %113 = vector.shape_cast %112 : vector<1x200x500xbf16> to vector<200x500xbf16>
    %cst_98 = arith.constant dense<0.000000e+00> : vector<16x500xf32>
    %114 = tpu.matmul %111, %113, %cst_98 {dimension_numbers = #tpu.dot_dimension_numbers<[1], [0], [0], [1], [0, 0, 1, 1], [], []>} : vector<16x200xbf16>, vector<200x500xbf16>, vector<16x500xf32> -> vector<16x500xf32>
    %115 = arith.addf %110, %114 : vector<16x500xf32>
    %116 = vector.extract_strided_slice %79 {offsets = [112, 0], sizes = [16, 200], strides = [1, 1]} : vector<160x200xbf16> to vector<16x200xbf16>
    %c7 = arith.constant 7 : index
    %c0_99 = arith.constant 0 : index
    %c0_100 = arith.constant 0 : index
    %117 = vector.load %arg6[%c7, %c0_99, %c0_100] : memref<10x200x500xbf16, #tpu.memory_space<vmem>>, vector<1x200x500xbf16>
    %118 = vector.shape_cast %117 : vector<1x200x500xbf16> to vector<200x500xbf16>
    %cst_101 = arith.constant dense<0.000000e+00> : vector<16x500xf32>
    %119 = tpu.matmul %116, %118, %cst_101 {dimension_numbers = #tpu.dot_dimension_numbers<[1], [0], [0], [1], [0, 0, 1, 1], [], []>} : vector<16x200xbf16>, vector<200x500xbf16>, vector<16x500xf32> -> vector<16x500xf32>
    %120 = arith.addf %115, %119 : vector<16x500xf32>
    %121 = vector.extract_strided_slice %79 {offsets = [128, 0], sizes = [16, 200], strides = [1, 1]} : vector<160x200xbf16> to vector<16x200xbf16>
    %c8 = arith.constant 8 : index
    %c0_102 = arith.constant 0 : index
    %c0_103 = arith.constant 0 : index
    %122 = vector.load %arg6[%c8, %c0_102, %c0_103] : memref<10x200x500xbf16, #tpu.memory_space<vmem>>, vector<1x200x500xbf16>
    %123 = vector.shape_cast %122 : vector<1x200x500xbf16> to vector<200x500xbf16>
    %cst_104 = arith.constant dense<0.000000e+00> : vector<16x500xf32>
    %124 = tpu.matmul %121, %123, %cst_104 {dimension_numbers = #tpu.dot_dimension_numbers<[1], [0], [0], [1], [0, 0, 1, 1], [], []>} : vector<16x200xbf16>, vector<200x500xbf16>, vector<16x500xf32> -> vector<16x500xf32>
    %125 = arith.addf %120, %124 : vector<16x500xf32>
    %126 = vector.extract_strided_slice %79 {offsets = [144, 0], sizes = [16, 200], strides = [1, 1]} : vector<160x200xbf16> to vector<16x200xbf16>
    %c9 = arith.constant 9 : index
    %c0_105 = arith.constant 0 : index
    %c0_106 = arith.constant 0 : index
    %127 = vector.load %arg6[%c9, %c0_105, %c0_106] : memref<10x200x500xbf16, #tpu.memory_space<vmem>>, vector<1x200x500xbf16>
    %128 = vector.shape_cast %127 : vector<1x200x500xbf16> to vector<200x500xbf16>
    %cst_107 = arith.constant dense<0.000000e+00> : vector<16x500xf32>
    %129 = tpu.matmul %126, %128, %cst_107 {dimension_numbers = #tpu.dot_dimension_numbers<[1], [0], [0], [1], [0, 0, 1, 1], [], []>} : vector<16x200xbf16>, vector<200x500xbf16>, vector<16x500xf32> -> vector<16x500xf32>
    %130 = arith.addf %125, %129 : vector<16x500xf32>
    %c0_108 = arith.constant 0 : index
    %c0_109 = arith.constant 0 : index
    %131 = vector.load %arg7[%c0_108, %c0_109] : memref<1x500xf32, #tpu.memory_space<vmem>>, vector<1x500xf32>
    %132 = vector.broadcast %131 : vector<1x500xf32> to vector<16x500xf32>
    %133 = arith.addf %130, %132 : vector<16x500xf32>
    %cst_110 = arith.constant 0.000000e+00 : f32
    %134 = vector.broadcast %cst_110 : f32 to vector<16x500xf32>
    %135 = arith.maximumf %133, %134 : vector<16x500xf32>
    %136 = arith.truncf %135 : vector<16x500xf32> to vector<16x500xbf16>
    %c0_111 = arith.constant 0 : index
    %c0_112 = arith.constant 0 : index
    %137 = vector.load %arg8[%c0_111, %c0_112] : memref<500x10xbf16, #tpu.memory_space<vmem>>, vector<500x10xbf16>
    %cst_113 = arith.constant dense<0.000000e+00> : vector<16x10xf32>
    %138 = tpu.matmul %136, %137, %cst_113 {dimension_numbers = #tpu.dot_dimension_numbers<[1], [0], [0], [1], [0, 0, 1, 1], [], []>} : vector<16x500xbf16>, vector<500x10xbf16>, vector<16x10xf32> -> vector<16x10xf32>
    %c0_114 = arith.constant 0 : index
    %c0_115 = arith.constant 0 : index
    %139 = vector.load %arg9[%c0_114, %c0_115] : memref<1x10xf32, #tpu.memory_space<vmem>>, vector<1x10xf32>
    %140 = vector.broadcast %139 : vector<1x10xf32> to vector<16x10xf32>
    %141 = arith.addf %138, %140 : vector<16x10xf32>
    %cst_116 = arith.constant dense<0xFF800000> : vector<16xf32>
    %142 = vector.multi_reduction <maximumf>, %141, %cst_116 [1] : vector<16x10xf32> to vector<16xf32>
    %143 = vector.shape_cast %142 : vector<16xf32> to vector<16x1xf32>
    %144 = vector.broadcast %143 : vector<16x1xf32> to vector<16x10xf32>
    %145 = arith.subf %141, %144 : vector<16x10xf32>
    %146 = math.exp %145 : vector<16x10xf32>
    %cst_117 = arith.constant dense<0.000000e+00> : vector<16xf32>
    %147 = vector.multi_reduction <add>, %146, %cst_117 [1] : vector<16x10xf32> to vector<16xf32>
    %148 = vector.shape_cast %147 : vector<16xf32> to vector<16x1xf32>
    %149 = math.log %148 : vector<16x1xf32>
    %150 = arith.addf %143, %149 : vector<16x1xf32>
    %151 = vector.broadcast %150 : vector<16x1xf32> to vector<16x10xf32>
    %152 = arith.subf %141, %151 : vector<16x10xf32>
    %c0_118 = arith.constant 0 : index
    %c0_119 = arith.constant 0 : index
    %153 = vector.load %arg10[%c0_118, %c0_119] : memref<16x10xf32, #tpu.memory_space<vmem>>, vector<16x10xf32>
    tpu.vector_store %arg10[%c0_118, %c0_119], %152 {strides = array<i32>} : memref<16x10xf32, #tpu.memory_space<vmem>>, vector<16x10xf32>,
    return
  }
  func.func @transform_0(%arg0: i32) -> (i32, i32, i32, i32) {
    %c0_i32 = arith.constant 0 : i32
    %c0_i32_0 = arith.constant 0 : i32
    %c0_i32_1 = arith.constant 0 : i32
    %c0_i32_2 = arith.constant 0 : i32
    return %arg0, %c0_i32, %c0_i32_0, %c0_i32_1 : i32, i32, i32, i32
  }
  func.func @transform_1(%arg0: i32) -> (i32, i32, i32) {
    %c0_i32 = arith.constant 0 : i32
    %c0_i32_0 = arith.constant 0 : i32
    %c0_i32_1 = arith.constant 0 : i32
    %c0_i32_2 = arith.constant 0 : i32
    return %c0_i32, %c0_i32_0, %c0_i32_1 : i32, i32, i32
  }
  func.func @transform_2(%arg0: i32) -> (i32, i32) {
    %c0_i32 = arith.constant 0 : i32
    %c0_i32_0 = arith.constant 0 : i32
    %c0_i32_1 = arith.constant 0 : i32
    return %c0_i32, %c0_i32_0 : i32, i32
  }
  func.func @transform_3(%arg0: i32) -> (i32, i32, i32) {
    %c0_i32 = arith.constant 0 : i32
    %c0_i32_0 = arith.constant 0 : i32
    %c0_i32_1 = arith.constant 0 : i32
    %c0_i32_2 = arith.constant 0 : i32
    return %c0_i32, %c0_i32_0, %c0_i32_1 : i32, i32, i32
  }
  func.func @transform_4(%arg0: i32) -> (i32, i32) {
    %c0_i32 = arith.constant 0 : i32
    %c0_i32_0 = arith.constant 0 : i32
    %c0_i32_1 = arith.constant 0 : i32
    return %c0_i32, %c0_i32_0 : i32, i32
  }
  func.func @transform_5(%arg0: i32) -> (i32, i32, i32) {
    %c0_i32 = arith.constant 0 : i32
    %c0_i32_0 = arith.constant 0 : i32
    %c0_i32_1 = arith.constant 0 : i32
    %c0_i32_2 = arith.constant 0 : i32
    return %c0_i32, %c0_i32_0, %c0_i32_1 : i32, i32, i32
  }
  func.func @transform_6(%arg0: i32) -> (i32, i32) {
    %c0_i32 = arith.constant 0 : i32
    %c0_i32_0 = arith.constant 0 : i32
    %c0_i32_1 = arith.constant 0 : i32
    return %c0_i32, %c0_i32_0 : i32, i32
  }
  func.func @transform_7(%arg0: i32) -> (i32, i32) {
    %c0_i32 = arith.constant 0 : i32
    %c0_i32_0 = arith.constant 0 : i32
    %c0_i32_1 = arith.constant 0 : i32
    return %c0_i32, %c0_i32_0 : i32, i32
  }
  func.func @transform_8(%arg0: i32) -> (i32, i32) {
    %c0_i32 = arith.constant 0 : i32
    %c0_i32_0 = arith.constant 0 : i32
    %c0_i32_1 = arith.constant 0 : i32
    return %c0_i32, %c0_i32_0 : i32, i32
  }
  func.func @transform_9(%arg0: i32) -> (i32, i32) {
    %c0_i32 = arith.constant 0 : i32
    %c0_i32_0 = arith.constant 0 : i32
    return %arg0, %c0_i32 : i32, i32
  }
}

</mosaic_0001>

<bundles_post_ra>
// kernel: conv_net_forward.1
= control target key start
LH: loop header
LB: loop body
LE: loop exit
PB: predicated region body
PF: predicated region fallthrough
CT: control target
= control target key end

     0   :  { %s11556_s30 = smov 0   ;;  %s14407_s0 = inlined_call_operand.vmem [shape: bf16[4,2,224,28], index: 0, kind: input, shape index: {}]   ;;  %s14408_s1 = inlined_call_operand.vmem [shape: bf16[5,28,256], index: 1, kind: input, shape index: {}]   ;;  %s14409_s2 = inlined_call_operand.vmem [shape: f32[1,256], index: 2, kind: input, shape index: {}]   ;;  %s14410_s3 = inlined_call_operand.vmem [shape: bf16[3,120,200], index: 3, kind: input, shape index: {}]   ;;  %s14411_s4 = inlined_call_operand.vmem [shape: f32[1,200], index: 4, kind: input, shape index: {}]   ;;  %s14412_s5 = inlined_call_operand.vmem [shape: bf16[10,200,500], index: 5, kind: input, shape index: {}]   ;;  %s14413_s6 = inlined_call_operand.vmem [shape: f32[1,500], index: 6, kind: input, shape index: {}]   ;;  %s14414_s7 = inlined_call_operand.vmem [shape: bf16[500,10], index: 7, kind: input, shape index: {}]   ;;  %s14415_s8 = inlined_call_operand.vmem [shape: f32[1,10], index: 8, kind: input, shape index: {}]   ;;  %s14416_s9 = inlined_call_operand.vmem [shape: f32[64,10], index: 9, kind: output, shape index: {}]  }
   0x1 LB: > { %s11562_s10 = sadd.s32 4294967295, %s11503_s30   ;;  %p8476_p0 = scmp.ge.s32.totalorder %s11503_s30, 1  ;;  %s11503_s30 = sphi %s11556_s30, %s19_s30  }
   0x2   : > { %p287_p1 = scmp.lt.s32.totalorder %s11503_s30, 5 }
   0x4   : > { %p288_p2 = pnand %p8476_p0, %p287_p1 }
   0x6   : > { %291 = sbr.rel (%p288_p2) target bundleno = 3122 (0xc32), region = 56 }
   0xd   : > { %v10522_v0 = vld [vmem:[%s14408_s1 + $0x24] ss:$8 sps:$4 sm:$0xff]   ;;  %vm611_vm0 = vcmask 1045504   ;;  %v10524_v1 = vld [vmem:[%s14408_s1 + $0x20] ss:$8 sps:$4 sm:$0xff]   ;;  %v14417_v2 = vmov 0  }
   0xe   : > { %650 = vmatprep.mubr.bf16.mxu0 %v14417_v2  ;;  %p323_p3 = scmp.lt.s32.totalorder %s11562_s10, 3  ;;  %3426 = vmatprep.mubr.bf16.mxu1 %v14417_v2  ;;  %v10525_v3 = vld [vmem:[%s14408_s1 + $0x34] ss:$8 sps:$4 sm:$0x3f]   ;;  %v10531_v6 = vld [vmem:[%s14408_s1 + $0x4] ss:$8 sps:$4 sm:$0xff]  }
   0xf   : > { %618 = vmatprep.subr.bf16.mxu0 %v10522_v0  ;;  %v10527_v4 = vld [vmem:[%s14408_s1 + $0x30] ss:$8 sps:$4 sm:$0x3f]   ;;  %v10529_v7 = vld [vmem:[%s14408_s1] ss:$8 sps:$4 sm:$0xff]   ;;  %vm538_vm1 = vcmask 228352  }
  0x10   : > { %619 = vmatpush1.bf16.msra.mxu0 %v10524_v1  ;;  %s324_s19 = scalar_select %p323_p3, %s11562_s10, 3  ;;  %v613_v5 = vsel %vm611_vm0, %v10527_v4, 0  ;;  %v10544_v8 = vld [vmem:[%s14408_s1 + $0x14] ss:$8 sps:$4 sm:$0x3f]   ;;  %vm3170_vm2 = vcmask 1043456  }
  0x11   : > { %8537 = vmatprep.subr.msk.bf16.mxu0 %vm611_vm0, %v10525_v3  ;;  %v10546_v9 = vld [vmem:[%s14408_s1 + $0x10] ss:$8 sps:$4 sm:$0x3f]   ;;  %v10561_v20 = vld [vmem:[%s14408_s1 + $0x44] ss:$8 sps:$4 sm:$0xff]   ;;  %vm3139_vm3 = vcmask 982016  }
  0x12   : > { %s10512_s22 = smul.u32 224, %s324_s19  ;;  %v913_v11 = vsel %vm611_vm0, %v10546_v9, 0  ;;  %v10559_v37 = vld [vmem:[%s14408_s1 + $0x40] ss:$8 sps:$4 sm:$0xff]   ;;  %v10567_v41 = vld [vmem:[%s14408_s1 + $0x64] ss:$8 sps:$4 sm:$0xff]  }
  0x13   : > { %v10562_v38 = vld [vmem:[%s14408_s1 + $0x54] ss:$8 sps:$4 sm:$0x3f]   ;;  %v10564_v39 = vld [vmem:[%s14408_s1 + $0x50] ss:$8 sps:$4 sm:$0x3f]  }
  0x14   : > { %621 = vmatpush1.bf16.msra.mxu0 %v613_v5  ;;  %s11599_s12 = scalar_lea.vmem %s14407_s0, %s10512_s22  ;;  %v1335_v40 = vsel %vm611_vm0, %v10564_v39, 0  ;;  %v10565_v54 = vld [vmem:[%s14408_s1 + $0x60] ss:$8 sps:$4 sm:$0xff]   ;;  %v10569_v55 = vld [vmem:[%s14408_s1 + $0x74] ss:$8 sps:$4 sm:$0x3f]  }
  0x15   : > { %v10528_v10 = vld [vmem:[%s11599_s12 + $0x70] sm:$0xff]   ;;  %918 = vmatprep.subr.bf16.mxu0 %v10531_v6  ;;  %v10532_v12 = vld [vmem:[%s11599_s12 + $0x78] sm:$0xff]   ;;  %v10533_v13 = vld [vmem:[%s11599_s12 + $0x80] sm:$0xff]   ;;  %vm4263_vm4 = vcmask 588800   ;;  %vm8301_vm5 = vcmask 1041408   ;;  %vm8297_vm6 = vcmask 949248  }
  0x16   : > { %v10534_v14 = vld [vmem:[%s11599_s12 + $0x88] sm:$0xff]   ;;  %v10535_v15 = vld [vmem:[%s11599_s12 + $0x90] sm:$0xff]   ;;  %v10536_v16 = vld [vmem:[%s11599_s12 + $0x98] sm:$0xff]   ;;  %vm8387_vm7 = vcmask 80896   ;;  %s8478_s24 = sshll.u32 %s11562_s10, 1 }
  0x17   : > { %8538 = vmatmul.mubr.msk.bf16.vlgmr.msra.gmra.mrb[0].mxu0 %vm538_vm1, %v10528_v10  ;;  %v10537_v17 = vld [vmem:[%s11599_s12 + $0xa0] sm:$0xff]   ;;  %v10538_v18 = vld [vmem:[%s11599_s12 + $0xa8] sm:$0xff]   ;;  %v10539_v19 = vld [vmem:[%s11599_s12 + $0xb0] sm:$0xff]   ;;  %p329_p4 = scmp.lt.s32.totalorder %s8478_s24, 7 }
  0x18   : > { %919 = vmatpush1.bf16.msra.mxu0 %v10529_v7  ;;  %660 = vmatprep.mubr.bf16.mxu0 %v14417_v2  ;;  %v10540_v21 = vld [vmem:[%s11599_s12 + $0xb8] sm:$0xff]   ;;  %v10541_v22 = vld [vmem:[%s11599_s12 + $0xc0] sm:$0xff]   ;;  %v10542_v23 = vld [vmem:[%s11599_s12 + $0xc8] sm:$0xff]  }
  0x19   : > { %8566 = vmatprep.subr.msk.bf16.mxu0 %vm611_vm0, %v10544_v8  ;;  %v10543_v24 = vld [vmem:[%s11599_s12 + $0x8] sm:$0xff]   ;;  %v10547_v25 = vld [vmem:[%s11599_s12 + $0x10] sm:$0xff]   ;;  %v10548_v26 = vld [vmem:[%s11599_s12 + $0x18] sm:$0xff]   ;;  %s14443_s24 = smov (!%p329_p4, %s8478_s24), 7 }
  0x1a   : > { %v11652_v27 = vld [vmem:[%s11599_s12 + $0x20] sm:$0xff]   ;;  %v11658_v28 = vld [vmem:[%s11599_s12 + $0x28] sm:$0xff]   ;;  %v11664_v29 = vld [vmem:[%s11599_s12 + $0x30] sm:$0xff]   ;;  %s8479_s25 = sshll.u32 %s14443_s24, 3 }
  0x1b   : > { %v11670_v30 = vld [vmem:[%s11599_s12 + $0x38] sm:$0xff]   ;;  %v11676_v31 = vld [vmem:[%s11599_s12 + $0x40] sm:$0xff]   ;;  %v11682_v32 = vld [vmem:[%s11599_s12 + $0x48] sm:$0xff]   ;;  %s332_s28 = scalar_lea.vmem %s14416_s9, %s8479_s25 }
  0x1c   : > { %921 = vmatpush1.bf16.msra.mxu0 %v913_v11  ;;  %v11688_v33 = vld [vmem:[%s11599_s12 + $0x50] sm:$0xff]   ;;  %v11694_v34 = vld [vmem:[%s11599_s12 + $0x58] sm:$0xff]   ;;  %v11700_v35 = vld [vmem:[%s11599_s12 + $0x60] sm:$0xff]  }
  0x1d   : > { %1340 = vmatprep.subr.bf16.mxu0 %v10561_v20  ;;  %v10558_v36 = vld [vmem:[%s11599_s12] sm:$0xff]   ;;  %v11482_v42 = vld [vmem:[%s11599_s12 + $0x70] sm:$0xff]   ;;  %v11483_v43 = vld [vmem:[%s11599_s12 + $0x78] sm:$0xff]  }
  0x1e   : > { %v11484_v44 = vld [vmem:[%s11599_s12 + $0x80] sm:$0xff]   ;;  %v11485_v45 = vld [vmem:[%s11599_s12 + $0x88] sm:$0xff]   ;;  %v11486_v46 = vld [vmem:[%s11599_s12 + $0x90] sm:$0xff]  }
  0x1f   : > { %8539 = vmatmul.mubr.msk.bf16.gmra.mrb[4].mxu0 %vm538_vm1, %v10532_v12  ;;  %v11487_v47 = vld [vmem:[%s11599_s12 + $0x98] sm:$0xff]   ;;  %v11488_v48 = vld [vmem:[%s11599_s12 + $0xa0] sm:$0xff]   ;;  %v11489_v49 = vld [vmem:[%s11599_s12 + $0xa8] sm:$0xff]  }
  0x20   : > { %670 = vmatprep.mubr.bf16.mxu0 %v14417_v2  ;;  %v11490_v50 = vld [vmem:[%s11599_s12 + $0xb0] sm:$0xff]   ;;  %v11491_v51 = vld [vmem:[%s11599_s12 + $0xb8] sm:$0xff]   ;;  %v11492_v52 = vld [vmem:[%s11599_s12 + $0xc0] sm:$0xff]  }
  0x21   : > { %v11493_v53 = vld [vmem:[%s11599_s12 + $0xc8] sm:$0xff]   ;;  %v10571_v56 = vld [vmem:[%s14408_s1 + $0x70] ss:$8 sps:$4 sm:$0x3f]   ;;  %v10572_v63 = vld [vmem:[%s11599_s12 + $0x80] sm:$0xff]  }
  0x22   : > { %v11494_v57 = vld [vmem:[%s11599_s12 + $0x8] sm:$0xff]   ;;  %v1853_v58 = vsel %vm611_vm0, %v10571_v56, 0  ;;  %v11495_v59 = vld [vmem:[%s11599_s12 + $0x10] sm:$0xff]   ;;  %v11496_v60 = vld [vmem:[%s11599_s12 + $0x18] sm:$0xff]  }
  0x23   : > { %v10585_v61 = vld [vmem:[%s14408_s1 + $0x84] ss:$8 sps:$4 sm:$0xff]   ;;  %v10568_v62 = vld [vmem:[%s11599_s12 + $0x78] sm:$0xff]   ;;  %v10574_v1 = vld [vmem:[%s11599_s12 + $0x90] sm:$0xff]  }
  0x24   : > { %v10573_v0 = vld [vmem:[%s11599_s12 + $0x88] sm:$0xff]   ;;  %v10575_v3 = vld [vmem:[%s11599_s12 + $0x98] sm:$0xff]   ;;  %v10576_v4 = vld [vmem:[%s11599_s12 + $0xa0] sm:$0xff]  }
  0x25   : > { %v10577_v5 = vld [vmem:[%s11599_s12 + $0xa8] sm:$0xff]   ;;  %v10578_v6 = vld [vmem:[%s11599_s12 + $0xb0] sm:$0xff]   ;;  %v10579_v7 = vld [vmem:[%s11599_s12 + $0xb8] sm:$0xff]  }
  0x26   : > { %v10580_v8 = vld [vmem:[%s11599_s12 + $0xc0] sm:$0xff]   ;;  %v10581_v9 = vld [vmem:[%s11599_s12 + $0xc8] sm:$0xff]   ;;  %v10582_v10 = vld [vmem:[%s11599_s12 + $0xd0] sm:$0xff]  }
  0x27   : > { %8540 = vmatmul.mubr.msk.bf16.gmra.mrb[8].mxu0 %vm538_vm1, %v10533_v13  ;;  %v10583_v11 = vld [vmem:[%s14408_s1 + $0x80] ss:$8 sps:$4 sm:$0xff]   ;;  %v10587_v12 = vld [vmem:[%s14408_s1 + $0x94] ss:$8 sps:$4 sm:$0x3f]  }
  0x28   : > { %680 = vmatprep.mubr.bf16.mxu0 %v14417_v2  ;;  %v10589_v13 = vld [vmem:[%s14408_s1 + $0x90] ss:$8 sps:$4 sm:$0x3f]  }
  0x29   : > { %v10594_v20 = vld [vmem:[%s11599_s12 + $0x38] sm:$0xff]   ;;  %v10607_v39 = vld [vmem:[%s11599_s12 + $0xb0] sm:$0xff]  }
  0x2a   : > { %v10637_v56 = vld [vmem:[%s14410_s3 + $0xb8] ss:$8 sps:$4 sm:$0xff]  }
  0x2f   : > { %8541 = vmatmul.mubr.msk.bf16.gmra.mrb[12].mxu0 %vm538_vm1, %v10534_v14  ;;  %v2371_v14 = vsel %vm611_vm0, %v10589_v13, 0 }
  0x30   : > { %690 = vmatprep.mubr.bf16.mxu0 %v14417_v2 }
  0x37   : > { %8542 = vmatmul.mubr.msk.bf16.gmra.mrb[16].mxu0 %vm538_vm1, %v10535_v15  ;;  %v10586_v15 = vld [vmem:[%s11599_s12 + $0x10] sm:$0xff]  }
  0x38   : > { %700 = vmatprep.mubr.bf16.mxu0 %v14417_v2 }
  0x3f   : > { %8543 = vmatmul.mubr.msk.bf16.gmra.mrb[20].mxu0 %vm538_vm1, %v10536_v16  ;;  %v10590_v16 = vld [vmem:[%s11599_s12 + $0x18] sm:$0xff]  }
  0x40   : > { %710 = vmatprep.mubr.bf16.mxu0 %v14417_v2 }
  0x47   : > { %8544 = vmatmul.mubr.msk.bf16.gmra.mrb[24].mxu0 %vm538_vm1, %v10537_v17  ;;  %v10591_v17 = vld [vmem:[%s11599_s12 + $0x20] sm:$0xff]  }
  0x48   : > { %720 = vmatprep.mubr.bf16.mxu0 %v14417_v2 }
  0x4f   : > { %8545 = vmatmul.mubr.msk.bf16.gmra.mrb[28].mxu0 %vm538_vm1, %v10538_v18  ;;  %v10592_v18 = vld [vmem:[%s11599_s12 + $0x28] sm:$0xff]  }
  0x50   : > { %730 = vmatprep.mubr.bf16.mxu0 %v14417_v2 }
  0x57   : > { %8546 = vmatmul.mubr.msk.bf16.gmra.mrb[32].mxu0 %vm538_vm1, %v10539_v19  ;;  %v10593_v19 = vld [vmem:[%s11599_s12 + $0x30] sm:$0xff]  }
  0x58   : > { %740 = vmatprep.mubr.bf16.mxu0 %v14417_v2 }
  0x5f   : > { %8547 = vmatmul.mubr.msk.bf16.gmra.mrb[36].mxu0 %vm538_vm1, %v10540_v21  ;;  %v10595_v21 = vld [vmem:[%s11599_s12 + $0x40] sm:$0xff]  }
  0x60   : > { %750 = vmatprep.mubr.bf16.mxu0 %v14417_v2 }
  0x67   : > { %8548 = vmatmul.mubr.msk.bf16.gmra.mrb[40].mxu0 %vm538_vm1, %v10541_v22  ;;  %v10596_v22 = vld [vmem:[%s11599_s12 + $0x48] sm:$0xff]  }
  0x68   : > { %760 = vmatprep.mubr.bf16.mxu0 %v14417_v2 }
  0x6f   : > { %8549 = vmatmul.mubr.msk.bf16.gmra.mrb[44].mxu0 %vm538_vm1, %v10542_v23  ;;  %v10597_v23 = vld [vmem:[%s11599_s12 + $0x50] sm:$0xff]  }
  0x70   : > { %770 = vmatprep.mubr.bf16.mxu0 %v14417_v2 }
  0x77   : > { %8550 = vmatmul.mubr.msk.bf16.gmra.mrb[48].mxu0 %vm538_vm1, %v10543_v24 }
  0x78   : > { %780 = vmatprep.mubr.bf16.mxu0 %v14417_v2 }
  0x7f   : > { %8551 = vmatmul.mubr.msk.bf16.gmra.mrb[52].mxu0 %vm538_vm1, %v10547_v25 }
  0x80   : > { %790 = vmatprep.mubr.bf16.mxu0 %v14417_v2 }
  0x87   : > { %8552 = vmatmul.mubr.msk.bf16.gmra.mrb[56].mxu0 %vm538_vm1, %v10548_v26 }
  0x88   : > { %800 = vmatprep.mubr.bf16.mxu0 %v14417_v2 }
  0x8f   : > { %8553 = vmatmul.mubr.msk.bf16.gmra.mrb[60].mxu0 %vm538_vm1, %v11652_v27 }
  0x90   : > { %810 = vmatprep.mubr.bf16.mxu0 %v14417_v2 }
  0x97   : > { %8554 = vmatmul.mubr.msk.bf16.gmra.mrb[64].mxu0 %vm538_vm1, %v11658_v28 }
  0x98   : > { %820 = vmatprep.mubr.bf16.mxu0 %v14417_v2 }
  0x9f   : > { %8555 = vmatmul.mubr.msk.bf16.gmra.mrb[68].mxu0 %vm538_vm1, %v11664_v29 }
  0xa0   : > { %830 = vmatprep.mubr.bf16.mxu0 %v14417_v2 }
  0xa7   : > { %8556 = vmatmul.mubr.msk.bf16.gmra.mrb[72].mxu0 %vm538_vm1, %v11670_v30 }
  0xa8   : > { %840 = vmatprep.mubr.bf16.mxu0 %v14417_v2 }
  0xaf   : > { %8557 = vmatmul.mubr.msk.bf16.gmra.mrb[76].mxu0 %vm538_vm1, %v11676_v31 }
  0xb0   : > { %850 = vmatprep.mubr.bf16.mxu0 %v14417_v2 }
  0xb7   : > { %8558 = vmatmul.mubr.msk.bf16.gmra.mrb[80].mxu0 %vm538_vm1, %v11682_v32 }
  0xb8   : > { %860 = vmatprep.mubr.bf16.mxu0 %v14417_v2 }
  0xbf   : > { %8559 = vmatmul.mubr.msk.bf16.gmra.mrb[84].mxu0 %vm538_vm1, %v11688_v33 }
  0xc0   : > { %870 = vmatprep.mubr.bf16.mxu0 %v14417_v2 }
  0xc7   : > { %8560 = vmatmul.mubr.msk.bf16.gmra.mrb[88].mxu0 %vm538_vm1, %v11694_v34 }
  0xc8   : > { %880 = vmatprep.mubr.bf16.mxu0 %v14417_v2 }
  0xcf   : > { %8561 = vmatmul.mubr.msk.bf16.gmra.mrb[92].mxu0 %vm538_vm1, %v11700_v35 }
  0xd0   : > { %950 = vmatprep.mubr.bf16.mxu0 %v14417_v2 }
  0xd7   : > { %8567 = vmatmul.mubr.msk.bf16.vlgmr.msra.gmra.mrb[0].mxu0 %vm538_vm1, %v10558_v36  ;;  %v10619_v36 = vld [vmem:[%s14410_s3 + $0x98] ss:$8 sps:$4 sm:$0xff]  }
  0xd8   : > { %1341 = vmatpush1.bf16.msra.mxu0 %v10559_v37  ;;  %960 = vmatprep.mubr.bf16.mxu0 %v14417_v2  ;;  %v10621_v37 = vld [vmem:[%s14410_s3 + $0x9c] ss:$8 sps:$4 sm:$0xff]  }
  0xd9   : > { %8635 = vmatprep.subr.msk.bf16.mxu0 %vm611_vm0, %v10562_v38  ;;  %v10606_v38 = vld [vmem:[%s11599_s12 + $0xa8] sm:$0xff]  }
  0xdc   : > { %1343 = vmatpush1.bf16.msra.mxu0 %v1335_v40  ;;  %v10608_v40 = vld [vmem:[%s11599_s12 + $0xb8] sm:$0xff]  }
  0xdd   : > { %1858 = vmatprep.subr.bf16.mxu0 %v10567_v41  ;;  %v10622_v41 = vld [vmem:[%s14410_s3 + $0xa8] ss:$8 sps:$4 sm:$0xff]  }
  0xdf   : > { %8568 = vmatmul.mubr.msk.bf16.gmra.mrb[4].mxu0 %vm538_vm1, %v10543_v24  ;;  %v10598_v24 = vld [vmem:[%s11599_s12 + $0x58] sm:$0xff]  }
  0xe0   : > { %970 = vmatprep.mubr.bf16.mxu0 %v14417_v2 }
  0xe7   : > { %8569 = vmatmul.mubr.msk.bf16.gmra.mrb[8].mxu0 %vm538_vm1, %v10547_v25  ;;  %v10599_v25 = vld [vmem:[%s11599_s12 + $0x60] sm:$0xff]  }
  0xe8   : > { %980 = vmatprep.mubr.bf16.mxu0 %v14417_v2 }
  0xef   : > { %8570 = vmatmul.mubr.msk.bf16.gmra.mrb[12].mxu0 %vm538_vm1, %v10548_v26  ;;  %v10600_v26 = vld [vmem:[%s11599_s12 + $0x68] sm:$0xff]  }
  0xf0   : > { %990 = vmatprep.mubr.bf16.mxu0 %v14417_v2 }
  0xf7   : > { %8571 = vmatmul.mubr.msk.bf16.gmra.mrb[16].mxu0 %vm538_vm1, %v11652_v27 }
  0xf8   : > { %1000 = vmatprep.mubr.bf16.mxu0 %v14417_v2 }
  0xff   : > { %8572 = vmatmul.mubr.msk.bf16.gmra.mrb[20].mxu0 %vm538_vm1, %v11658_v28 }
 0x100   : > { %1010 = vmatprep.mubr.bf16.mxu0 %v14417_v2 }
 0x107   : > { %8573 = vmatmul.mubr.msk.bf16.gmra.mrb[24].mxu0 %vm538_vm1, %v11664_v29 }
 0x108   : > { %1020 = vmatprep.mubr.bf16.mxu0 %v14417_v2 }
 0x10f   : > { %8574 = vmatmul.mubr.msk.bf16.gmra.mrb[28].mxu0 %vm538_vm1, %v11670_v30 }
 0x110   : > { %1030 = vmatprep.mubr.bf16.mxu0 %v14417_v2 }
 0x117   : > { %8575 = vmatmul.mubr.msk.bf16.gmra.mrb[32].mxu0 %vm538_vm1, %v11676_v31 }
 0x118   : > { %1040 = vmatprep.mubr.bf16.mxu0 %v14417_v2 }
 0x11f   : > { %8576 = vmatmul.mubr.msk.bf16.gmra.mrb[36].mxu0 %vm538_vm1, %v11682_v32 }
 0x120   : > { %1050 = vmatprep.mubr.bf16.mxu0 %v14417_v2 }
 0x127   : > { %8577 = vmatmul.mubr.msk.bf16.gmra.mrb[40].mxu0 %vm538_vm1, %v11688_v33 }
 0x128   : > { %1060 = vmatprep.mubr.bf16.mxu0 %v14417_v2 }
 0x12f   : > { %8578 = vmatmul.mubr.msk.bf16.gmra.mrb[44].mxu0 %vm538_vm1, %v11694_v34 }
 0x130   : > { %1070 = vmatprep.mubr.bf16.mxu0 %v14417_v2 }
 0x137   : > { %8579 = vmatmul.mubr.msk.bf16.gmra.mrb[48].mxu0 %vm538_vm1, %v11482_v42  ;;  %v10624_v42 = vld [vmem:[%s14410_s3 + $0xac] ss:$8 sps:$4 sm:$0xff]  }
 0x138   : > { %1080 = vmatprep.mubr.bf16.mxu0 %v14417_v2 }
 0x13f   : > { %8580 = vmatmul.mubr.msk.bf16.gmra.mrb[52].mxu0 %vm538_vm1, %v11483_v43  ;;  %v10609_v43 = vld [vmem:[%s11599_s12 + $0xc0] sm:$0xff]  }
 0x140   : > { %1090 = vmatprep.mubr.bf16.mxu0 %v14417_v2 }
 0x147   : > { %8581 = vmatmul.mubr.msk.bf16.gmra.mrb[56].mxu0 %vm538_vm1, %v11484_v44  ;;  %v10625_v44 = vld [vmem:[%s14410_s3 + $0x4] ss:$8 sps:$4 sm:$0xff]  }
 0x148   : > { %1100 = vmatprep.mubr.bf16.mxu0 %v14417_v2  ;;  %3394 = vmatprep.subr.bf16.mxu1 %v10625_v44 }
 0x14f   : > { %8582 = vmatmul.mubr.msk.bf16.gmra.mrb[60].mxu0 %vm538_vm1, %v11485_v45  ;;  %v10627_v45 = vld [vmem:[%s14410_s3] ss:$8 sps:$4 sm:$0xff]  }
 0x150   : > { %1110 = vmatprep.mubr.bf16.mxu0 %v14417_v2  ;;  %3395 = vmatpush1.bf16.msra.mxu1 %v10627_v45 }
 0x157   : > { %8583 = vmatmul.mubr.msk.bf16.gmra.mrb[64].mxu0 %vm538_vm1, %v11486_v46  ;;  %v10628_v46 = vld [vmem:[%s14410_s3 + $0x14] ss:$8 sps:$4 sm:$0xff]  }
 0x158   : > { %1120 = vmatprep.mubr.bf16.mxu0 %v14417_v2  ;;  %3396 = vmatprep.subr.bf16.mxu1 %v10628_v46 }
 0x15f   : > { %8584 = vmatmul.mubr.msk.bf16.gmra.mrb[68].mxu0 %vm538_vm1, %v11487_v47  ;;  %v10610_v47 = vld [vmem:[%s11599_s12 + $0xc8] sm:$0xff]  }
 0x160   : > { %1130 = vmatprep.mubr.bf16.mxu0 %v14417_v2 }
 0x167   : > { %8585 = vmatmul.mubr.msk.bf16.gmra.mrb[72].mxu0 %vm538_vm1, %v11488_v48  ;;  %v10630_v48 = vld [vmem:[%s14410_s3 + $0x10] ss:$8 sps:$4 sm:$0xff]  }
 0x168   : > { %1140 = vmatprep.mubr.bf16.mxu0 %v14417_v2  ;;  %3397 = vmatpush1.bf16.msra.mxu1 %v10630_v48 }
 0x16f   : > { %8586 = vmatmul.mubr.msk.bf16.gmra.mrb[76].mxu0 %vm538_vm1, %v11489_v49  ;;  %v10631_v49 = vld [vmem:[%s14410_s3 + $0x24] ss:$8 sps:$4 sm:$0xff]  }
 0x170   : > { %1150 = vmatprep.mubr.bf16.mxu0 %v14417_v2  ;;  %3398 = vmatprep.subr.bf16.mxu1 %v10631_v49 }
 0x177   : > { %8587 = vmatmul.mubr.msk.bf16.gmra.mrb[80].mxu0 %vm538_vm1, %v11490_v50  ;;  %v10633_v50 = vld [vmem:[%s14410_s3 + $0x20] ss:$8 sps:$4 sm:$0xff]  }
 0x178   : > { %1160 = vmatprep.mubr.bf16.mxu0 %v14417_v2  ;;  %3399 = vmatpush1.bf16.msra.mxu1 %v10633_v50 }
 0x17f   : > { %8588 = vmatmul.mubr.msk.bf16.gmra.mrb[84].mxu0 %vm538_vm1, %v11491_v51  ;;  %v10634_v51 = vld [vmem:[%s14410_s3 + $0x34] ss:$8 sps:$4 sm:$0xff]  }
 0x180   : > { %1170 = vmatprep.mubr.bf16.mxu0 %v14417_v2  ;;  %3400 = vmatprep.subr.bf16.mxu1 %v10634_v51 }
 0x187   : > { %8589 = vmatmul.mubr.msk.bf16.gmra.mrb[88].mxu0 %vm538_vm1, %v11492_v52  ;;  %v10611_v52 = vld [vmem:[%s11599_s12 + $0xd0] sm:$0xff]  }
 0x188   : > { %1180 = vmatprep.mubr.bf16.mxu0 %v14417_v2 }
 0x18f   : > { %8590 = vmatmul.mubr.msk.bf16.gmra.mrb[92].mxu0 %vm538_vm1, %v11493_v53  ;;  %v10636_v53 = vld [vmem:[%s14410_s3 + $0x30] ss:$8 sps:$4 sm:$0xff]  }
 0x190   : > { %1372 = vmatprep.mubr.bf16.mxu0 %v14417_v2  ;;  %3401 = vmatpush1.bf16.msra.mxu1 %v10636_v53  ;;  %v2747_v53 = vlaneseq }
 0x197   : > { %8636 = vmatmul.mubr.msk.bf16.vlgmr.msra.gmra.mrb[0].mxu0 %vm538_vm1, %v11494_v57  ;;  %v10639_v57 = vld [vmem:[%s14410_s3 + $0xbc] ss:$8 sps:$4 sm:$0xff]  }
 0x198   : > { %1859 = vmatpush1.bf16.msra.mxu0 %v10565_v54  ;;  %1382 = vmatprep.mubr.bf16.mxu0 %v14417_v2  ;;  %v10640_v54 = vld [vmem:[%s14410_s3 + $0x44] ss:$8 sps:$4 sm:$0xff]  }
 0x199   : > { %8680 = vmatprep.subr.msk.bf16.mxu0 %vm611_vm0, %v10569_v55  ;;  %v10642_v55 = vld [vmem:[%s14410_s3 + $0x40] ss:$8 sps:$4 sm:$0xff]   ;;  %3402 = vmatprep.subr.bf16.mxu1 %v10640_v54 }
 0x19a   : > { %3403 = vmatpush1.bf16.msra.mxu1 %v10642_v55 }
 0x19c   : > { %1861 = vmatpush1.bf16.msra.mxu0 %v1853_v58  ;;  %v10643_v58 = vld [vmem:[%s14410_s3 + $0x54] ss:$8 sps:$4 sm:$0xff]  }
 0x19d   : > { %2376 = vmatprep.subr.bf16.mxu0 %v10585_v61  ;;  %3404 = vmatprep.subr.bf16.mxu1 %v10643_v58  ;;  %v10646_v61 = vld [vmem:[%s14410_s3 + $0x64] ss:$8 sps:$4 sm:$0xff]  }
 0x19f   : > { %8637 = vmatmul.mubr.msk.bf16.gmra.mrb[4].mxu0 %vm538_vm1, %v11495_v59  ;;  %v10612_v59 = vld [vmem:[%s11599_s12 + $0xd8] sm:$0xff]  }
 0x1a0   : > { %1392 = vmatprep.mubr.bf16.mxu0 %v14417_v2 }
 0x1a7   : > { %8638 = vmatmul.mubr.msk.bf16.gmra.mrb[8].mxu0 %vm538_vm1, %v11496_v60  ;;  %v10645_v60 = vld [vmem:[%s14410_s3 + $0x50] ss:$8 sps:$4 sm:$0xff]  }
 0x1a8   : > { %1402 = vmatprep.mubr.bf16.mxu0 %v14417_v2  ;;  %3405 = vmatpush1.bf16.msra.mxu1 %v10645_v60  ;;  %v2745_v60 = vld [vmem:[%s14409_s2] sm:$0x3] }
 0x1a9   : > { %3406 = vmatprep.subr.bf16.mxu1 %v10646_v61 }
 0x1af   : > { %8639 = vmatmul.mubr.msk.bf16.gmra.mrb[12].mxu0 %vm538_vm1, %v11652_v27  ;;  %v10613_v27 = vld [vmem:[%s14410_s3 + $0x78] ss:$8 sps:$4 sm:$0xff]  }
 0x1b0   : > { %1412 = vmatprep.mubr.bf16.mxu0 %v14417_v2 }
 0x1b7   : > { %8640 = vmatmul.mubr.msk.bf16.gmra.mrb[16].mxu0 %vm538_vm1, %v11658_v28  ;;  %v10615_v28 = vld [vmem:[%s14410_s3 + $0x7c] ss:$8 sps:$4 sm:$0xff]  }
 0x1b8   : > { %1422 = vmatprep.mubr.bf16.mxu0 %v14417_v2 }
 0x1bf   : > { %8641 = vmatmul.mubr.msk.bf16.gmra.mrb[20].mxu0 %vm538_vm1, %v11664_v29  ;;  %v10601_v29 = vld [vmem:[%s11599_s12 + $0x80] sm:$0xff]  }
 0x1c0   : > { %1432 = vmatprep.mubr.bf16.mxu0 %v14417_v2 }
 0x1c7   : > { %8642 = vmatmul.mubr.msk.bf16.gmra.mrb[24].mxu0 %vm538_vm1, %v11670_v30  ;;  %v10602_v30 = vld [vmem:[%s11599_s12 + $0x88] sm:$0xff]  }
 0x1c8   : > { %1442 = vmatprep.mubr.bf16.mxu0 %v14417_v2 }
 0x1cf   : > { %8643 = vmatmul.mubr.msk.bf16.gmra.mrb[28].mxu0 %vm538_vm1, %v11676_v31  ;;  %v10616_v31 = vld [vmem:[%s14410_s3 + $0x88] ss:$8 sps:$4 sm:$0xff]  }
 0x1d0   : > { %1452 = vmatprep.mubr.bf16.mxu0 %v14417_v2 }
 0x1d7   : > { %8644 = vmatmul.mubr.msk.bf16.gmra.mrb[32].mxu0 %vm538_vm1, %v11682_v32  ;;  %v10618_v32 = vld [vmem:[%s14410_s3 + $0x8c] ss:$8 sps:$4 sm:$0xff]  }
 0x1d8   : > { %1462 = vmatprep.mubr.bf16.mxu0 %v14417_v2 }
 0x1df   : > { %8645 = vmatmul.mubr.msk.bf16.gmra.mrb[36].mxu0 %vm538_vm1, %v11688_v33  ;;  %v10603_v33 = vld [vmem:[%s11599_s12 + $0x90] sm:$0xff]  }
 0x1e0   : > { %1472 = vmatprep.mubr.bf16.mxu0 %v14417_v2 }
 0x1e7   : > { %8646 = vmatmul.mubr.msk.bf16.gmra.mrb[40].mxu0 %vm538_vm1, %v11694_v34  ;;  %v10604_v34 = vld [vmem:[%s11599_s12 + $0x98] sm:$0xff]  }
 0x1e8   : > { %1482 = vmatprep.mubr.bf16.mxu0 %v14417_v2 }
 0x1ef   : > { %8647 = vmatmul.mubr.msk.bf16.gmra.mrb[44].mxu0 %vm538_vm1, %v11700_v35  ;;  %v10605_v35 = vld [vmem:[%s11599_s12 + $0xa0] sm:$0xff]  }
 0x1f0   : > { %1492 = vmatprep.mubr.bf16.mxu0 %v14417_v2 }
 0x1f7   : > { %8648 = vmatmul.mubr.msk.bf16.gmra.mrb[48].mxu0 %vm538_vm1, %v10568_v62 }
 0x1f8   : > { %1502 = vmatprep.mubr.bf16.mxu0 %v14417_v2 }
 0x1ff   : > { %8649 = vmatmul.mubr.msk.bf16.gmra.mrb[52].mxu0 %vm538_vm1, %v10572_v63 }
 0x200   : > { %1512 = vmatprep.mubr.bf16.mxu0 %v14417_v2 }
 0x207   : > { %8650 = vmatmul.mubr.msk.bf16.gmra.mrb[56].mxu0 %vm538_vm1, %v10573_v0 }
 0x208   : > { %1522 = vmatprep.mubr.bf16.mxu0 %v14417_v2 }
 0x20f   : > { %8651 = vmatmul.mubr.msk.bf16.gmra.mrb[60].mxu0 %vm538_vm1, %v10574_v1 }
 0x210   : > { %1532 = vmatprep.mubr.bf16.mxu0 %v14417_v2 }
 0x217   : > { %8652 = vmatmul.mubr.msk.bf16.gmra.mrb[64].mxu0 %vm538_vm1, %v10575_v3 }
 0x218   : > { %1542 = vmatprep.mubr.bf16.mxu0 %v14417_v2 }
 0x21f   : > { %8653 = vmatmul.mubr.msk.bf16.gmra.mrb[68].mxu0 %vm538_vm1, %v10576_v4 }
 0x220   : > { %1552 = vmatprep.mubr.bf16.mxu0 %v14417_v2 }
 0x227   : > { %8654 = vmatmul.mubr.msk.bf16.gmra.mrb[72].mxu0 %vm538_vm1, %v10577_v5 }
 0x228   : > { %1562 = vmatprep.mubr.bf16.mxu0 %v14417_v2 }
 0x22f   : > { %8655 = vmatmul.mubr.msk.bf16.gmra.mrb[76].mxu0 %vm538_vm1, %v10578_v6 }
 0x230   : > { %1572 = vmatprep.mubr.bf16.mxu0 %v14417_v2 }
 0x237   : > { %8656 = vmatmul.mubr.msk.bf16.gmra.mrb[80].mxu0 %vm538_vm1, %v10579_v7 }
 0x238   : > { %1582 = vmatprep.mubr.bf16.mxu0 %v14417_v2 }
 0x23f   : > { %8657 = vmatmul.mubr.msk.bf16.gmra.mrb[84].mxu0 %vm538_vm1, %v10580_v8 }
 0x240   : > { %1592 = vmatprep.mubr.bf16.mxu0 %v14417_v2 }
 0x247   : > { %8658 = vmatmul.mubr.msk.bf16.gmra.mrb[88].mxu0 %vm538_vm1, %v10581_v9 }
 0x248   : > { %1602 = vmatprep.mubr.bf16.mxu0 %v14417_v2 }
 0x24f   : > { %8659 = vmatmul.mubr.msk.bf16.gmra.mrb[92].mxu0 %vm538_vm1, %v10582_v10 }
 0x250   : > { %1890 = vmatprep.mubr.bf16.mxu0 %v14417_v2 }
 0x257   : > { %8681 = vmatmul.mubr.msk.bf16.vlgmr.msra.gmra.mrb[0].mxu0 %vm538_vm1, %v10568_v62  ;;  %v10648_v62 = vld [vmem:[%s14410_s3 + $0x60] ss:$8 sps:$4 sm:$0xff]  }
 0x258   : > { %2377 = vmatpush1.bf16.msra.mxu0 %v10583_v11  ;;  %1900 = vmatprep.mubr.bf16.mxu0 %v14417_v2 }
 0x259   : > { %8749 = vmatprep.subr.msk.bf16.mxu0 %vm611_vm0, %v10587_v12  ;;  %3407 = vmatpush1.bf16.msra.mxu1 %v10648_v62  ;;  %v10659_v12 = vld [vmem:[%s14410_s3 + $0xf4] ss:$8 sps:$4 sm:$0xff]  }
 0x25c   : > { %2379 = vmatpush1.bf16.msra.mxu0 %v2371_v14 }
 0x25d   : > { %3177 = vmatprep.subr.bf16.mxu0 %v10615_v28 }
 0x25f   : > { %8682 = vmatmul.mubr.msk.bf16.gmra.mrb[4].mxu0 %vm538_vm1, %v10572_v63  ;;  %v3047_v63 = vld [vmem:[%s14410_s3 + $0x70] sm:$0xff] }
 0x260   : > { %1910 = vmatprep.mubr.bf16.mxu0 %v14417_v2 }
 0x267   : > { %8683 = vmatmul.mubr.msk.bf16.gmra.mrb[8].mxu0 %vm538_vm1, %v10573_v0  ;;  %v10651_v0 = vld [vmem:[%s14410_s3 + $0xcc] ss:$8 sps:$4 sm:$0xff]  }
 0x268   : > { %1920 = vmatprep.mubr.bf16.mxu0 %v14417_v2 }
 0x26f   : > { %8684 = vmatmul.mubr.msk.bf16.gmra.mrb[12].mxu0 %vm538_vm1, %v10574_v1  ;;  %v8831_v1 = vcombine.high %v3047_v63, %v3047_v63 }
 0x270   : > { %1930 = vmatprep.mubr.bf16.mxu0 %v14417_v2 }
 0x271   : > { %8832 = vmatprep.subr.msk.bf16.mxu1 %vm3170_vm2, %v8831_v1 }
 0x277   : > { %8685 = vmatmul.mubr.msk.bf16.gmra.mrb[16].mxu0 %vm538_vm1, %v10575_v3  ;;  %v8830_v3 = vcombine.low %v3047_v63, %v3047_v63 }
 0x278   : > { %1940 = vmatprep.mubr.bf16.mxu0 %v14417_v2 }
 0x27f   : > { %8686 = vmatmul.mubr.msk.bf16.gmra.mrb[20].mxu0 %vm538_vm1, %v10576_v4  ;;  %v10649_v4 = vld [vmem:[%s14410_s3 + $0xc8] ss:$8 sps:$4 sm:$0xff]  }
 0x280   : > { %1950 = vmatprep.mubr.bf16.mxu0 %v14417_v2 }
 0x287   : > { %8687 = vmatmul.mubr.msk.bf16.gmra.mrb[24].mxu0 %vm538_vm1, %v10577_v5  ;;  %v3389_v5 = vsel %vm3170_vm2, %v8830_v3, 0 }
 0x288   : > { %1960 = vmatprep.mubr.bf16.mxu0 %v14417_v2  ;;  %3409 = vmatpush1.bf16.msra.mxu1 %v3389_v5 }
 0x289   : > { %3627 = vmatprep.subr.bf16.mxu1 %v10659_v12 }
 0x28f   : > { %8688 = vmatmul.mubr.msk.bf16.gmra.mrb[28].mxu0 %vm538_vm1, %v10578_v6  ;;  %v10656_v6 = vld [vmem:[%s14410_s3 + $0xdc] ss:$8 sps:$4 sm:$0xff]  }
 0x290   : > { %1970 = vmatprep.mubr.bf16.mxu0 %v14417_v2 }
 0x297   : > { %8689 = vmatmul.mubr.msk.bf16.gmra.mrb[32].mxu0 %vm538_vm1, %v10579_v7  ;;  %v10654_v7 = vld [vmem:[%s14410_s3 + $0xd8] ss:$8 sps:$4 sm:$0xff]  }
 0x298   : > { %1980 = vmatprep.mubr.bf16.mxu0 %v14417_v2 }
 0x29f   : > { %8690 = vmatmul.mubr.msk.bf16.gmra.mrb[36].mxu0 %vm538_vm1, %v10580_v8  ;;  %v8788_v8 = vld [vmem:[%s14410_s3 + $0xe8] sm:$0xff] }
 0x2a0   : > { %1990 = vmatprep.mubr.bf16.mxu0 %v14417_v2 }
 0x2a7   : > { %8691 = vmatmul.mubr.msk.bf16.gmra.mrb[40].mxu0 %vm538_vm1, %v10581_v9  ;;  %v8804_v9 = vcombine.high %v8788_v8, %v8788_v8 }
 0x2a8   : > { %2000 = vmatprep.mubr.bf16.mxu0 %v14417_v2 }
 0x2af   : > { %8692 = vmatmul.mubr.msk.bf16.gmra.mrb[44].mxu0 %vm538_vm1, %v10582_v10  ;;  %v8803_v10 = vcombine.low %v8788_v8, %v8788_v8 }
 0x2b0   : > { %2010 = vmatprep.mubr.bf16.mxu0 %v14417_v2 }
 0x2b1   : > { %v3172_v11 = vsel %vm3170_vm2, %v8803_v10, 0 }
 0x2b7   : > { %8693 = vmatmul.mubr.msk.bf16.gmra.mrb[48].mxu0 %vm538_vm1, %v10586_v15 }
 0x2b8   : > { %2020 = vmatprep.mubr.bf16.mxu0 %v14417_v2 }
 0x2bf   : > { %8694 = vmatmul.mubr.msk.bf16.gmra.mrb[52].mxu0 %vm538_vm1, %v10590_v16 }
 0x2c0   : > { %2030 = vmatprep.mubr.bf16.mxu0 %v14417_v2 }
 0x2c7   : > { %8695 = vmatmul.mubr.msk.bf16.gmra.mrb[56].mxu0 %vm538_vm1, %v10591_v17 }
 0x2c8   : > { %2040 = vmatprep.mubr.bf16.mxu0 %v14417_v2 }
 0x2cf   : > { %8696 = vmatmul.mubr.msk.bf16.gmra.mrb[60].mxu0 %vm538_vm1, %v10592_v18 }
 0x2d0   : > { %2050 = vmatprep.mubr.bf16.mxu0 %v14417_v2 }
 0x2d7   : > { %8697 = vmatmul.mubr.msk.bf16.gmra.mrb[64].mxu0 %vm538_vm1, %v10593_v19 }
 0x2d8   : > { %2060 = vmatprep.mubr.bf16.mxu0 %v14417_v2 }
 0x2df   : > { %8698 = vmatmul.mubr.msk.bf16.gmra.mrb[68].mxu0 %vm538_vm1, %v10594_v20 }
 0x2e0   : > { %2070 = vmatprep.mubr.bf16.mxu0 %v14417_v2 }
 0x2e7   : > { %8699 = vmatmul.mubr.msk.bf16.gmra.mrb[72].mxu0 %vm538_vm1, %v10595_v21 }
 0x2e8   : > { %2080 = vmatprep.mubr.bf16.mxu0 %v14417_v2 }
 0x2ef   : > { %8700 = vmatmul.mubr.msk.bf16.gmra.mrb[76].mxu0 %vm538_vm1, %v10596_v22 }
 0x2f0   : > { %2090 = vmatprep.mubr.bf16.mxu0 %v14417_v2 }
 0x2f7   : > { %8701 = vmatmul.mubr.msk.bf16.gmra.mrb[80].mxu0 %vm538_vm1, %v10597_v23 }
 0x2f8   : > { %2100 = vmatprep.mubr.bf16.mxu0 %v14417_v2 }
 0x2ff   : > { %8702 = vmatmul.mubr.msk.bf16.gmra.mrb[84].mxu0 %vm538_vm1, %v10598_v24 }
 0x300   : > { %2110 = vmatprep.mubr.bf16.mxu0 %v14417_v2 }
 0x307   : > { %8703 = vmatmul.mubr.msk.bf16.gmra.mrb[88].mxu0 %vm538_vm1, %v10599_v25 }
 0x308   : > { %2120 = vmatprep.mubr.bf16.mxu0 %v14417_v2 }
 0x30f   : > { %8704 = vmatmul.mubr.msk.bf16.gmra.mrb[92].mxu0 %vm538_vm1, %v10600_v26 }
 0x310   : > { %2408 = vmatprep.mubr.bf16.mxu0 %v14417_v2 }
 0x317   : > { %8750 = vmatmul.mubr.msk.bf16.vlgmr.msra.gmra.mrb[0].mxu0 %vm538_vm1, %v10586_v15 }
 0x318   : > { %2418 = vmatprep.mubr.bf16.mxu0 %v14417_v2  ;;  %3178 = vmatpush1.bf16.msra.mxu0 %v10613_v27 }
 0x319   : > { %3179 = vmatprep.subr.bf16.mxu0 %v10618_v32 }
 0x31c   : > { %3180 = vmatpush1.bf16.msra.mxu0 %v10616_v31 }
 0x31d   : > { %3181 = vmatprep.subr.bf16.mxu0 %v10621_v37 }
 0x31f   : > { %8751 = vmatmul.mubr.msk.bf16.gmra.mrb[4].mxu0 %vm538_vm1, %v10590_v16 }
 0x320   : > { %2428 = vmatprep.mubr.bf16.mxu0 %v14417_v2  ;;  %3182 = vmatpush1.bf16.msra.mxu0 %v10619_v36 }
 0x321   : > { %3183 = vmatprep.subr.bf16.mxu0 %v10624_v42 }
 0x324   : > { %3184 = vmatpush1.bf16.msra.mxu0 %v10622_v41 }
 0x325   : > { %3185 = vmatprep.subr.bf16.mxu0 %v10639_v57  ;;  %v12180_v57 = vshrl.u32 %v2747_v53, 7 }
 0x327   : > { %8752 = vmatmul.mubr.msk.bf16.gmra.mrb[8].mxu0 %vm538_vm1, %v10591_v17  ;;  %14425 = vst [vmem:[#allocation2_spill] sm:$0xff] %v12180_v57  ;;  %v12191_v61 = vsub.s32 1, %v12180_v57 }
 0x328   : > { %2438 = vmatprep.mubr.bf16.mxu0 %v14417_v2  ;;  %3186 = vmatpush1.bf16.msra.mxu0 %v10637_v56 }
 0x329   : > { %3187 = vmatprep.subr.bf16.mxu0 %v10651_v0  ;;  %14428 = vst [vmem:[#allocation5_spill] sm:$0xff] %v12191_v61 }
 0x32c   : > { %3188 = vmatpush1.bf16.msra.mxu0 %v10649_v4  ;;  %v12205_v4 = vrot.slane %v2745_v60, %v12191_v61 }
 0x32d   : > { %3189 = vmatprep.subr.bf16.mxu0 %v10656_v6 }
 0x32f   : > { %8753 = vmatmul.mubr.msk.bf16.gmra.mrb[12].mxu0 %vm538_vm1, %v10592_v18 }
 0x330   : > { %2448 = vmatprep.mubr.bf16.mxu0 %v14417_v2  ;;  %3190 = vmatpush1.bf16.msra.mxu0 %v10654_v7 }
 0x331   : > { %8805 = vmatprep.subr.msk.bf16.mxu0 %vm3170_vm2, %v8804_v9 }
 0x334   : > { %3192 = vmatpush1.bf16.msra.mxu0 %v3172_v11 }
 0x337   : > { %8754 = vmatmul.mubr.msk.bf16.gmra.mrb[16].mxu0 %vm538_vm1, %v10593_v19 }
 0x338   : > { %2458 = vmatprep.mubr.bf16.mxu0 %v14417_v2 }
 0x33f   : > { %8755 = vmatmul.mubr.msk.bf16.gmra.mrb[20].mxu0 %vm538_vm1, %v10594_v20 }
 0x340   : > { %2468 = vmatprep.mubr.bf16.mxu0 %v14417_v2 }
 0x347   : > { %8756 = vmatmul.mubr.msk.bf16.gmra.mrb[24].mxu0 %vm538_vm1, %v10595_v21 }
 0x348   : > { %2478 = vmatprep.mubr.bf16.mxu0 %v14417_v2 }
 0x34f   : > { %8757 = vmatmul.mubr.msk.bf16.gmra.mrb[28].mxu0 %vm538_vm1, %v10596_v22 }
 0x350   : > { %2488 = vmatprep.mubr.bf16.mxu0 %v14417_v2 }
 0x357   : > { %8758 = vmatmul.mubr.msk.bf16.gmra.mrb[32].mxu0 %vm538_vm1, %v10597_v23 }
 0x358   : > { %2498 = vmatprep.mubr.bf16.mxu0 %v14417_v2 }
 0x35f   : > { %8759 = vmatmul.mubr.msk.bf16.gmra.mrb[36].mxu0 %vm538_vm1, %v10598_v24 }
 0x360   : > { %2508 = vmatprep.mubr.bf16.mxu0 %v14417_v2 }
 0x367   : > { %8760 = vmatmul.mubr.msk.bf16.gmra.mrb[40].mxu0 %vm538_vm1, %v10599_v25 }
 0x368   : > { %2518 = vmatprep.mubr.bf16.mxu0 %v14417_v2 }
 0x36f   : > { %8761 = vmatmul.mubr.msk.bf16.gmra.mrb[44].mxu0 %vm538_vm1, %v10600_v26 }
 0x370   : > { %2528 = vmatprep.mubr.bf16.mxu0 %v14417_v2 }
 0x377   : > { %8762 = vmatmul.mubr.msk.bf16.gmra.mrb[48].mxu0 %vm538_vm1, %v10601_v29 }
 0x378   : > { %2538 = vmatprep.mubr.bf16.mxu0 %v14417_v2 }
 0x37f   : > { %8763 = vmatmul.mubr.msk.bf16.gmra.mrb[52].mxu0 %vm538_vm1, %v10602_v30 }
 0x380   : > { %2548 = vmatprep.mubr.bf16.mxu0 %v14417_v2 }
 0x387   : > { %8764 = vmatmul.mubr.msk.bf16.gmra.mrb[56].mxu0 %vm538_vm1, %v10603_v33 }
 0x388   : > { %2558 = vmatprep.mubr.bf16.mxu0 %v14417_v2 }
 0x38f   : > { %8765 = vmatmul.mubr.msk.bf16.gmra.mrb[60].mxu0 %vm538_vm1, %v10604_v34 }
 0x390   : > { %2568 = vmatprep.mubr.bf16.mxu0 %v14417_v2 }
 0x397   : > { %8766 = vmatmul.mubr.msk.bf16.gmra.mrb[64].mxu0 %vm538_vm1, %v10605_v35 }
 0x398   : > { %2578 = vmatprep.mubr.bf16.mxu0 %v14417_v2 }
 0x39f   : > { %8767 = vmatmul.mubr.msk.bf16.gmra.mrb[68].mxu0 %vm538_vm1, %v10606_v38 }
 0x3a0   : > { %2588 = vmatprep.mubr.bf16.mxu0 %v14417_v2 }
 0x3a7   : > { %8768 = vmatmul.mubr.msk.bf16.gmra.mrb[72].mxu0 %vm538_vm1, %v10607_v39 }
 0x3a8   : > { %2598 = vmatprep.mubr.bf16.mxu0 %v14417_v2 }
 0x3af   : > { %8769 = vmatmul.mubr.msk.bf16.gmra.mrb[76].mxu0 %vm538_vm1, %v10608_v40 }
 0x3b0   : > { %2608 = vmatprep.mubr.bf16.mxu0 %v14417_v2 }
 0x3b7   : > { %8770 = vmatmul.mubr.msk.bf16.gmra.mrb[80].mxu0 %vm538_vm1, %v10609_v43 }
 0x3b8   : > { %2618 = vmatprep.mubr.bf16.mxu0 %v14417_v2 }
 0x3bf   : > { %8771 = vmatmul.mubr.msk.bf16.gmra.mrb[84].mxu0 %vm538_vm1, %v10610_v47 }
 0x3c0   : > { %2628 = vmatprep.mubr.bf16.mxu0 %v14417_v2 }
 0x3c7   : > { %8772 = vmatmul.mubr.msk.bf16.gmra.mrb[88].mxu0 %vm538_vm1, %v10611_v52 }
 0x3c8   : > { %2638 = vmatprep.mubr.bf16.mxu0 %v14417_v2 }
 0x3cf   : > { %8773 = vmatmul.mubr.msk.bf16.gmra.mrb[92].mxu0 %vm538_vm1, %v10612_v59  ;;  %v12185_v59 = vsub.s32 0, %v12180_v57 }
 0x3d0   : > { %3209 = vmatprep.mubr.bf16.mxu0 %v14417_v2 }
 0x3d1   : > { %14427 = vst [vmem:[#allocation4_spill] sm:$0xff] %v12185_v59  ;;  %v12200_v1 = vrot.slane %v2745_v60, %v12185_v59 }
 0x3ea   : > { %v2410_v13 = vpop.f32.mrb[0].mxu0 }
 0x3eb   : > { %v2412_v14 = vpop.f32.mrb[1].mxu0  ;;  %v2757_v5 = vadd.f32 %v12200_v1, %v2410_v13 }
 0x3ec   : > { %v2414_v15 = vpop.f32.mrb[2].mxu0  ;;  %v2758_v6 = vadd.f32 %v12205_v4, %v2412_v14 }
 0x3ed   : > { %v2416_v16 = vpop.f32.mrb[3].mxu0  ;;  %v2759_v8 = vadd.f32 %v12200_v1, %v2414_v15  ;;  %v2853_v2 = vmax.f32 %v2757_v5, 0.0 }
 0x3ee   : > { %v2760_v11 = vadd.f32 %v12205_v4, %v2416_v16  ;;  %v2854_v59 = vmax.f32 %v2758_v6, 0.0 }
 0x3f2   : > { %v12102_v17 = vpop.f32.mrb[4].mxu0 }
 0x3f3   : > { %v12104_v18 = vpop.f32.mrb[5].mxu0  ;;  %v2761_v16 = vadd.f32 %v12200_v1, %v12102_v17 }
 0x3f4   : > { %v12106_v19 = vpop.f32.mrb[6].mxu0  ;;  %v2762_v5 = vadd.f32 %v12205_v4, %v12104_v18 }
 0x3f5   : > { %v12108_v20 = vpop.f32.mrb[7].mxu0  ;;  %v2763_v6 = vadd.f32 %v12200_v1, %v12106_v19  ;;  %v10657_v19 = vld [vmem:[%s14410_s3 + $0xf0] ss:$8 sps:$4 sm:$0xff]  }
 0x3fa   : > { %v12110_v21 = vpop.f32.mrb[8].mxu0 }
 0x3fb   : > { %v12112_v22 = vpop.f32.mrb[9].mxu0 }
 0x3fc   : > { %v12114_v23 = vpop.f32.mrb[10].mxu0 }
 0x3fd   : > { %v12116_v24 = vpop.f32.mrb[11].mxu0 }
 0x402   : > { %v12118_v25 = vpop.f32.mrb[12].mxu0 }
 0x403   : > { %v12120_v26 = vpop.f32.mrb[13].mxu0 }
 0x404   : > { %v12122_v27 = vpop.f32.mrb[14].mxu0 }
 0x405   : > { %v12124_v28 = vpop.f32.mrb[15].mxu0 }
 0x40a   : > { %v12126_v29 = vpop.f32.mrb[16].mxu0 }
 0x40b   : > { %v12128_v30 = vpop.f32.mrb[17].mxu0 }
 0x40c   : > { %v12130_v31 = vpop.f32.mrb[18].mxu0 }
 0x40d   : > { %v12132_v32 = vpop.f32.mrb[19].mxu0 }
 0x412   : > { %v12134_v33 = vpop.f32.mrb[20].mxu0 }
 0x413   : > { %v12136_v34 = vpop.f32.mrb[21].mxu0 }
 0x414   : > { %v12138_v35 = vpop.f32.mrb[22].mxu0 }
 0x415   : > { %v12140_v36 = vpop.f32.mrb[23].mxu0 }
 0x41a   : > { %v12142_v37 = vpop.f32.mrb[24].mxu0 }
 0x41b   : > { %v12144_v38 = vpop.f32.mrb[25].mxu0 }
 0x41c   : > { %v12146_v39 = vpop.f32.mrb[26].mxu0 }
 0x41d   : > { %v12148_v40 = vpop.f32.mrb[27].mxu0 }
 0x422   : > { %v12150_v41 = vpop.f32.mrb[28].mxu0 }
 0x423   : > { %v12152_v42 = vpop.f32.mrb[29].mxu0 }
 0x424   : > { %v12154_v43 = vpop.f32.mrb[30].mxu0 }
 0x425   : > { %v12156_v44 = vpop.f32.mrb[31].mxu0 }
 0x42a   : > { %v12158_v45 = vpop.f32.mrb[32].mxu0 }
 0x42b   : > { %v12160_v46 = vpop.f32.mrb[33].mxu0 }
 0x42c   : > { %v12162_v47 = vpop.f32.mrb[34].mxu0 }
 0x42d   : > { %v12164_v48 = vpop.f32.mrb[35].mxu0 }
 0x432   : > { %v12166_v49 = vpop.f32.mrb[36].mxu0 }
 0x433   : > { %v12168_v50 = vpop.f32.mrb[37].mxu0 }
 0x434   : > { %v12170_v51 = vpop.f32.mrb[38].mxu0 }
 0x435   : > { %v12172_v52 = vpop.f32.mrb[39].mxu0 }
 0x43a   : > { %v12174_v54 = vpop.f32.mrb[40].mxu0 }
 0x43b   : > { %v12176_v55 = vpop.f32.mrb[41].mxu0 }
 0x43c   : > { %v12178_v56 = vpop.f32.mrb[42].mxu0 }
 0x43d   : > { %v12182_v58 = vpop.f32.mrb[43].mxu0 }
 0x43e   : > { %14426 = vst [vmem:[#allocation3_spill] sm:$0xff] %v12182_v58 }
 0x442   : > { %v12193_v62 = vpop.f32.mrb[44].mxu0 }
 0x443   : > { %14429 = vst [vmem:[#allocation6_spill] sm:$0xff] %v12193_v62  ;;  %v12195_v63 = vpop.f32.mrb[45].mxu0 }
 0x444   : > { %14430 = vst [vmem:[#allocation7_spill] sm:$0xff] %v12195_v63  ;;  %v12197_v0 = vpop.f32.mrb[46].mxu0  ;;  %v2856_v63 = vmax.f32 %v2760_v11, 0.0 }
 0x445   : > { %14431 = vst [vmem:[#allocation8_spill] sm:$0xff] %v12197_v0  ;;  %v12202_v3 = vpop.f32.mrb[47].mxu0 }
 0x446   : > { %14432 = vst [vmem:[#allocation9_spill] sm:$0xff] %v12202_v3  ;;  %v2855_v3 = vmax.f32 %v2759_v8, 0.0 }
 0x44a   : > { %v2530_v7 = vpop.f32.mrb[48].mxu0 }
 0x44b   : > { %v2805_v9 = vadd.f32 %v12200_v1, %v2530_v7  ;;  %v2532_v10 = vpop.f32.mrb[49].mxu0 }
 0x44c   : > { %v2806_v12 = vadd.f32 %v12205_v4, %v2532_v10  ;;  %v2534_v53 = vpop.f32.mrb[50].mxu0 }
 0x44d   : > { %v2901_v57 = vmax.f32 %v2805_v9, 0.0  ;;  %v2807_v60 = vadd.f32 %v12200_v1, %v2534_v53  ;;  %v2536_v61 = vpop.f32.mrb[51].mxu0 }
 0x44e   : > { %v2902_v13 = vmax.f32 %v2806_v12, 0.0  ;;  %v2808_v14 = vadd.f32 %v12205_v4, %v2536_v61 }
 0x44f   : > { %v2949_v0 = vmax.f32 %v2853_v2, %v2901_v57  ;;  %v2903_v15 = vmax.f32 %v2807_v60, 0.0  ;;  %v2764_v57 = vadd.f32 %v12205_v4, %v12108_v20  ;;  %v10664_v20 = vld [vmem:[%s14410_s3 + $0x104] ss:$8 sps:$4 sm:$0xff]   ;;  %v2859_v60 = vmax.f32 %v2763_v6, 0.0 }
 0x450   : > { %v2950_v7 = vmax.f32 %v2854_v59, %v2902_v13  ;;  %v2904_v62 = vmax.f32 %v2808_v14, 0.0  ;;  %v2766_v6 = vadd.f32 %v12205_v4, %v12112_v22 }
 0x451   : > { %v2951_v10 = vmax.f32 %v2855_v3, %v2903_v15  ;;  %v2857_v3 = vmax.f32 %v2761_v16, 0.0  ;;  %v2860_v15 = vmax.f32 %v2764_v57, 0.0 }
 0x452   : > { %v2997_v9 = vmax.f32 %v2949_v0, %v2950_v7  ;;  %v2952_v53 = vmax.f32 %v2856_v63, %v2904_v62  ;;  %v2540_v58 = vpop.f32.mrb[52].mxu0  ;;  %v2858_v62 = vmax.f32 %v2762_v5, 0.0 }
 0x453   : > { %v2809_v61 = vadd.f32 %v12200_v1, %v2540_v58  ;;  %v2542_v2 = vpop.f32.mrb[53].mxu0 }
 0x454   : > { %v2998_v59 = vmax.f32 %v2951_v10, %v2952_v53  ;;  %v2810_v8 = vadd.f32 %v12205_v4, %v2542_v2  ;;  %v2544_v17 = vpop.f32.mrb[54].mxu0  ;;  %v2765_v10 = vadd.f32 %v12200_v1, %v12110_v21  ;;  %v10662_v53 = vld [vmem:[%s14410_s3 + $0x100] ss:$8 sps:$4 sm:$0xff]   ;;  %v2767_v21 = vadd.f32 %v12200_v1, %v12114_v23 }
 0x455   : > { %v2905_v11 = vmax.f32 %v2809_v61, 0.0  ;;  %v2811_v18 = vadd.f32 %v12200_v1, %v2544_v17  ;;  %v2546_v0 = vpop.f32.mrb[55].mxu0 }
 0x456   : > { %v3021_v58 = vpack.c.bf16 %v2998_v59, %v2997_v9  ;;  %v2906_v63 = vmax.f32 %v2810_v8, 0.0  ;;  %v2812_v12 = vadd.f32 %v12205_v4, %v2546_v0  ;;  %v14433_v9 = vmov 0   ;;  %v10667_v59 = vld [vmem:[%s14410_s3 + $0x114] ss:$8 sps:$4 sm:$0xff]  }
 0x457   : > { %v2953_v13 = vmax.f32 %v2857_v3, %v2905_v11  ;;  %v2907_v14 = vmax.f32 %v2811_v18, 0.0  ;;  %v2768_v3 = vadd.f32 %v12205_v4, %v12116_v24  ;;  %v2861_v0 = vmax.f32 %v2765_v10, 0.0 }
 0x458   : > { %v2954_v7 = vmax.f32 %v2858_v62, %v2906_v63  ;;  %v2908_v16 = vmax.f32 %v2812_v12, 0.0  ;;  %8833 = vmatmul.mubr.msk.bf16.vlgmr.msra.gmra.mrb[0].mxu1 %vm3139_vm3, %v3021_v58  ;;  %v2862_v63 = vmax.f32 %v2766_v6, 0.0  ;;  %v2863_v24 = vmax.f32 %v2767_v21, 0.0 }
 0x459   : > { %v2955_v5 = vmax.f32 %v2859_v60, %v2907_v14  ;;  %3628 = vmatpush1.bf16.msra.mxu1 %v10657_v19  ;;  %3436 = vmatprep.mubr.bf16.mxu1 %v14433_v9  ;;  %v10665_v60 = vld [vmem:[%s14410_s3 + $0x110] ss:$8 sps:$4 sm:$0xff]   ;;  %v2770_v6 = vadd.f32 %v12205_v4, %v12120_v26  ;;  %v2771_v21 = vadd.f32 %v12200_v1, %v12122_v27 }
 0x45a   : > { %v2999_v61 = vmax.f32 %v2953_v13, %v2954_v7  ;;  %v2956_v2 = vmax.f32 %v2860_v15, %v2908_v16  ;;  %v2550_v57 = vpop.f32.mrb[56].mxu0  ;;  %3629 = vmatprep.subr.bf16.mxu1 %v10664_v20  ;;  %v10670_v15 = vld [vmem:[%s14410_s3 + $0x124] ss:$8 sps:$4 sm:$0xff]   ;;  %v2864_v7 = vmax.f32 %v2768_v3, 0.0  ;;  %v2772_v26 = vadd.f32 %v12205_v4, %v12124_v28  ;;  %v10671_v28 = vld [vmem:[%s14410_s3 + $0x130] ss:$8 sps:$4 sm:$0xff]  }
 0x45b   : > { %v2813_v8 = vadd.f32 %v12200_v1, %v2550_v57  ;;  %v2552_v17 = vpop.f32.mrb[57].mxu0 }
 0x45c   : > { %v3000_v11 = vmax.f32 %v2955_v5, %v2956_v2  ;;  %v2814_v22 = vadd.f32 %v12205_v4, %v2552_v17  ;;  %v2554_v18 = vpop.f32.mrb[58].mxu0  ;;  %v2769_v5 = vadd.f32 %v12200_v1, %v12118_v25  ;;  %v10673_v17 = vld [vmem:[%s14410_s3 + $0x134] ss:$8 sps:$4 sm:$0xff]  }
 0x45d   : > { %v2909_v19 = vmax.f32 %v2813_v8, 0.0  ;;  %v2815_v62 = vadd.f32 %v12200_v1, %v2554_v18  ;;  %v2556_v58 = vpop.f32.mrb[59].mxu0  ;;  %3630 = vmatpush1.bf16.msra.mxu1 %v10662_v53 }
 0x45e   : > { %v3022_v12 = vpack.c.bf16 %v3000_v11, %v2999_v61  ;;  %v2910_v20 = vmax.f32 %v2814_v22, 0.0  ;;  %v2816_v23 = vadd.f32 %v12205_v4, %v2556_v58  ;;  %3631 = vmatprep.subr.bf16.mxu1 %v10667_v59  ;;  %v10668_v59 = vld [vmem:[%s14410_s3 + $0x120] ss:$8 sps:$4 sm:$0xff]   ;;  %v2865_v18 = vmax.f32 %v2769_v5, 0.0 }
 0x45f   : > { %v2957_v13 = vmax.f32 %v2861_v0, %v2909_v19  ;;  %v2911_v14 = vmax.f32 %v2815_v62, 0.0  ;;  %v2866_v62 = vmax.f32 %v2770_v6, 0.0  ;;  %v2775_v5 = vadd.f32 %v12200_v1, %v12130_v31 }
 0x460   : > { %v2958_v16 = vmax.f32 %v2862_v63, %v2910_v20  ;;  %v2912_v10 = vmax.f32 %v2816_v23, 0.0  ;;  %8806 = vmatmul.mubr.msk.bf16.vlgmr.msra.gmra.mrb[96].mxu0 %vm3139_vm3, %v3022_v12  ;;  %8834 = vmatmul.mubr.msk.bf16.gmra.mrb[4].mxu1 %vm3139_vm3, %v3022_v12  ;;  %v2867_v20 = vmax.f32 %v2771_v21, 0.0 }
 0x461   : > { %v2959_v53 = vmax.f32 %v2863_v24, %v2911_v14  ;;  %3219 = vmatprep.mubr.bf16.mxu0 %v14433_v9  ;;  %3446 = vmatprep.mubr.bf16.mxu1 %v14433_v9  ;;  %v10676_v24 = vld [vmem:[%s14410_s3 + $0x144] ss:$8 sps:$4 sm:$0xff]  }
 0x462   : > { %v3001_v61 = vmax.f32 %v2957_v13, %v2958_v16  ;;  %v2960_v2 = vmax.f32 %v2864_v7, %v2912_v10  ;;  %v2560_v57 = vpop.f32.mrb[60].mxu0  ;;  %3632 = vmatpush1.bf16.msra.mxu1 %v10665_v60  ;;  %v2868_v13 = vmax.f32 %v2772_v26, 0.0  ;;  %v2773_v7 = vadd.f32 %v12200_v1, %v12126_v29 }
 0x463   : > { %v2817_v25 = vadd.f32 %v12200_v1, %v2560_v57  ;;  %v2562_v8 = vpop.f32.mrb[61].mxu0  ;;  %3633 = vmatprep.subr.bf16.mxu1 %v10670_v15  ;;  %v2774_v16 = vadd.f32 %v12205_v4, %v12128_v30  ;;  %v10679_v30 = vld [vmem:[%s14410_s3 + $0x154] ss:$8 sps:$4 sm:$0xff]  }
 0x464   : > { %v3002_v3 = vmax.f32 %v2959_v53, %v2960_v2  ;;  %v2818_v11 = vadd.f32 %v12205_v4, %v2562_v8  ;;  %v2564_v22 = vpop.f32.mrb[62].mxu0  ;;  %v10674_v2 = vld [vmem:[%s14410_s3 + $0x140] ss:$8 sps:$4 sm:$0xff]  }
 0x465   : > { %v2913_v0 = vmax.f32 %v2817_v25, 0.0  ;;  %v2819_v19 = vadd.f32 %v12200_v1, %v2564_v22  ;;  %v2566_v27 = vpop.f32.mrb[63].mxu0  ;;  %v8857_v8 = vld [vmem:[%s14410_s3 + $0x160] sm:$0xff]  ;;  %v2870_v26 = vmax.f32 %v2774_v16, 0.0 }
 0x466   : > { %v12280_v58 = vpack.c.bf16 %v3002_v3, %v3001_v61  ;;  %v2914_v63 = vmax.f32 %v2818_v11, 0.0  ;;  %v2820_v12 = vadd.f32 %v12205_v4, %v2566_v27  ;;  %3634 = vmatpush1.bf16.msra.mxu1 %v10668_v59  ;;  %v2776_v59 = vadd.f32 %v12205_v4, %v12132_v32  ;;  %v10677_v27 = vld [vmem:[%s14410_s3 + $0x150] ss:$8 sps:$4 sm:$0xff]  }
 0x467   : > { %v2961_v23 = vmax.f32 %v2865_v18, %v2913_v0  ;;  %v2915_v60 = vmax.f32 %v2819_v19, 0.0  ;;  %3635 = vmatprep.subr.bf16.mxu1 %v10673_v17  ;;  %v2869_v17 = vmax.f32 %v2773_v7, 0.0  ;;  %v2871_v18 = vmax.f32 %v2775_v5, 0.0 }
 0x468   : > { %v2962_v14 = vmax.f32 %v2866_v62, %v2914_v63  ;;  %v2916_v15 = vmax.f32 %v2820_v12, 0.0  ;;  %8807 = vmatmul.mubr.msk.bf16.gmra.mrb[100].mxu0 %vm3139_vm3, %v12280_v58  ;;  %8835 = vmatmul.mubr.msk.bf16.gmra.mrb[8].mxu1 %vm3139_vm3, %v12280_v58  ;;  %v8873_v12 = vcombine.high %v8857_v8, %v8857_v8 }
 0x469   : > { %v2963_v10 = vmax.f32 %v2867_v20, %v2915_v60  ;;  %3229 = vmatprep.mubr.bf16.mxu0 %v14433_v9  ;;  %3456 = vmatprep.mubr.bf16.mxu1 %v14433_v9  ;;  %v2872_v20 = vmax.f32 %v2776_v59, 0.0 }
 0x46a   : > { %v3003_v53 = vmax.f32 %v2961_v23, %v2962_v14  ;;  %v2964_v6 = vmax.f32 %v2868_v13, %v2916_v15  ;;  %v2570_v61 = vpop.f32.mrb[64].mxu0  ;;  %3636 = vmatpush1.bf16.msra.mxu1 %v10671_v28  ;;  %v8872_v28 = vcombine.low %v8857_v8, %v8857_v8  ;;  %v2778_v14 = vadd.f32 %v12205_v4, %v12136_v34 }
 0x46b   : > { %v2821_v29 = vadd.f32 %v12200_v1, %v2570_v61  ;;  %v2572_v57 = vpop.f32.mrb[65].mxu0  ;;  %3637 = vmatprep.subr.bf16.mxu1 %v10676_v24  ;;  %v2777_v24 = vadd.f32 %v12200_v1, %v12134_v33 }
 0x46c   : > { %v3004_v31 = vmax.f32 %v2963_v10, %v2964_v6  ;;  %v2822_v21 = vadd.f32 %v12205_v4, %v2572_v57  ;;  %v2574_v25 = vpop.f32.mrb[66].mxu0  ;;  %v2779_v10 = vadd.f32 %v12200_v1, %v12138_v35  ;;  %v3622_v33 = vsel %vm3170_vm2, %v8872_v28, 0 }
 0x46d   : > { %v2917_v3 = vmax.f32 %v2821_v29, 0.0  ;;  %v2823_v11 = vadd.f32 %v12200_v1, %v2574_v25  ;;  %v2576_v22 = vpop.f32.mrb[67].mxu0  ;;  %v2780_v6 = vadd.f32 %v12205_v4, %v12140_v36  ;;  %v2873_v29 = vmax.f32 %v2777_v24, 0.0 }
 0x46e   : > { %v12315_v0 = vpack.c.bf16 %v3004_v31, %v3003_v53  ;;  %v2918_v19 = vmax.f32 %v2822_v21, 0.0  ;;  %v2824_v32 = vadd.f32 %v12205_v4, %v2576_v22  ;;  %3638 = vmatpush1.bf16.msra.mxu1 %v10674_v2  ;;  %v2874_v35 = vmax.f32 %v2778_v14, 0.0 }
 0x46f   : > { %v2965_v62 = vmax.f32 %v2869_v17, %v2917_v3  ;;  %v2919_v63 = vmax.f32 %v2823_v11, 0.0  ;;  %3639 = vmatprep.subr.bf16.mxu1 %v10679_v30  ;;  %v2875_v8 = vmax.f32 %v2779_v10, 0.0  ;;  %v2876_v36 = vmax.f32 %v2780_v6, 0.0 }
 0x470   : > { %v2966_v23 = vmax.f32 %v2870_v26, %v2918_v19  ;;  %v2920_v60 = vmax.f32 %v2824_v32, 0.0  ;;  %8808 = vmatmul.mubr.msk.bf16.gmra.mrb[104].mxu0 %vm3139_vm3, %v12315_v0  ;;  %8836 = vmatmul.mubr.msk.bf16.gmra.mrb[12].mxu1 %vm3139_vm3, %v12315_v0  ;;  %v2781_v22 = vadd.f32 %v12200_v1, %v12142_v37  ;;  %v2782_v19 = vadd.f32 %v12205_v4, %v12144_v38 }
 0x471   : > { %v2967_v13 = vmax.f32 %v2871_v18, %v2919_v63  ;;  %3239 = vmatprep.mubr.bf16.mxu0 %v14433_v9  ;;  %3466 = vmatprep.mubr.bf16.mxu1 %v14433_v9  ;;  %v2783_v63 = vadd.f32 %v12200_v1, %v12146_v39  ;;  %v2784_v37 = vadd.f32 %v12205_v4, %v12148_v40 }
 0x472   : > { %v3005_v15 = vmax.f32 %v2965_v62, %v2966_v23  ;;  %v2968_v7 = vmax.f32 %v2872_v20, %v2920_v60  ;;  %v2580_v16 = vpop.f32.mrb[68].mxu0  ;;  %3640 = vmatpush1.bf16.msra.mxu1 %v10677_v27  ;;  %v2877_v24 = vmax.f32 %v2781_v22, 0.0 }
 0x473   : > { %v2825_v5 = vadd.f32 %v12200_v1, %v2580_v16  ;;  %v2582_v53 = vpop.f32.mrb[69].mxu0  ;;  %8874 = vmatprep.subr.msk.bf16.mxu1 %vm3170_vm2, %v8873_v12  ;;  %v2879_v10 = vmax.f32 %v2783_v63, 0.0 }
 0x474   : > { %v3006_v61 = vmax.f32 %v2967_v13, %v2968_v7  ;;  %v2826_v34 = vadd.f32 %v12205_v4, %v2582_v53  ;;  %v2584_v2 = vpop.f32.mrb[70].mxu0 }
 0x475   : > { %v2921_v57 = vmax.f32 %v2825_v5, 0.0  ;;  %v2827_v30 = vadd.f32 %v12200_v1, %v2584_v2  ;;  %v2586_v59 = vpop.f32.mrb[71].mxu0  ;;  %v2786_v2 = vadd.f32 %v12205_v4, %v12152_v42 }
 0x476   : > { %v12340_v31 = vpack.c.bf16 %v3006_v61, %v3005_v15  ;;  %v2922_v21 = vmax.f32 %v2826_v34, 0.0  ;;  %v2828_v25 = vadd.f32 %v12205_v4, %v2586_v59  ;;  %3642 = vmatpush1.bf16.msra.mxu1 %v3622_v33  ;;  %v2878_v15 = vmax.f32 %v2782_v19, 0.0 }
 0x477   : > { %v2969_v17 = vmax.f32 %v2873_v29, %v2921_v57  ;;  %v2923_v26 = vmax.f32 %v2827_v30, 0.0  ;;  %v2880_v33 = vmax.f32 %v2784_v37, 0.0  ;;  %v2785_v61 = vadd.f32 %v12200_v1, %v12150_v41 }
 0x478   : > { %v2970_v3 = vmax.f32 %v2874_v35, %v2922_v21  ;;  %v2924_v11 = vmax.f32 %v2828_v25, 0.0  ;;  %8809 = vmatmul.mubr.msk.bf16.gmra.mrb[108].mxu0 %vm3139_vm3, %v12340_v31  ;;  %8837 = vmatmul.mubr.msk.bf16.gmra.mrb[16].mxu1 %vm3139_vm3, %v12340_v31  ;;  %v2787_v59 = vadd.f32 %v12200_v1, %v12154_v43  ;;  %v2788_v41 = vadd.f32 %v12205_v4, %v12156_v44 }
 0x479   : > { %v2971_v18 = vmax.f32 %v2875_v8, %v2923_v26  ;;  %3249 = vmatprep.mubr.bf16.mxu0 %v14433_v9  ;;  %3476 = vmatprep.mubr.bf16.mxu1 %v14433_v9  ;;  %v2881_v26 = vmax.f32 %v2785_v61, 0.0  ;;  %v2790_v37 = vadd.f32 %v12205_v4, %v12160_v46 }
 0x47a   : > { %v3007_v32 = vmax.f32 %v2969_v17, %v2970_v3  ;;  %v2972_v27 = vmax.f32 %v2876_v36, %v2924_v11  ;;  %v2590_v62 = vpop.f32.mrb[72].mxu0  ;;  %v2882_v11 = vmax.f32 %v2786_v2, 0.0  ;;  %v2883_v19 = vmax.f32 %v2787_v59, 0.0 }
 0x47b   : > { %v2829_v12 = vadd.f32 %v12200_v1, %v2590_v62  ;;  %v2592_v28 = vpop.f32.mrb[73].mxu0  ;;  %v2884_v62 = vmax.f32 %v2788_v41, 0.0  ;;  %v2794_v59 = vadd.f32 %v12205_v4, %v12168_v50 }
 0x47c   : > { %v3008_v20 = vmax.f32 %v2971_v18, %v2972_v27  ;;  %v2830_v23 = vadd.f32 %v12205_v4, %v2592_v28  ;;  %v2594_v60 = vpop.f32.mrb[74].mxu0 }
 0x47d   : > { %v2925_v13 = vmax.f32 %v2829_v12, 0.0  ;;  %v2831_v38 = vadd.f32 %v12200_v1, %v2594_v60  ;;  %v2596_v14 = vpop.f32.mrb[75].mxu0  ;;  %v2789_v12 = vadd.f32 %v12200_v1, %v12158_v45  ;;  %v2792_v45 = vadd.f32 %v12205_v4, %v12164_v48 }
 0x47e   : > { %v12360_v7 = vpack.c.bf16 %v3008_v20, %v3007_v32  ;;  %v2926_v16 = vmax.f32 %v2830_v23, 0.0  ;;  %v2832_v39 = vadd.f32 %v12205_v4, %v2596_v14 }
 0x47f   : > { %v2973_v5 = vmax.f32 %v2877_v24, %v2925_v13  ;;  %v2927_v53 = vmax.f32 %v2831_v38, 0.0  ;;  %v2791_v24 = vadd.f32 %v12200_v1, %v12162_v47  ;;  %v2888_v2 = vmax.f32 %v2792_v45, 0.0 }
 0x480   : > { %v2974_v40 = vmax.f32 %v2878_v15, %v2926_v16  ;;  %v2928_v6 = vmax.f32 %v2832_v39, 0.0  ;;  %8810 = vmatmul.mubr.msk.bf16.gmra.mrb[112].mxu0 %vm3139_vm3, %v12360_v7  ;;  %8838 = vmatmul.mubr.msk.bf16.gmra.mrb[20].mxu1 %vm3139_vm3, %v12360_v7  ;;  %v2885_v39 = vmax.f32 %v2789_v12, 0.0 }
 0x481   : > { %v2975_v34 = vmax.f32 %v2879_v10, %v2927_v53  ;;  %3259 = vmatprep.mubr.bf16.mxu0 %v14433_v9  ;;  %3486 = vmatprep.mubr.bf16.mxu1 %v14433_v9  ;;  %v2886_v53 = vmax.f32 %v2790_v37, 0.0 }
 0x482   : > { %v3009_v29 = vmax.f32 %v2973_v5, %v2974_v40  ;;  %v2976_v57 = vmax.f32 %v2880_v33, %v2928_v6  ;;  %v2600_v30 = vpop.f32.mrb[76].mxu0  ;;  %v2887_v6 = vmax.f32 %v2791_v24, 0.0 }
 0x483   : > { %v2833_v35 = vadd.f32 %v12200_v1, %v2600_v30  ;;  %v2602_v21 = vpop.f32.mrb[77].mxu0 }
 0x484   : > { %v3010_v25 = vmax.f32 %v2975_v34, %v2976_v57  ;;  %v2834_v8 = vadd.f32 %v12205_v4, %v2602_v21  ;;  %v2604_v17 = vpop.f32.mrb[78].mxu0  ;;  %v2793_v57 = vadd.f32 %v12200_v1, %v12166_v49  ;;  %v2796_v49 = vadd.f32 %v12205_v4, %v12172_v52 }
 0x485   : > { %v2929_v36 = vmax.f32 %v2833_v35, 0.0  ;;  %v2835_v42 = vadd.f32 %v12200_v1, %v2604_v17  ;;  %v2606_v3 = vpop.f32.mrb[79].mxu0 }
 0x486   : > { %v12380_v22 = vpack.c.bf16 %v3010_v25, %v3009_v29  ;;  %v2930_v18 = vmax.f32 %v2834_v8, 0.0  ;;  %v2836_v43 = vadd.f32 %v12205_v4, %v2606_v3  ;;  %v2795_v25 = vadd.f32 %v12200_v1, %v12170_v51 }
 0x487   : > { %v2977_v32 = vmax.f32 %v2881_v26, %v2929_v36  ;;  %v2931_v27 = vmax.f32 %v2835_v42, 0.0  ;;  %v2889_v3 = vmax.f32 %v2793_v57, 0.0  ;;  %v14435_v57 = vld [vmem:[#allocation6_spill] sm:$0xff] }
 0x488   : > { %v2978_v44 = vmax.f32 %v2882_v11, %v2930_v18  ;;  %v2932_v63 = vmax.f32 %v2836_v43, 0.0  ;;  %8811 = vmatmul.mubr.msk.bf16.gmra.mrb[116].mxu0 %vm3139_vm3, %v12380_v22  ;;  %8839 = vmatmul.mubr.msk.bf16.gmra.mrb[24].mxu1 %vm3139_vm3, %v12380_v22  ;;  %v2890_v43 = vmax.f32 %v2794_v59, 0.0 }
 0x489   : > { %v2979_v28 = vmax.f32 %v2883_v19, %v2931_v27  ;;  %3269 = vmatprep.mubr.bf16.mxu0 %v14433_v9  ;;  %3496 = vmatprep.mubr.bf16.mxu1 %v14433_v9  ;;  %v2891_v27 = vmax.f32 %v2795_v25, 0.0 }
 0x48a   : > { %v3011_v20 = vmax.f32 %v2977_v32, %v2978_v44  ;;  %v2980_v23 = vmax.f32 %v2884_v62, %v2932_v63  ;;  %v2610_v60 = vpop.f32.mrb[80].mxu0  ;;  %v2892_v63 = vmax.f32 %v2796_v49, 0.0 }
 0x48b   : > { %v2837_v13 = vadd.f32 %v12200_v1, %v2610_v60  ;;  %v2612_v38 = vpop.f32.mrb[81].mxu0 }
 0x48c   : > { %v3012_v14 = vmax.f32 %v2979_v28, %v2980_v23  ;;  %v2838_v15 = vadd.f32 %v12205_v4, %v2612_v38  ;;  %v2614_v16 = vpop.f32.mrb[82].mxu0  ;;  %v2797_v28 = vadd.f32 %v12200_v1, %v12174_v54 }
 0x48d   : > { %v2933_v10 = vmax.f32 %v2837_v13, 0.0  ;;  %v2839_v46 = vadd.f32 %v12200_v1, %v2614_v16  ;;  %v2616_v5 = vpop.f32.mrb[83].mxu0  ;;  %v2799_v13 = vadd.f32 %v12200_v1, %v12178_v56 }
 0x48e   : > { %v12400_v33 = vpack.c.bf16 %v3012_v14, %v3011_v20  ;;  %v2934_v40 = vmax.f32 %v2838_v15, 0.0  ;;  %v2840_v47 = vadd.f32 %v12205_v4, %v2616_v5  ;;  %v2798_v20 = vadd.f32 %v12205_v4, %v12176_v55  ;;  %v14434_v14 = vld [vmem:[#allocation3_spill] sm:$0xff] }
 0x48f   : > { %v2981_v61 = vmax.f32 %v2885_v39, %v2933_v10  ;;  %v2935_v34 = vmax.f32 %v2839_v46, 0.0  ;;  %v2800_v54 = vadd.f32 %v12205_v4, %v14434_v14  ;;  %v2893_v10 = vmax.f32 %v2797_v28, 0.0  ;;  %v10690_v14 = vld [vmem:[%s14412_s5 + $0x1dc] ss:$16 sps:$4 sm:$0xff]  }
 0x490   : > { %v2982_v48 = vmax.f32 %v2886_v53, %v2934_v40  ;;  %v2936_v29 = vmax.f32 %v2840_v47, 0.0  ;;  %8812 = vmatmul.mubr.msk.bf16.gmra.mrb[120].mxu0 %vm3139_vm3, %v12400_v33  ;;  %8840 = vmatmul.mubr.msk.bf16.gmra.mrb[28].mxu1 %vm3139_vm3, %v12400_v33  ;;  %v2894_v53 = vmax.f32 %v2798_v20, 0.0 }
 0x491   : > { %v2983_v30 = vmax.f32 %v2887_v6, %v2935_v34  ;;  %3279 = vmatprep.mubr.bf16.mxu0 %v14433_v9  ;;  %3506 = vmatprep.mubr.bf16.mxu1 %v14433_v9  ;;  %v2895_v6 = vmax.f32 %v2799_v13, 0.0 }
 0x492   : > { %v3013_v35 = vmax.f32 %v2981_v61, %v2982_v48  ;;  %v2984_v21 = vmax.f32 %v2888_v2, %v2936_v29  ;;  %v2620_v41 = vpop.f32.mrb[84].mxu0  ;;  %v2896_v2 = vmax.f32 %v2800_v54, 0.0  ;;  %v10693_v54 = vld [vmem:[%s14412_s5 + $0x1fc] ss:$16 sps:$4 sm:$0xff]  }
 0x493   : > { %v2841_v8 = vadd.f32 %v12200_v1, %v2620_v41  ;;  %v2622_v17 = vpop.f32.mrb[85].mxu0 }
 0x494   : > { %v3014_v26 = vmax.f32 %v2983_v30, %v2984_v21  ;;  %v2842_v36 = vadd.f32 %v12205_v4, %v2622_v17  ;;  %v2624_v42 = vpop.f32.mrb[86].mxu0  ;;  %v2801_v30 = vadd.f32 %v12200_v1, %v14435_v57  ;;  %v14437_v17 = vld [vmem:[#allocation8_spill] sm:$0xff]  ;;  %v10724_v57 = vld [vmem:[%s14412_s5 + $0x298] ss:$16 sps:$4 sm:$0xff]  }
 0x495   : > { %v2937_v11 = vmax.f32 %v2841_v8, 0.0  ;;  %v2843_v50 = vadd.f32 %v12200_v1, %v2624_v42  ;;  %v2626_v18 = vpop.f32.mrb[87].mxu0  ;;  %v2803_v49 = vadd.f32 %v12200_v1, %v14437_v17  ;;  %v14438_v42 = vld [vmem:[#allocation9_spill] sm:$0xff]  ;;  %v10738_v17 = vld [vmem:[%s14412_s5 + $0x294] ss:$16 sps:$4 sm:$0xff]  }
 0x496   : > { %v12420_v19 = vpack.c.bf16 %v3014_v26, %v3013_v35  ;;  %v2938_v32 = vmax.f32 %v2842_v36, 0.0  ;;  %v2844_v51 = vadd.f32 %v12205_v4, %v2626_v18  ;;  %v14436_v35 = vld [vmem:[#allocation7_spill] sm:$0xff] }
 0x497   : > { %v2985_v62 = vmax.f32 %v2889_v3, %v2937_v11  ;;  %v2939_v44 = vmax.f32 %v2843_v50, 0.0  ;;  %v2802_v21 = vadd.f32 %v12205_v4, %v14436_v35  ;;  %v2804_v3 = vadd.f32 %v12205_v4, %v14438_v42  ;;  %v10727_v35 = vld [vmem:[%s14412_s5 + $0x250] ss:$16 sps:$4 sm:$0xff]   ;;  %v10741_v42 = vld [vmem:[%s14412_s5 + $0x2dc] ss:$16 sps:$4 sm:$0xff]  }
 0x498   : > { %v2986_v52 = vmax.f32 %v2890_v43, %v2938_v32  ;;  %v2940_v12 = vmax.f32 %v2844_v51, 0.0  ;;  %8813 = vmatmul.mubr.msk.bf16.gmra.mrb[124].mxu0 %vm3139_vm3, %v12420_v19  ;;  %8841 = vmatmul.mubr.msk.bf16.gmra.mrb[32].mxu1 %vm3139_vm3, %v12420_v19  ;;  %v2897_v43 = vmax.f32 %v2801_v30, 0.0  ;;  %v10726_v30 = vld [vmem:[%s14412_s5 + $0x29c] ss:$16 sps:$4 sm:$0xff]  }
 0x499   : > { %v2987_v37 = vmax.f32 %v2891_v27, %v2939_v44  ;;  %3289 = vmatprep.mubr.bf16.mxu0 %v14433_v9  ;;  %3516 = vmatprep.mubr.bf16.mxu1 %v14433_v9  ;;  %v2900_v20 = vmax.f32 %v2804_v3, 0.0  ;;  %v10739_v3 = vld [vmem:[%s14412_s5 + $0x2d8] ss:$16 sps:$4 sm:$0xff]  }
 0x49a   : > { %v3015_v23 = vmax.f32 %v2985_v62, %v2986_v52  ;;  %v2988_v60 = vmax.f32 %v2892_v63, %v2940_v12  ;;  %v2630_v24 = vpop.f32.mrb[88].mxu0  ;;  %v2898_v62 = vmax.f32 %v2802_v21, 0.0  ;;  %v2899_v12 = vmax.f32 %v2803_v49, 0.0  ;;  %v10730_v21 = vld [vmem:[%s14412_s5 + $0x270] ss:$16 sps:$4 sm:$0xff]  }
 0x49b   : > { %v2845_v38 = vadd.f32 %v12200_v1, %v2630_v24  ;;  %v2632_v45 = vpop.f32.mrb[89].mxu0  ;;  %v10736_v49 = vld [vmem:[%s14412_s5 + $0x290] ss:$16 sps:$4 sm:$0xff]  }
 0x49c   : > { %v3016_v15 = vmax.f32 %v2987_v37, %v2988_v60  ;;  %v2846_v16 = vadd.f32 %v12205_v4, %v2632_v45  ;;  %v2634_v39 = vpop.f32.mrb[90].mxu0 }
 0x49d   : > { %v2941_v46 = vmax.f32 %v2845_v38, 0.0  ;;  %v2847_v55 = vadd.f32 %v12200_v1, %v2634_v39  ;;  %v2636_v5 = vpop.f32.mrb[91].mxu0  ;;  %v10697_v39 = vld [vmem:[%s14412_s5 + $0x190] ss:$16 sps:$4 sm:$0xff]  }
 0x49e   : > { %v12440_v40 = vpack.c.bf16 %v3016_v15, %v3015_v23  ;;  %v2942_v47 = vmax.f32 %v2846_v16, 0.0  ;;  %v2848_v56 = vadd.f32 %v12205_v4, %v2636_v5  ;;  %v10694_v15 = vld [vmem:[%s14412_s5 + $0x218] ss:$16 sps:$4 sm:$0xff]   ;;  %v10699_v16 = vld [vmem:[%s14412_s5 + $0x194] ss:$16 sps:$4 sm:$0xff]  }
 0x49f   : > { %v2989_v61 = vmax.f32 %v2893_v10, %v2941_v46  ;;  %v2943_v34 = vmax.f32 %v2847_v55, 0.0  ;;  %4279 = vmatprep.subr.bf16.mxu0 %v10699_v16  ;;  %v10700_v10 = vld [vmem:[%s14412_s5 + $0x238] ss:$16 sps:$4 sm:$0xff]   ;;  %v10703_v46 = vld [vmem:[%s14412_s5 + $0x1b0] ss:$16 sps:$4 sm:$0xff]  }
 0x4a0   : > { %v2990_v48 = vmax.f32 %v2894_v53, %v2942_v47  ;;  %v2944_v29 = vmax.f32 %v2848_v56, 0.0  ;;  %8814 = vmatmul.mubr.msk.bf16.gmra.mrb[128].mxu0 %vm3139_vm3, %v12440_v40  ;;  %8842 = vmatmul.mubr.msk.bf16.gmra.mrb[36].mxu1 %vm3139_vm3, %v12440_v40  ;;  %v10705_v55 = vld [vmem:[%s14412_s5 + $0x1b4] ss:$16 sps:$4 sm:$0xff]   ;;  %v10706_v53 = vld [vmem:[%s14412_s5 + $0x1d0] ss:$16 sps:$4 sm:$0xff]  }
 0x4a1   : > { %v2991_v59 = vmax.f32 %v2895_v6, %v2943_v34  ;;  %3299 = vmatprep.mubr.bf16.mxu0 %v14433_v9  ;;  %3659 = vmatprep.mubr.bf16.mxu1 %v14433_v9  ;;  %v10708_v5 = vld [vmem:[%s14412_s5 + $0x1d4] ss:$16 sps:$4 sm:$0xff]   ;;  %v10709_v47 = vld [vmem:[%s14412_s5 + $0x258] ss:$16 sps:$4 sm:$0xff]   ;;  %v10712_v56 = vld [vmem:[%s14412_s5 + $0x1f0] ss:$16 sps:$4 sm:$0xff]  }
 0x4a2   : > { %v3017_v41 = vmax.f32 %v2989_v61, %v2990_v48  ;;  %v2992_v25 = vmax.f32 %v2896_v2, %v2944_v29  ;;  %v2640_v8 = vpop.f32.mrb[92].mxu0  ;;  %4280 = vmatpush1.bf16.msra.mxu0 %v10697_v39  ;;  %v10714_v6 = vld [vmem:[%s14412_s5 + $0x1f4] ss:$16 sps:$4 sm:$0xff]   ;;  %v10715_v34 = vld [vmem:[%s14412_s5 + $0x210] ss:$16 sps:$4 sm:$0xff]  }
 0x4a3   : > { %v2849_v26 = vadd.f32 %v12200_v1, %v2640_v8  ;;  %v2642_v36 = vpop.f32.mrb[93].mxu0  ;;  %4281 = vmatprep.subr.bf16.mxu0 %v10705_v55  ;;  %v10717_v61 = vld [vmem:[%s14412_s5 + $0x214] ss:$16 sps:$4 sm:$0xff]   ;;  %v10718_v2 = vld [vmem:[%s14412_s5 + $0x278] ss:$16 sps:$4 sm:$0xff]  }
 0x4a4   : > { %v3018_v11 = vmax.f32 %v2991_v59, %v2992_v25  ;;  %v2850_v50 = vadd.f32 %v12205_v4, %v2642_v36  ;;  %v2644_v18 = vpop.f32.mrb[94].mxu0  ;;  %v10720_v48 = vld [vmem:[%s14412_s5 + $0x27c] ss:$16 sps:$4 sm:$0xff]   ;;  %v10723_v29 = vld [vmem:[%s14412_s5 + $0x234] ss:$16 sps:$4 sm:$0xff]  }
 0x4a5   : > { %v2945_v32 = vmax.f32 %v2849_v26, 0.0  ;;  %v2851_v51 = vadd.f32 %v12200_v1, %v2644_v18  ;;  %v2646_v27 = vpop.f32.mrb[95].mxu0  ;;  %v10729_v59 = vld [vmem:[%s14412_s5 + $0x254] ss:$16 sps:$4 sm:$0xff]   ;;  %v10733_v25 = vld [vmem:[%s14412_s5 + $0x2b8] ss:$16 sps:$4 sm:$0xff]  }
 0x4a6   : > { %v12460_v44 = vpack.c.bf16 %v3018_v11, %v3017_v41  ;;  %v2946_v63 = vmax.f32 %v2850_v50, 0.0  ;;  %v2852_v52 = vadd.f32 %v12205_v4, %v2646_v27  ;;  %v10682_v4 = vld [vmem:[%s14412_s5 + $0x198] ss:$16 sps:$4 sm:$0xff]   ;;  %4282 = vmatpush1.bf16.msra.mxu0 %v10703_v46  ;;  %v10732_v41 = vld [vmem:[%s14412_s5 + $0x274] ss:$16 sps:$4 sm:$0xff]  }
 0x4a7   : > { %v2993_v28 = vmax.f32 %v2897_v43, %v2945_v32  ;;  %v2947_v37 = vmax.f32 %v2851_v51, 0.0  ;;  %4283 = vmatprep.subr.bf16.mxu0 %v10708_v5  ;;  %v10735_v8 = vld [vmem:[%s14412_s5 + $0x2bc] ss:$16 sps:$4 sm:$0xff]   ;;  %v10744_v26 = vld [vmem:[%s14412_s5 + $0x2b4] ss:$16 sps:$4 sm:$0xff]  }
 0x4a8   : > { %v2994_v23 = vmax.f32 %v2898_v62, %v2946_v63  ;;  %v2948_v60 = vmax.f32 %v2852_v52, 0.0  ;;  %8815 = vmatmul.mubr.msk.bf16.gmra.mrb[132].mxu0 %vm3139_vm3, %v12460_v44  ;;  %8875 = vmatmul.mubr.msk.bf16.vlgmr.msra.gmra.mrb[0].mxu1 %vm3139_vm3, %v12280_v58  ;;  %v10684_v58 = vld [vmem:[%s14412_s5 + $0x19c] ss:$16 sps:$4 sm:$0xff]   ;;  %v10742_v36 = vld [vmem:[%s14412_s5 + $0x2b0] ss:$16 sps:$4 sm:$0xff]  }
 0x4a9   : > { %v2995_v1 = vmax.f32 %v2899_v12, %v2947_v37  ;;  %3669 = vmatprep.mubr.bf16.mxu1 %v14433_v9  ;;  %4322 = vmatprep.subr.bf16.mxu1 %v10684_v58  ;;  %v10747_v11 = vld [vmem:[%s14412_s5 + $0x2d4] ss:$16 sps:$4 sm:$0xff]   ;;  %v10745_v50 = vld [vmem:[%s14412_s5 + $0x2d0] ss:$16 sps:$4 sm:$0xff]   ;;  %v10750_v18 = vld [vmem:[%s14412_s5 + $0x2fc] ss:$16 sps:$4 sm:$0xff]  }
 0x4aa   : > { %v3019_v24 = vmax.f32 %v2993_v28, %v2994_v23  ;;  %v2996_v13 = vmax.f32 %v2900_v20, %v2948_v60  ;;  %4323 = vmatpush1.bf16.msra.mxu1 %v10682_v4  ;;  %4284 = vmatpush1.bf16.msra.mxu0 %v10706_v53  ;;  %v10748_v43 = vld [vmem:[%s14412_s5 + $0x2f8] ss:$16 sps:$4 sm:$0xff]   ;;  %v10753_v32 = vld [vmem:[%s14412_s5 + $0x2f4] ss:$16 sps:$4 sm:$0xff]   ;;  %v10751_v51 = vld [vmem:[%s14412_s5 + $0x2f0] ss:$16 sps:$4 sm:$0xff]  }
 0x4ab   : > { %4285 = vmatprep.subr.bf16.mxu0 %v10714_v6  ;;  %v8934_v27 = vld [vmem:[%s14412_s5 + $0x318] sm:$0xff]  ;;  %v8933_v63 = vld [vmem:[%s14412_s5 + $0x310] sm:$0xff] }
 0x4ac   : > { %v3020_v38 = vmax.f32 %v2995_v1, %v2996_v13  ;;  %v8986_v62 = vcombine.high %v8934_v27, %v8934_v27  ;;  %v8984_v52 = vcombine.high %v8933_v63, %v8933_v63  ;;  %v8983_v12 = vcombine.low %v8933_v63, %v8933_v63  ;;  %v10760_v20 = vld [vmem:[%s14412_s5 + $0x4] ss:$16 sps:$4 sm:$0xff]  }
 0x4ae   : > { %v12468_v45 = vpack.c.bf16 %v3020_v38, %v3019_v24  ;;  %4286 = vmatpush1.bf16.msra.mxu0 %v10712_v56  ;;  %v4268_v37 = vsel %vm3170_vm2, %v8983_v12, 0 }
 0x4af   : > { %4287 = vmatprep.subr.bf16.mxu0 %v10717_v61 }
 0x4b0   : > { %8876 = vmatmul.mubr.msk.bf16.gmra.mrb[4].mxu1 %vm3139_vm3, %v12315_v0  ;;  %v10685_v0 = vld [vmem:[%s14412_s5 + $0x1b8] ss:$16 sps:$4 sm:$0xff]  }
 0x4b1   : > { %3679 = vmatprep.mubr.bf16.mxu1 %v14433_v9 }
 0x4b2   : > { %4288 = vmatpush1.bf16.msra.mxu0 %v10715_v34 }
 0x4b3   : > { %4289 = vmatprep.subr.bf16.mxu0 %v10723_v29 }
 0x4b8   : > { %8877 = vmatmul.mubr.msk.bf16.gmra.mrb[8].mxu1 %vm3139_vm3, %v12340_v31  ;;  %v10687_v31 = vld [vmem:[%s14412_s5 + $0x1bc] ss:$16 sps:$4 sm:$0xff]  }
 0x4b9   : > { %3689 = vmatprep.mubr.bf16.mxu1 %v14433_v9  ;;  %4324 = vmatprep.subr.bf16.mxu1 %v10687_v31 }
 0x4ba   : > { %4325 = vmatpush1.bf16.msra.mxu1 %v10685_v0 }
 0x4bb   : > { %4326 = vmatprep.subr.bf16.mxu1 %v10690_v14 }
 0x4c0   : > { %8878 = vmatmul.mubr.msk.bf16.gmra.mrb[12].mxu1 %vm3139_vm3, %v12360_v7  ;;  %v10688_v7 = vld [vmem:[%s14412_s5 + $0x1d8] ss:$16 sps:$4 sm:$0xff]  }
 0x4c1   : > { %3699 = vmatprep.mubr.bf16.mxu1 %v14433_v9  ;;  %4327 = vmatpush1.bf16.msra.mxu1 %v10688_v7 }
 0x4c2   : > { %4328 = vmatprep.subr.bf16.mxu1 %v10693_v54 }
 0x4c8   : > { %8879 = vmatmul.mubr.msk.bf16.gmra.mrb[16].mxu1 %vm3139_vm3, %v12380_v22  ;;  %v10691_v22 = vld [vmem:[%s14412_s5 + $0x1f8] ss:$16 sps:$4 sm:$0xff]  }
 0x4c9   : > { %3709 = vmatprep.mubr.bf16.mxu1 %v14433_v9  ;;  %4329 = vmatpush1.bf16.msra.mxu1 %v10691_v22 }
 0x4d0   : > { %8880 = vmatmul.mubr.msk.bf16.gmra.mrb[20].mxu1 %vm3139_vm3, %v12400_v33  ;;  %v10696_v33 = vld [vmem:[%s14412_s5 + $0x21c] ss:$16 sps:$4 sm:$0xff]  }
 0x4d1   : > { %3719 = vmatprep.mubr.bf16.mxu1 %v14433_v9  ;;  %4330 = vmatprep.subr.bf16.mxu1 %v10696_v33 }
 0x4d2   : > { %4331 = vmatpush1.bf16.msra.mxu1 %v10694_v15 }
 0x4d8   : > { %8881 = vmatmul.mubr.msk.bf16.gmra.mrb[24].mxu1 %vm3139_vm3, %v12420_v19  ;;  %v10702_v19 = vld [vmem:[%s14412_s5 + $0x23c] ss:$16 sps:$4 sm:$0xff]  }
 0x4d9   : > { %3729 = vmatprep.mubr.bf16.mxu1 %v14433_v9  ;;  %4332 = vmatprep.subr.bf16.mxu1 %v10702_v19 }
 0x4da   : > { %4333 = vmatpush1.bf16.msra.mxu1 %v10700_v10 }
 0x4e0   : > { %8882 = vmatmul.mubr.msk.bf16.gmra.mrb[28].mxu1 %vm3139_vm3, %v12440_v40  ;;  %v10711_v40 = vld [vmem:[%s14412_s5 + $0x25c] ss:$16 sps:$4 sm:$0xff]  }
 0x4e1   : > { %3739 = vmatprep.mubr.bf16.mxu1 %v14433_v9  ;;  %4334 = vmatprep.subr.bf16.mxu1 %v10711_v40 }
 0x4e2   : > { %4335 = vmatpush1.bf16.msra.mxu1 %v10709_v47 }
 0x4e3   : > { %4336 = vmatprep.subr.bf16.mxu1 %v10720_v48 }
 0x4e6   : > { %4337 = vmatpush1.bf16.msra.mxu1 %v10718_v2 }
 0x4e7   : > { %4338 = vmatprep.subr.bf16.mxu1 %v10726_v30  ;;  %v3800_v30 = vld [vmem:[%s14411_s4] sm:$0x3] }
 0x4e8   : > { %8883 = vmatmul.mubr.msk.bf16.gmra.mrb[32].mxu1 %vm3139_vm3, %v12460_v44  ;;  %v8985_v44 = vcombine.low %v8934_v27, %v8934_v27 }
 0x4e9   : > { %3749 = vmatprep.mubr.bf16.mxu1 %v14433_v9  ;;  %v10721_v9 = vld [vmem:[%s14412_s5 + $0x230] ss:$16 sps:$4 sm:$0xff]  }
 0x4ea   : > { %4290 = vmatpush1.bf16.msra.mxu0 %v10721_v9  ;;  %4339 = vmatpush1.bf16.msra.mxu1 %v10724_v57  ;;  %v4274_v28 = vsel %vm3170_vm2, %v8985_v44, 0 }
 0x4eb   : > { %4291 = vmatprep.subr.bf16.mxu0 %v10729_v59  ;;  %4340 = vmatprep.subr.bf16.mxu1 %v10735_v8  ;;  %v14439_v59 = vld [vmem:[#allocation4_spill] sm:$0xff] }
 0x4ee   : > { %4292 = vmatpush1.bf16.msra.mxu0 %v10727_v35  ;;  %4341 = vmatpush1.bf16.msra.mxu1 %v10733_v25  ;;  %v12715_v35 = vrot.slane %v3800_v30, %v14439_v59  ;;  %v14440_v25 = vld [vmem:[#allocation5_spill] sm:$0xff] }
 0x4ef   : > { %4293 = vmatprep.subr.bf16.mxu0 %v10732_v41  ;;  %4342 = vmatprep.subr.bf16.mxu1 %v10741_v42  ;;  %v12720_v8 = vrot.slane %v3800_v30, %v14440_v25 }
 0x4f0   : > { %8884 = vmatmul.mubr.msk.bf16.gmra.mrb[36].mxu1 %vm3139_vm3, %v12468_v45 }
 0x4f2   : > { %4294 = vmatpush1.bf16.msra.mxu0 %v10730_v21  ;;  %4343 = vmatpush1.bf16.msra.mxu1 %v10739_v3 }
 0x4f3   : > { %4295 = vmatprep.subr.bf16.mxu0 %v10738_v17  ;;  %4344 = vmatprep.subr.bf16.mxu1 %v10750_v18 }
 0x4f6   : > { %4296 = vmatpush1.bf16.msra.mxu0 %v10736_v49  ;;  %4345 = vmatpush1.bf16.msra.mxu1 %v10748_v43 }
 0x4f7   : > { %4297 = vmatprep.subr.bf16.mxu0 %v10744_v26  ;;  %8989 = vmatprep.subr.msk.bf16.mxu1 %vm3170_vm2, %v8986_v62 }
 0x4fa   : > { %4298 = vmatpush1.bf16.msra.mxu0 %v10742_v36  ;;  %4347 = vmatpush1.bf16.msra.mxu1 %v4274_v28 }
 0x4fb   : > { %4299 = vmatprep.subr.bf16.mxu0 %v10747_v11  ;;  %4630 = vmatprep.subr.bf16.mxu1 %v10760_v20 }
 0x4fe   : > { %4300 = vmatpush1.bf16.msra.mxu0 %v10745_v50 }
 0x4ff   : > { %4301 = vmatprep.subr.bf16.mxu0 %v10753_v32 }
 0x502   : > { %4302 = vmatpush1.bf16.msra.mxu0 %v10751_v51 }
 0x503   : > { %8987 = vmatprep.subr.msk.bf16.mxu0 %vm3170_vm2, %v8984_v52 }
 0x506   : > { %4304 = vmatpush1.bf16.msra.mxu0 %v4268_v37 }
 0x533   : > { %v3211_v23 = vpop.f32.mrb[96].mxu0 }
 0x534   : > { %v3213_v60 = vpop.f32.mrb[97].mxu0 }
 0x535   : > { %v3215_v1 = vpop.f32.mrb[98].mxu0 }
 0x536   : > { %v3217_v24 = vpop.f32.mrb[99].mxu0 }
 0x53b   : > { %v3221_v13 = vpop.f32.mrb[100].mxu0 }
 0x53c   : > { %v3223_v38 = vpop.f32.mrb[101].mxu0 }
 0x53d   : > { %v3225_v45 = vpop.f32.mrb[102].mxu0 }
 0x53e   : > { %v12653_v4 = vpop.f32.mrb[103].mxu0 }
 0x543   : > { %v12655_v58 = vpop.f32.mrb[104].mxu0 }
 0x544   : > { %v12657_v0 = vpop.f32.mrb[105].mxu0 }
 0x545   : > { %v12659_v31 = vpop.f32.mrb[106].mxu0 }
 0x546   : > { %v12661_v7 = vpop.f32.mrb[107].mxu0 }
 0x54b   : > { %v12663_v14 = vpop.f32.mrb[108].mxu0 }
 0x54c   : > { %v12665_v22 = vpop.f32.mrb[109].mxu0 }
 0x54d   : > { %v12667_v54 = vpop.f32.mrb[110].mxu0 }
 0x54e   : > { %v12669_v15 = vpop.f32.mrb[111].mxu0 }
 0x553   : > { %v12671_v33 = vpop.f32.mrb[112].mxu0 }
 0x554   : > { %v12673_v16 = vpop.f32.mrb[113].mxu0 }
 0x555   : > { %v12675_v39 = vpop.f32.mrb[114].mxu0 }
 0x556   : > { %v12677_v10 = vpop.f32.mrb[115].mxu0 }
 0x55b   : > { %v12679_v19 = vpop.f32.mrb[116].mxu0 }
 0x55c   : > { %v12681_v46 = vpop.f32.mrb[117].mxu0 }
 0x55d   : > { %v12683_v55 = vpop.f32.mrb[118].mxu0 }
 0x55e   : > { %v12685_v5 = vpop.f32.mrb[119].mxu0 }
 0x563   : > { %v12687_v53 = vpop.f32.mrb[120].mxu0 }
 0x564   : > { %v12689_v47 = vpop.f32.mrb[121].mxu0 }
 0x565   : > { %v12691_v40 = vpop.f32.mrb[122].mxu0 }
 0x566   : > { %v12693_v56 = vpop.f32.mrb[123].mxu0 }
 0x56b   : > { %v12695_v6 = vpop.f32.mrb[124].mxu0 }
 0x56c   : > { %v12697_v61 = vpop.f32.mrb[125].mxu0 }
 0x56d   : > { %v12699_v34 = vpop.f32.mrb[126].mxu0 }
 0x56e   : > { %v12701_v2 = vpop.f32.mrb[127].mxu0 }
 0x573   : > { %v12703_v48 = vpop.f32.mrb[128].mxu0 }
 0x574   : > { %v12705_v9 = vpop.f32.mrb[129].mxu0 }
 0x575   : > { %v12707_v29 = vpop.f32.mrb[130].mxu0 }
 0x576   : > { %v12709_v57 = vpop.f32.mrb[131].mxu0 }
 0x57b   : > { %v12717_v21 = vpop.f32.mrb[132].mxu0  ;;  %v3661_v41 = vpop.f32.mrb[0].mxu1 }
 0x57c   : > { %v9975_v17 = vadd.f32 %v3661_v41, %v3211_v23  ;;  %v12722_v49 = vpop.f32.mrb[133].mxu0  ;;  %v3663_v26 = vpop.f32.mrb[1].mxu1 }
 0x57d   : > { %v9976_v36 = vadd.f32 %v3663_v26, %v3213_v60  ;;  %v12724_v42 = vpop.f32.mrb[134].mxu0  ;;  %v3665_v3 = vpop.f32.mrb[2].mxu1 }
 0x57e   : > { %v3812_v11 = vadd.f32 %v9975_v17, %v12715_v35  ;;  %v9977_v50 = vadd.f32 %v3665_v3, %v3215_v1  ;;  %v12727_v18 = vpop.f32.mrb[135].mxu0  ;;  %v3667_v43 = vpop.f32.mrb[3].mxu1 }
 0x57f   : > { %v3813_v32 = vadd.f32 %v9976_v36, %v12720_v8  ;;  %v9978_v51 = vadd.f32 %v3667_v43, %v3217_v24 }
 0x580   : > { %v3814_v27 = vadd.f32 %v9977_v50, %v12715_v35  ;;  %v3852_v44 = vmax.f32 %v3812_v11, 0.0 }
 0x581   : > { %v3815_v62 = vadd.f32 %v9978_v51, %v12720_v8  ;;  %v3853_v52 = vmax.f32 %v3813_v32, 0.0 }
 0x582   : > { %v3854_v63 = vmax.f32 %v3814_v27, 0.0 }
 0x583   : > { %v3855_v12 = vmax.f32 %v3815_v62, 0.0  ;;  %v3671_v28 = vpop.f32.mrb[4].mxu1 }
 0x584   : > { %v12732_v37 = vpack.c.bf16 %v3854_v63, %v3852_v44  ;;  %v9979_v20 = vadd.f32 %v3671_v28, %v3221_v13  ;;  %v3673_v23 = vpop.f32.mrb[5].mxu1 }
 0x585   : > { %v12734_v60 = vpack.c.bf16 %v3855_v12, %v3853_v52  ;;  %v9980_v1 = vadd.f32 %v3673_v23, %v3223_v38  ;;  %v3675_v30 = vpop.f32.mrb[6].mxu1 }
 0x586   : > { %v3816_v41 = vadd.f32 %v9979_v20, %v12715_v35  ;;  %v9981_v24 = vadd.f32 %v3675_v30, %v3225_v45  ;;  %v3677_v17 = vpop.f32.mrb[7].mxu1  ;;  %v10763_v20 = vld [vmem:[%s14412_s5 + $0x24] ss:$16 sps:$4 sm:$0xff]  }
 0x587   : > { %v3817_v26 = vadd.f32 %v9980_v1, %v12720_v8  ;;  %v9982_v36 = vadd.f32 %v3677_v17, %v12653_v4  ;;  %v10758_v4 = vld [vmem:[%s14412_s5] ss:$16 sps:$4 sm:$0xff]  }
 0x588   : > { %v3818_v3 = vadd.f32 %v9981_v24, %v12715_v35  ;;  %v3856_v50 = vmax.f32 %v3816_v41, 0.0  ;;  %v10766_v41 = vld [vmem:[%s14412_s5 + $0x44] ss:$16 sps:$4 sm:$0xff]  }
 0x589   : > { %v3819_v11 = vadd.f32 %v9982_v36, %v12720_v8  ;;  %v3857_v13 = vmax.f32 %v3817_v26, 0.0 }
 0x58a   : > { %v3858_v43 = vmax.f32 %v3818_v3, 0.0 }
 0x58b   : > { %v3859_v32 = vmax.f32 %v3819_v11, 0.0  ;;  %v3681_v51 = vpop.f32.mrb[8].mxu1 }
 0x58c   : > { %v3894_v27 = vpack.c.bf16 %v3858_v43, %v3856_v50  ;;  %v9983_v38 = vadd.f32 %v3681_v51, %v12655_v58  ;;  %v3683_v62 = vpop.f32.mrb[9].mxu1 }
 0x58d   : > { %v3895_v45 = vpack.c.bf16 %v3859_v32, %v3857_v13  ;;  %v9984_v44 = vadd.f32 %v3683_v62, %v12657_v0  ;;  %v3685_v63 = vpop.f32.mrb[10].mxu1  ;;  %v10764_v32 = vld [vmem:[%s14412_s5 + $0x40] ss:$16 sps:$4 sm:$0xff]  }
 0x58e   : > { %v3820_v52 = vadd.f32 %v9983_v38, %v12715_v35  ;;  %v9985_v12 = vadd.f32 %v3685_v63, %v12659_v31  ;;  %v3687_v28 = vpop.f32.mrb[11].mxu1  ;;  %v10761_v31 = vld [vmem:[%s14412_s5 + $0x20] ss:$16 sps:$4 sm:$0xff]  }
 0x58f   : > { %v3821_v58 = vadd.f32 %v9984_v44, %v12720_v8  ;;  %v9986_v23 = vadd.f32 %v3687_v28, %v12661_v7  ;;  %8988 = vmatprep.mubr.msk.bf16.mxu0 %vm4263_vm4, %v3895_v45  ;;  %8990 = vmatprep.mubr.msk.bf16.mxu1 %vm4263_vm4, %v3895_v45  ;;  %v10767_v63 = vld [vmem:[%s14412_s5 + $0x60] ss:$16 sps:$4 sm:$0xff]  }
 0x590   : > { %v3822_v0 = vadd.f32 %v9985_v12, %v12715_v35  ;;  %4312 = vmatmul.mubr.bf16.vlgmr.msra.gmra.mrb[136].mxu0 %v3894_v27  ;;  %4355 = vmatmul.mubr.bf16.vlgmr.msra.gmra.mrb[40].mxu1 %v3894_v27  ;;  %v3860_v30 = vmax.f32 %v3820_v52, 0.0  ;;  %v10772_v52 = vld [vmem:[%s14412_s5 + $0x84] ss:$16 sps:$4 sm:$0xff]  }
 0x591   : > { %v3823_v1 = vadd.f32 %v9986_v23, %v12720_v8  ;;  %4631 = vmatpush1.bf16.msra.mxu1 %v10758_v4  ;;  %9044 = vmatprep.mubr.msk.bf16.mxu1 %vm4263_vm4, %v12734_v60  ;;  %v3861_v24 = vmax.f32 %v3821_v58, 0.0 }
 0x592   : > { %v3862_v7 = vmax.f32 %v3822_v0, 0.0  ;;  %4632 = vmatprep.subr.bf16.mxu1 %v10763_v20 }
 0x593   : > { %v3863_v17 = vmax.f32 %v3823_v1, 0.0  ;;  %v3691_v26 = vpop.f32.mrb[12].mxu1 }
 0x594   : > { %v12765_v36 = vpack.c.bf16 %v3862_v7, %v3860_v30  ;;  %v9987_v3 = vadd.f32 %v3691_v26, %v12663_v14  ;;  %v3693_v11 = vpop.f32.mrb[13].mxu1  ;;  %v10769_v14 = vld [vmem:[%s14412_s5 + $0x64] ss:$16 sps:$4 sm:$0xff]   ;;  %v10770_v30 = vld [vmem:[%s14412_s5 + $0x80] ss:$16 sps:$4 sm:$0xff]  }
 0x595   : > { %v12768_v50 = vpack.c.bf16 %v3863_v17, %v3861_v24  ;;  %v9988_v43 = vadd.f32 %v3693_v11, %v12665_v22  ;;  %4633 = vmatpush1.bf16.msra.mxu1 %v10761_v31  ;;  %v3695_v13 = vpop.f32.mrb[14].mxu1  ;;  %v10773_v11 = vld [vmem:[%s14412_s5 + $0xa0] ss:$16 sps:$4 sm:$0xff]  }
 0x596   : > { %v3824_v51 = vadd.f32 %v9987_v3, %v12715_v35  ;;  %v9989_v27 = vadd.f32 %v3695_v13, %v12667_v54  ;;  %v3697_v38 = vpop.f32.mrb[15].mxu1  ;;  %4634 = vmatprep.subr.bf16.mxu1 %v10766_v41  ;;  %v10778_v13 = vld [vmem:[%s14412_s5 + $0xc4] ss:$16 sps:$4 sm:$0xff]  }
 0x597   : > { %v3825_v62 = vadd.f32 %v9988_v43, %v12720_v8  ;;  %v9990_v22 = vadd.f32 %v3697_v38, %v12669_v15 }
 0x598   : > { %v3826_v45 = vadd.f32 %v9989_v27, %v12715_v35  ;;  %v3864_v54 = vmax.f32 %v3824_v51, 0.0 }
 0x599   : > { %v3827_v44 = vadd.f32 %v9990_v22, %v12720_v8  ;;  %4635 = vmatpush1.bf16.msra.mxu1 %v10764_v32  ;;  %v3865_v12 = vmax.f32 %v3825_v62, 0.0 }
 0x59a   : > { %v3866_v4 = vmax.f32 %v3826_v45, 0.0  ;;  %4636 = vmatprep.subr.bf16.mxu1 %v10769_v14 }
 0x59b   : > { %v3867_v28 = vmax.f32 %v3827_v44, 0.0  ;;  %v3701_v20 = vpop.f32.mrb[16].mxu1  ;;  %v10776_v44 = vld [vmem:[%s14412_s5 + $0xc0] ss:$16 sps:$4 sm:$0xff]  }
 0x59c   : > { %v12789_v15 = vpack.c.bf16 %v3866_v4, %v3864_v54  ;;  %v9991_v58 = vadd.f32 %v3701_v20, %v12671_v33  ;;  %v3703_v23 = vpop.f32.mrb[17].mxu1  ;;  %v10775_v33 = vld [vmem:[%s14412_s5 + $0xa4] ss:$16 sps:$4 sm:$0xff]   ;;  %v10779_v20 = vld [vmem:[%s14412_s5 + $0xe0] ss:$16 sps:$4 sm:$0xff]  }
 0x59d   : > { %v12792_v0 = vpack.c.bf16 %v3867_v28, %v3865_v12  ;;  %v9992_v1 = vadd.f32 %v3703_v23, %v12673_v16  ;;  %4637 = vmatpush1.bf16.msra.mxu1 %v10767_v63  ;;  %v3705_v31 = vpop.f32.mrb[18].mxu1  ;;  %v10784_v23 = vld [vmem:[%s14412_s5 + $0x104] ss:$16 sps:$4 sm:$0xff]  }
 0x59e   : > { %v3828_v7 = vadd.f32 %v9991_v58, %v12715_v35  ;;  %v9993_v41 = vadd.f32 %v3705_v31, %v12675_v39  ;;  %v3707_v24 = vpop.f32.mrb[19].mxu1  ;;  %4638 = vmatprep.subr.bf16.mxu1 %v10772_v52 }
 0x59f   : > { %v3829_v17 = vadd.f32 %v9992_v1, %v12720_v8  ;;  %v9994_v16 = vadd.f32 %v3707_v24, %v12677_v10 }
 0x5a0   : > { %v3830_v26 = vadd.f32 %v9993_v41, %v12715_v35  ;;  %v3868_v39 = vmax.f32 %v3828_v7, 0.0 }
 0x5a1   : > { %v3831_v3 = vadd.f32 %v9994_v16, %v12720_v8  ;;  %4639 = vmatpush1.bf16.msra.mxu1 %v10770_v30  ;;  %v3869_v32 = vmax.f32 %v3829_v17, 0.0  ;;  %v10782_v16 = vld [vmem:[%s14412_s5 + $0x100] ss:$16 sps:$4 sm:$0xff]  }
 0x5a2   : > { %v3870_v43 = vmax.f32 %v3830_v26, 0.0  ;;  %4640 = vmatprep.subr.bf16.mxu1 %v10775_v33 }
 0x5a3   : > { %v3871_v51 = vmax.f32 %v3831_v3, 0.0  ;;  %v3711_v27 = vpop.f32.mrb[20].mxu1 }
 0x5a4   : > { %v12813_v10 = vpack.c.bf16 %v3870_v43, %v3868_v39  ;;  %v9995_v38 = vadd.f32 %v3711_v27, %v12679_v19  ;;  %v3713_v14 = vpop.f32.mrb[21].mxu1  ;;  %v10781_v19 = vld [vmem:[%s14412_s5 + $0xe4] ss:$16 sps:$4 sm:$0xff]  }
 0x5a5   : > { %v12816_v62 = vpack.c.bf16 %v3871_v51, %v3869_v32  ;;  %v9996_v22 = vadd.f32 %v3713_v14, %v12681_v46  ;;  %4641 = vmatpush1.bf16.msra.mxu1 %v10773_v11  ;;  %v3715_v45 = vpop.f32.mrb[22].mxu1  ;;  %v10785_v32 = vld [vmem:[%s14412_s5 + $0x120] ss:$16 sps:$4 sm:$0xff]   ;;  %v10790_v27 = vld [vmem:[%s14412_s5 + $0x144] ss:$16 sps:$4 sm:$0xff]  }
 0x5a6   : > { %v3832_v63 = vadd.f32 %v9995_v38, %v12715_v35  ;;  %v9997_v54 = vadd.f32 %v3715_v45, %v12683_v55  ;;  %v3717_v4 = vpop.f32.mrb[23].mxu1  ;;  %4642 = vmatprep.subr.bf16.mxu1 %v10778_v13 }
 0x5a7   : > { %v3833_v52 = vadd.f32 %v9996_v22, %v12720_v8  ;;  %v9998_v46 = vadd.f32 %v3717_v4, %v12685_v5 }
 0x5a8   : > { %v3834_v12 = vadd.f32 %v9997_v54, %v12715_v35  ;;  %v3872_v55 = vmax.f32 %v3832_v63, 0.0 }
 0x5a9   : > { %v3835_v28 = vadd.f32 %v9998_v46, %v12720_v8  ;;  %4643 = vmatpush1.bf16.msra.mxu1 %v10776_v44  ;;  %v3873_v1 = vmax.f32 %v3833_v52, 0.0 }
 0x5aa   : > { %v3874_v58 = vmax.f32 %v3834_v12, 0.0  ;;  %4644 = vmatprep.subr.bf16.mxu1 %v10781_v19  ;;  %v10788_v19 = vld [vmem:[%s14412_s5 + $0x140] ss:$16 sps:$4 sm:$0xff]  }
 0x5ab   : > { %v3875_v31 = vmax.f32 %v3835_v28, 0.0  ;;  %v3721_v30 = vpop.f32.mrb[24].mxu1 }
 0x5ac   : > { %v12837_v5 = vpack.c.bf16 %v3874_v58, %v3872_v55  ;;  %v9999_v7 = vadd.f32 %v3721_v30, %v12687_v53  ;;  %v3723_v41 = vpop.f32.mrb[25].mxu1  ;;  %v10787_v53 = vld [vmem:[%s14412_s5 + $0x124] ss:$16 sps:$4 sm:$0xff]  }
 0x5ad   : > { %v12840_v24 = vpack.c.bf16 %v3875_v31, %v3873_v1  ;;  %v10000_v33 = vadd.f32 %v3723_v41, %v12689_v47  ;;  %4645 = vmatpush1.bf16.msra.mxu1 %v10779_v20  ;;  %v3725_v17 = vpop.f32.mrb[26].mxu1  ;;  %v3960_v20 = vld [vmem:[%s14412_s5 + $0x180] sm:$0xff] }
 0x5ae   : > { %v3836_v26 = vadd.f32 %v9999_v7, %v12715_v35  ;;  %v10001_v3 = vadd.f32 %v3725_v17, %v12691_v40  ;;  %v3727_v11 = vpop.f32.mrb[27].mxu1  ;;  %4646 = vmatprep.subr.bf16.mxu1 %v10784_v23  ;;  %v9040_v31 = vcombine.high %v3960_v20, %v3960_v20  ;;  %v9039_v30 = vcombine.low %v3960_v20, %v3960_v20 }
 0x5af   : > { %v3837_v39 = vadd.f32 %v10000_v33, %v12720_v8  ;;  %v10002_v47 = vadd.f32 %v3727_v11, %v12693_v56 }
 0x5b0   : > { %v3838_v43 = vadd.f32 %v10001_v3, %v12715_v35  ;;  %v3876_v40 = vmax.f32 %v3836_v26, 0.0 }
 0x5b1   : > { %v3839_v13 = vadd.f32 %v10002_v47, %v12720_v8  ;;  %4647 = vmatpush1.bf16.msra.mxu1 %v10782_v16  ;;  %v3877_v38 = vmax.f32 %v3837_v39, 0.0 }
 0x5b2   : > { %v3878_v51 = vmax.f32 %v3838_v43, 0.0  ;;  %4648 = vmatprep.subr.bf16.mxu1 %v10787_v53  ;;  %v4619_v43 = vsel %vm3170_vm2, %v9039_v30, 0  ;;  %v10808_v30 = vld [vmem:[%s14412_s5 + $0x88] ss:$16 sps:$4 sm:$0xff]  }
 0x5b3   : > { %v3879_v14 = vmax.f32 %v3839_v13, 0.0  ;;  %v3731_v22 = vpop.f32.mrb[28].mxu1 }
 0x5b4   : > { %v12861_v56 = vpack.c.bf16 %v3878_v51, %v3876_v40  ;;  %v10003_v45 = vadd.f32 %v3731_v22, %v12695_v6  ;;  %v3733_v44 = vpop.f32.mrb[29].mxu1  ;;  %v10793_v6 = vld [vmem:[%s14412_s5 + $0x164] ss:$16 sps:$4 sm:$0xff]  }
 0x5b5   : > { %v12864_v63 = vpack.c.bf16 %v3879_v14, %v3877_v38  ;;  %v10004_v54 = vadd.f32 %v3733_v44, %v12697_v61  ;;  %4649 = vmatpush1.bf16.msra.mxu1 %v10785_v32  ;;  %v3735_v4 = vpop.f32.mrb[30].mxu1  ;;  %v10801_v38 = vld [vmem:[%s14412_s5 + $0x2c] ss:$16 sps:$4 sm:$0xff]  }
 0x5b6   : > { %v3840_v52 = vadd.f32 %v10003_v45, %v12715_v35  ;;  %v10005_v46 = vadd.f32 %v3735_v4, %v12699_v34  ;;  %v3737_v12 = vpop.f32.mrb[31].mxu1  ;;  %4650 = vmatprep.subr.bf16.mxu1 %v10790_v27  ;;  %v10791_v34 = vld [vmem:[%s14412_s5 + $0x160] ss:$16 sps:$4 sm:$0xff]  }
 0x5b7   : > { %v3841_v28 = vadd.f32 %v10004_v54, %v12720_v8  ;;  %v10006_v61 = vadd.f32 %v3737_v12, %v12701_v2 }
 0x5b8   : > { %v3842_v55 = vadd.f32 %v10005_v46, %v12715_v35  ;;  %v3880_v23 = vmax.f32 %v3840_v52, 0.0  ;;  %v10799_v46 = vld [vmem:[%s14412_s5 + $0x28] ss:$16 sps:$4 sm:$0xff]  }
 0x5b9   : > { %v3843_v58 = vadd.f32 %v10006_v61, %v12720_v8  ;;  %4651 = vmatpush1.bf16.msra.mxu1 %v10788_v19  ;;  %v3881_v7 = vmax.f32 %v3841_v28, 0.0  ;;  %v10804_v28 = vld [vmem:[%s14412_s5 + $0x4c] ss:$16 sps:$4 sm:$0xff]  }
 0x5ba   : > { %v3882_v1 = vmax.f32 %v3842_v55, 0.0  ;;  %4652 = vmatprep.subr.bf16.mxu1 %v10793_v6  ;;  %v10802_v55 = vld [vmem:[%s14412_s5 + $0x48] ss:$16 sps:$4 sm:$0xff]  }
 0x5bb   : > { %v3883_v2 = vmax.f32 %v3843_v58, 0.0  ;;  %v3741_v41 = vpop.f32.mrb[32].mxu1 }
 0x5bc   : > { %v12885_v33 = vpack.c.bf16 %v3882_v1, %v3880_v23  ;;  %v10007_v17 = vadd.f32 %v3741_v41, %v12703_v48  ;;  %v3743_v16 = vpop.f32.mrb[33].mxu1  ;;  %v10798_v48 = vld [vmem:[%s14412_s5 + $0xc] ss:$16 sps:$4 sm:$0xff]  }
 0x5bd   : > { %v12888_v26 = vpack.c.bf16 %v3883_v2, %v3881_v7  ;;  %v10008_v3 = vadd.f32 %v3743_v16, %v12705_v9  ;;  %4653 = vmatpush1.bf16.msra.mxu1 %v10791_v34  ;;  %v3745_v11 = vpop.f32.mrb[34].mxu1  ;;  %v10807_v34 = vld [vmem:[%s14412_s5 + $0x6c] ss:$16 sps:$4 sm:$0xff]   ;;  %v10811_v2 = vld [vmem:[%s14412_s5 + $0xa8] ss:$16 sps:$4 sm:$0xff]  }
 0x5be   : > { %v3844_v53 = vadd.f32 %v10007_v17, %v12715_v35  ;;  %v10009_v39 = vadd.f32 %v3745_v11, %v12707_v29  ;;  %v3747_v47 = vpop.f32.mrb[35].mxu1  ;;  %9043 = vmatprep.subr.msk.bf16.mxu1 %vm3170_vm2, %v9040_v31  ;;  %v10796_v29 = vld [vmem:[%s14412_s5 + $0x8] ss:$16 sps:$4 sm:$0xff]   ;;  %v10813_v7 = vld [vmem:[%s14412_s5 + $0xac] ss:$16 sps:$4 sm:$0xff]  }
 0x5bf   : > { %v3845_v13 = vadd.f32 %v10008_v3, %v12720_v8  ;;  %v10010_v32 = vadd.f32 %v3747_v47, %v12709_v57  ;;  %v10816_v41 = vld [vmem:[%s14412_s5 + $0xcc] ss:$16 sps:$4 sm:$0xff]   ;;  %v10814_v17 = vld [vmem:[%s14412_s5 + $0xc8] ss:$16 sps:$4 sm:$0xff]  }
 0x5c0   : > { %v3846_v9 = vadd.f32 %v10009_v39, %v12715_v35  ;;  %v3884_v51 = vmax.f32 %v3844_v53, 0.0  ;;  %v10819_v16 = vld [vmem:[%s14412_s5 + $0xec] ss:$16 sps:$4 sm:$0xff]   ;;  %v10817_v3 = vld [vmem:[%s14412_s5 + $0xe8] ss:$16 sps:$4 sm:$0xff]  }
 0x5c1   : > { %v3847_v40 = vadd.f32 %v10010_v32, %v12720_v8  ;;  %4655 = vmatpush1.bf16.msra.mxu1 %v4619_v43  ;;  %v3885_v14 = vmax.f32 %v3845_v13, 0.0  ;;  %v10822_v11 = vld [vmem:[%s14412_s5 + $0x10c] ss:$16 sps:$4 sm:$0xff]   ;;  %v10820_v53 = vld [vmem:[%s14412_s5 + $0x108] ss:$16 sps:$4 sm:$0xff]  }
 0x5c2   : > { %v3886_v27 = vmax.f32 %v3846_v9, 0.0  ;;  %4673 = vmatprep.subr.bf16.mxu1 %v10798_v48  ;;  %v10825_v39 = vld [vmem:[%s14412_s5 + $0x12c] ss:$16 sps:$4 sm:$0xff]   ;;  %v10823_v47 = vld [vmem:[%s14412_s5 + $0x128] ss:$16 sps:$4 sm:$0xff]  }
 0x5c3   : > { %v3887_v22 = vmax.f32 %v3847_v40, 0.0  ;;  %v3751_v45 = vpop.f32.mrb[36].mxu1  ;;  %v10828_v43 = vld [vmem:[%s14412_s5 + $0x14c] ss:$16 sps:$4 sm:$0xff]   ;;  %v10826_v48 = vld [vmem:[%s14412_s5 + $0x148] ss:$16 sps:$4 sm:$0xff]  }
 0x5c4   : > { %v12908_v57 = vpack.c.bf16 %v3886_v27, %v3884_v51  ;;  %v10011_v44 = vadd.f32 %v3751_v45, %v12717_v21  ;;  %4663 = vmatmul.mubr.bf16.vlgmr.msra.gmra.mrb[44].mxu1 %v12732_v37  ;;  %v3753_v54 = vpop.f32.mrb[37].mxu1  ;;  %v10831_v13 = vld [vmem:[%s14412_s5 + $0x16c] ss:$16 sps:$4 sm:$0xff]   ;;  %v10829_v9 = vld [vmem:[%s14412_s5 + $0x168] ss:$16 sps:$4 sm:$0xff]  }
 0x5c5   : > { %v12912_v4 = vpack.c.bf16 %v3887_v22, %v3885_v14  ;;  %v10012_v19 = vadd.f32 %v3753_v54, %v12722_v49  ;;  %4674 = vmatpush1.bf16.msra.mxu1 %v10796_v29  ;;  %9046 = vmatprep.mubr.msk.bf16.mxu1 %vm4263_vm4, %v12734_v60  ;;  %v3755_v52 = vpop.f32.mrb[38].mxu1  ;;  %v3961_v32 = vld [vmem:[%s14412_s5 + $0x188] sm:$0xff]  ;;  %v10836_v27 = vld [vmem:[%s14412_s5 + $0x324] ss:$16 sps:$4 sm:$0xff]   ;;  %v10837_v22 = vld [vmem:[%s14412_s5 + $0x340] ss:$16 sps:$4 sm:$0xff]  }
 0x5c6   : > { %v3848_v12 = vadd.f32 %v10011_v44, %v12715_v35  ;;  %v10013_v21 = vadd.f32 %v3755_v52, %v12724_v42  ;;  %v3757_v6 = vpop.f32.mrb[39].mxu1  ;;  %4675 = vmatprep.subr.bf16.mxu1 %v10801_v38  ;;  %v9042_v40 = vcombine.high %v3961_v32, %v3961_v32  ;;  %v9041_v29 = vcombine.low %v3961_v32, %v3961_v32  ;;  %v10834_v38 = vld [vmem:[%s14412_s5 + $0x320] ss:$16 sps:$4 sm:$0xff]   ;;  %v10839_v14 = vld [vmem:[%s14412_s5 + $0x344] ss:$16 sps:$4 sm:$0xff]  }
 0x5c7   : > { %v3849_v49 = vadd.f32 %v10012_v19, %v12720_v8  ;;  %v10014_v61 = vadd.f32 %v3757_v6, %v12727_v18  ;;  %v10842_v45 = vld [vmem:[%s14412_s5 + $0x364] ss:$16 sps:$4 sm:$0xff]   ;;  %v10840_v44 = vld [vmem:[%s14412_s5 + $0x360] ss:$16 sps:$4 sm:$0xff]   ;;  %v10895_v32 = vld [vmem:[%s14412_s5 + $0x40c] ss:$16 sps:$4 sm:$0xff]  }
 0x5c8   : > { %v3850_v60 = vadd.f32 %v10013_v21, %v12715_v35  ;;  %v3888_v42 = vmax.f32 %v3848_v12, 0.0  ;;  %v10805_v35 = vld [vmem:[%s14412_s5 + $0x68] ss:$16 sps:$4 sm:$0xff]   ;;  %v4625_v51 = vsel %vm3170_vm2, %v9041_v29, 0  ;;  %v10843_v54 = vld [vmem:[%s14412_s5 + $0x380] ss:$16 sps:$4 sm:$0xff]  }
 0x5c9   : > { %v3851_v20 = vadd.f32 %v10014_v61, %v12720_v8  ;;  %4676 = vmatpush1.bf16.msra.mxu1 %v10799_v46  ;;  %v3889_v23 = vmax.f32 %v3849_v49, 0.0  ;;  %v10810_v8 = vld [vmem:[%s14412_s5 + $0x8c] ss:$16 sps:$4 sm:$0xff]   ;;  %v10848_v19 = vld [vmem:[%s14412_s5 + $0x3a4] ss:$16 sps:$4 sm:$0xff]  }
 0x5ca   : > { %v3890_v58 = vmax.f32 %v3850_v60, 0.0  ;;  %4677 = vmatprep.subr.bf16.mxu1 %v10804_v28  ;;  %v10846_v52 = vld [vmem:[%s14412_s5 + $0x3a0] ss:$16 sps:$4 sm:$0xff]   ;;  %v10851_v46 = vld [vmem:[%s14412_s5 + $0x3c4] ss:$16 sps:$4 sm:$0xff]  }
 0x5cb   : > { %v3891_v1 = vmax.f32 %v3851_v20, 0.0  ;;  %v10849_v12 = vld [vmem:[%s14412_s5 + $0x3c0] ss:$16 sps:$4 sm:$0xff]   ;;  %v10854_v21 = vld [vmem:[%s14412_s5 + $0x3e4] ss:$16 sps:$4 sm:$0xff]  }
 0x5cc   : > { %v12935_v31 = vpack.c.bf16 %v3890_v58, %v3888_v42  ;;  %v10852_v6 = vld [vmem:[%s14412_s5 + $0x3e0] ss:$16 sps:$4 sm:$0xff]   ;;  %v10857_v28 = vld [vmem:[%s14412_s5 + $0x404] ss:$16 sps:$4 sm:$0xff]   ;;  %v10896_v29 = vld [vmem:[%s14412_s5 + $0x428] ss:$16 sps:$4 sm:$0xff]  }
 0x5cd   : > { %v12937_v18 = vpack.c.bf16 %v3891_v1, %v3889_v23  ;;  %4678 = vmatpush1.bf16.msra.mxu1 %v10802_v55  ;;  %v10855_v49 = vld [vmem:[%s14412_s5 + $0x400] ss:$16 sps:$4 sm:$0xff]   ;;  %v10860_v61 = vld [vmem:[%s14412_s5 + $0x424] ss:$16 sps:$4 sm:$0xff]  }
 0x5ce   : > { %4679 = vmatprep.subr.bf16.mxu1 %v10807_v34  ;;  %v10858_v60 = vld [vmem:[%s14412_s5 + $0x420] ss:$16 sps:$4 sm:$0xff]   ;;  %v10863_v20 = vld [vmem:[%s14412_s5 + $0x444] ss:$16 sps:$4 sm:$0xff]  }
 0x5cf   : > { %v10861_v55 = vld [vmem:[%s14412_s5 + $0x440] ss:$16 sps:$4 sm:$0xff]   ;;  %v10866_v42 = vld [vmem:[%s14412_s5 + $0x464] ss:$16 sps:$4 sm:$0xff]  }
 0x5d0   : > { %v10864_v58 = vld [vmem:[%s14412_s5 + $0x460] ss:$16 sps:$4 sm:$0xff]   ;;  %v10869_v34 = vld [vmem:[%s14412_s5 + $0x484] ss:$16 sps:$4 sm:$0xff]  }
 0x5d1   : > { %4680 = vmatpush1.bf16.msra.mxu1 %v10805_v35  ;;  %v9095_v23 = vld [vmem:[%s14412_s5 + $0x4a0] sm:$0xff] }
 0x5d2   : > { %4681 = vmatprep.subr.bf16.mxu1 %v10810_v8  ;;  %v10867_v1 = vld [vmem:[%s14412_s5 + $0x480] ss:$16 sps:$4 sm:$0xff]   ;;  %v9146_v35 = vcombine.high %v9095_v23, %v9095_v23  ;;  %v9145_v8 = vcombine.low %v9095_v23, %v9095_v23 }
 0x5d3   : > { %v10925_v23 = vld [vmem:[%s14412_s5 + $0x550] ss:$16 sps:$4 sm:$0xff]  }
 0x5d5   : > { %4682 = vmatpush1.bf16.msra.mxu1 %v10808_v30  ;;  %v5021_v30 = vsel %vm3170_vm2, %v9145_v8, 0  ;;  %v10933_v8 = vld [vmem:[%s14412_s5 + $0x594] ss:$16 sps:$4 sm:$0xff]  }
 0x5d6   : > { %4683 = vmatprep.subr.bf16.mxu1 %v10813_v7  ;;  %v10874_v7 = vld [vmem:[%s14412_s5 + $0x32c] ss:$16 sps:$4 sm:$0xff]  }
 0x5d9   : > { %4684 = vmatpush1.bf16.msra.mxu1 %v10811_v2  ;;  %v10872_v2 = vld [vmem:[%s14412_s5 + $0x328] ss:$16 sps:$4 sm:$0xff]  }
 0x5da   : > { %4685 = vmatprep.subr.bf16.mxu1 %v10816_v41  ;;  %v10877_v41 = vld [vmem:[%s14412_s5 + $0x34c] ss:$16 sps:$4 sm:$0xff]  }
 0x5dd   : > { %4686 = vmatpush1.bf16.msra.mxu1 %v10814_v17  ;;  %v10875_v17 = vld [vmem:[%s14412_s5 + $0x348] ss:$16 sps:$4 sm:$0xff]  }
 0x5de   : > { %4687 = vmatprep.subr.bf16.mxu1 %v10819_v16  ;;  %v10880_v16 = vld [vmem:[%s14412_s5 + $0x36c] ss:$16 sps:$4 sm:$0xff]  }
 0x5e1   : > { %4688 = vmatpush1.bf16.msra.mxu1 %v10817_v3  ;;  %v10878_v3 = vld [vmem:[%s14412_s5 + $0x368] ss:$16 sps:$4 sm:$0xff]  }
 0x5e2   : > { %4689 = vmatprep.subr.bf16.mxu1 %v10822_v11  ;;  %v10883_v11 = vld [vmem:[%s14412_s5 + $0x38c] ss:$16 sps:$4 sm:$0xff]  }
 0x5e5   : > { %4690 = vmatpush1.bf16.msra.mxu1 %v10820_v53  ;;  %v10886_v53 = vld [vmem:[%s14412_s5 + $0x3ac] ss:$16 sps:$4 sm:$0xff]  }
 0x5e6   : > { %4691 = vmatprep.subr.bf16.mxu1 %v10825_v39  ;;  %v10884_v39 = vld [vmem:[%s14412_s5 + $0x3a8] ss:$16 sps:$4 sm:$0xff]  }
 0x5e9   : > { %4692 = vmatpush1.bf16.msra.mxu1 %v10823_v47  ;;  %v10889_v47 = vld [vmem:[%s14412_s5 + $0x3cc] ss:$16 sps:$4 sm:$0xff]  }
 0x5ea   : > { %4693 = vmatprep.subr.bf16.mxu1 %v10828_v43  ;;  %v10887_v43 = vld [vmem:[%s14412_s5 + $0x3c8] ss:$16 sps:$4 sm:$0xff]  }
 0x5ed   : > { %4694 = vmatpush1.bf16.msra.mxu1 %v10826_v48  ;;  %v10892_v48 = vld [vmem:[%s14412_s5 + $0x3ec] ss:$16 sps:$4 sm:$0xff]  }
 0x5ee   : > { %4695 = vmatprep.subr.bf16.mxu1 %v10831_v13  ;;  %v10890_v13 = vld [vmem:[%s14412_s5 + $0x3e8] ss:$16 sps:$4 sm:$0xff]  }
 0x5f1   : > { %4696 = vmatpush1.bf16.msra.mxu1 %v10829_v9  ;;  %v10893_v9 = vld [vmem:[%s14412_s5 + $0x408] ss:$16 sps:$4 sm:$0xff]  }
 0x5f2   : > { %9045 = vmatprep.subr.msk.bf16.mxu1 %vm3170_vm2, %v9042_v40  ;;  %v10898_v40 = vld [vmem:[%s14412_s5 + $0x42c] ss:$16 sps:$4 sm:$0xff]  }
 0x5f5   : > { %4698 = vmatpush1.bf16.msra.mxu1 %v4625_v51  ;;  %v10901_v51 = vld [vmem:[%s14412_s5 + $0x44c] ss:$16 sps:$4 sm:$0xff]  }
 0x5f6   : > { %5032 = vmatprep.subr.bf16.mxu1 %v10836_v27  ;;  %v10899_v27 = vld [vmem:[%s14412_s5 + $0x448] ss:$16 sps:$4 sm:$0xff]  }
 0x5f8   : > { %4706 = vmatmul.mubr.bf16.vlgmr.msra.gmra.mrb[40].mxu1 %v12732_v37  ;;  %v10845_v37 = vld [vmem:[%s14412_s5 + $0x384] ss:$16 sps:$4 sm:$0xff]  }
 0x5f9   : > { %5033 = vmatpush1.bf16.msra.mxu1 %v10834_v38  ;;  %9150 = vmatprep.mubr.msk.bf16.mxu1 %vm4263_vm4, %v12768_v50  ;;  %v10904_v38 = vld [vmem:[%s14412_s5 + $0x46c] ss:$16 sps:$4 sm:$0xff]  }
 0x5fa   : > { %5034 = vmatprep.subr.bf16.mxu1 %v10839_v14  ;;  %v10902_v14 = vld [vmem:[%s14412_s5 + $0x468] ss:$16 sps:$4 sm:$0xff]  }
 0x5fd   : > { %5035 = vmatpush1.bf16.msra.mxu1 %v10837_v22  ;;  %v10907_v22 = vld [vmem:[%s14412_s5 + $0x48c] ss:$16 sps:$4 sm:$0xff]  }
 0x5fe   : > { %5036 = vmatprep.subr.bf16.mxu1 %v10842_v45  ;;  %v9096_v45 = vld [vmem:[%s14412_s5 + $0x4a8] sm:$0xff] }
 0x601   : > { %5037 = vmatpush1.bf16.msra.mxu1 %v10840_v44  ;;  %v10905_v44 = vld [vmem:[%s14412_s5 + $0x488] ss:$16 sps:$4 sm:$0xff]  }
 0x602   : > { %5038 = vmatprep.subr.bf16.mxu1 %v10845_v37  ;;  %v9148_v37 = vcombine.high %v9096_v45, %v9096_v45 }
 0x605   : > { %5039 = vmatpush1.bf16.msra.mxu1 %v10843_v54  ;;  %v9147_v54 = vcombine.low %v9096_v45, %v9096_v45  ;;  %v10968_v45 = vld [vmem:[%s14412_s5 + $0x57c] ss:$16 sps:$4 sm:$0xff]  }
 0x606   : > { %5040 = vmatprep.subr.bf16.mxu1 %v10848_v19 }
 0x607   : > { %v5027_v19 = vsel %vm3170_vm2, %v9147_v54, 0  ;;  %v10969_v54 = vld [vmem:[%s14412_s5 + $0x598] ss:$16 sps:$4 sm:$0xff]  }
 0x609   : > { %5041 = vmatpush1.bf16.msra.mxu1 %v10846_v52  ;;  %v10912_v52 = vld [vmem:[%s14412_s5 + $0x4b4] ss:$16 sps:$4 sm:$0xff]  }
 0x60a   : > { %5042 = vmatprep.subr.bf16.mxu1 %v10851_v46  ;;  %v10910_v46 = vld [vmem:[%s14412_s5 + $0x4b0] ss:$16 sps:$4 sm:$0xff]  }
 0x60d   : > { %5043 = vmatpush1.bf16.msra.mxu1 %v10849_v12  ;;  %v10915_v12 = vld [vmem:[%s14412_s5 + $0x4d4] ss:$16 sps:$4 sm:$0xff]  }
 0x60e   : > { %5044 = vmatprep.subr.bf16.mxu1 %v10854_v21  ;;  %v10913_v21 = vld [vmem:[%s14412_s5 + $0x4d0] ss:$16 sps:$4 sm:$0xff]  }
 0x611   : > { %5045 = vmatpush1.bf16.msra.mxu1 %v10852_v6  ;;  %v10918_v6 = vld [vmem:[%s14412_s5 + $0x4f4] ss:$16 sps:$4 sm:$0xff]  }
 0x612   : > { %5046 = vmatprep.subr.bf16.mxu1 %v10857_v28 }
 0x615   : > { %5047 = vmatpush1.bf16.msra.mxu1 %v10855_v49 }
 0x616   : > { %5048 = vmatprep.subr.bf16.mxu1 %v10860_v61 }
 0x619   : > { %5049 = vmatpush1.bf16.msra.mxu1 %v10858_v60 }
 0x61a   : > { %5050 = vmatprep.subr.bf16.mxu1 %v10863_v20  ;;  %v10921_v20 = vld [vmem:[%s14412_s5 + $0x514] ss:$16 sps:$4 sm:$0xff]  }
 0x61d   : > { %5051 = vmatpush1.bf16.msra.mxu1 %v10861_v55  ;;  %v10919_v55 = vld [vmem:[%s14412_s5 + $0x510] ss:$16 sps:$4 sm:$0xff]  }
 0x61e   : > { %5052 = vmatprep.subr.bf16.mxu1 %v10866_v42  ;;  %v10924_v42 = vld [vmem:[%s14412_s5 + $0x534] ss:$16 sps:$4 sm:$0xff]  }
 0x621   : > { %5053 = vmatpush1.bf16.msra.mxu1 %v10864_v58  ;;  %v10922_v58 = vld [vmem:[%s14412_s5 + $0x530] ss:$16 sps:$4 sm:$0xff]  }
 0x622   : > { %5054 = vmatprep.subr.bf16.mxu1 %v10869_v34  ;;  %v10927_v34 = vld [vmem:[%s14412_s5 + $0x554] ss:$16 sps:$4 sm:$0xff]  }
 0x625   : > { %5055 = vmatpush1.bf16.msra.mxu1 %v10867_v1  ;;  %v10930_v1 = vld [vmem:[%s14412_s5 + $0x574] ss:$16 sps:$4 sm:$0xff]  }
 0x626   : > { %9149 = vmatprep.subr.msk.bf16.mxu1 %vm3170_vm2, %v9146_v35  ;;  %v10928_v35 = vld [vmem:[%s14412_s5 + $0x570] ss:$16 sps:$4 sm:$0xff]  }
 0x629   : > { %5057 = vmatpush1.bf16.msra.mxu1 %v5021_v30  ;;  %v10931_v30 = vld [vmem:[%s14412_s5 + $0x590] ss:$16 sps:$4 sm:$0xff]  }
 0x62a   : > { %5075 = vmatprep.subr.bf16.mxu1 %v10874_v7  ;;  %v10936_v7 = vld [vmem:[%s14412_s5 + $0x5b4] ss:$16 sps:$4 sm:$0xff]  }
 0x62c   : > { %5065 = vmatmul.mubr.bf16.vlgmr.msra.gmra.mrb[44].mxu1 %v12765_v36 }
 0x62d   : > { %5076 = vmatpush1.bf16.msra.mxu1 %v10872_v2  ;;  %9152 = vmatprep.mubr.msk.bf16.mxu1 %vm4263_vm4, %v12768_v50  ;;  %v10881_v50 = vld [vmem:[%s14412_s5 + $0x388] ss:$16 sps:$4 sm:$0xff]   ;;  %v10934_v2 = vld [vmem:[%s14412_s5 + $0x5b0] ss:$16 sps:$4 sm:$0xff]  }
 0x62e   : > { %5077 = vmatprep.subr.bf16.mxu1 %v10877_v41  ;;  %v10939_v41 = vld [vmem:[%s14412_s5 + $0x5d4] ss:$16 sps:$4 sm:$0xff]  }
 0x631   : > { %5078 = vmatpush1.bf16.msra.mxu1 %v10875_v17  ;;  %v10937_v17 = vld [vmem:[%s14412_s5 + $0x5d0] ss:$16 sps:$4 sm:$0xff]  }
 0x632   : > { %5079 = vmatprep.subr.bf16.mxu1 %v10880_v16  ;;  %v10942_v16 = vld [vmem:[%s14412_s5 + $0x5f4] ss:$16 sps:$4 sm:$0xff]  }
 0x635   : > { %5080 = vmatpush1.bf16.msra.mxu1 %v10878_v3  ;;  %v10940_v3 = vld [vmem:[%s14412_s5 + $0x5f0] ss:$16 sps:$4 sm:$0xff]  }
 0x636   : > { %5081 = vmatprep.subr.bf16.mxu1 %v10883_v11  ;;  %v10945_v11 = vld [vmem:[%s14412_s5 + $0x614] ss:$16 sps:$4 sm:$0xff]  }
 0x639   : > { %5082 = vmatpush1.bf16.msra.mxu1 %v10881_v50  ;;  %v9201_v50 = vld [vmem:[%s14412_s5 + $0x630] sm:$0xff] }
 0x63a   : > { %5083 = vmatprep.subr.bf16.mxu1 %v10886_v53  ;;  %v10943_v53 = vld [vmem:[%s14412_s5 + $0x610] ss:$16 sps:$4 sm:$0xff]  }
 0x63d   : > { %5084 = vmatpush1.bf16.msra.mxu1 %v10884_v39  ;;  %v9252_v39 = vcombine.high %v9201_v50, %v9201_v50 }
 0x63e   : > { %5085 = vmatprep.subr.bf16.mxu1 %v10889_v47  ;;  %v9251_v47 = vcombine.low %v9201_v50, %v9201_v50  ;;  %v11004_v50 = vld [vmem:[%s14412_s5 + $0x700] ss:$16 sps:$4 sm:$0xff]  }
 0x641   : > { %5086 = vmatpush1.bf16.msra.mxu1 %v10887_v43  ;;  %v5431_v43 = vsel %vm3170_vm2, %v9251_v47, 0  ;;  %v11012_v47 = vld [vmem:[%s14412_s5 + $0x744] ss:$16 sps:$4 sm:$0xff]  }
 0x642   : > { %5087 = vmatprep.subr.bf16.mxu1 %v10892_v48  ;;  %v10950_v48 = vld [vmem:[%s14412_s5 + $0x4bc] ss:$16 sps:$4 sm:$0xff]  }
 0x645   : > { %5088 = vmatpush1.bf16.msra.mxu1 %v10890_v13  ;;  %v10948_v13 = vld [vmem:[%s14412_s5 + $0x4b8] ss:$16 sps:$4 sm:$0xff]  }
 0x646   : > { %5089 = vmatprep.subr.bf16.mxu1 %v10895_v32  ;;  %v10953_v32 = vld [vmem:[%s14412_s5 + $0x4dc] ss:$16 sps:$4 sm:$0xff]  }
 0x649   : > { %5090 = vmatpush1.bf16.msra.mxu1 %v10893_v9  ;;  %v10951_v9 = vld [vmem:[%s14412_s5 + $0x4d8] ss:$16 sps:$4 sm:$0xff]  }
 0x64a   : > { %5091 = vmatprep.subr.bf16.mxu1 %v10898_v40  ;;  %v10956_v40 = vld [vmem:[%s14412_s5 + $0x4fc] ss:$16 sps:$4 sm:$0xff]  }
 0x64d   : > { %5092 = vmatpush1.bf16.msra.mxu1 %v10896_v29  ;;  %v10954_v29 = vld [vmem:[%s14412_s5 + $0x4f8] ss:$16 sps:$4 sm:$0xff]  }
 0x64e   : > { %5093 = vmatprep.subr.bf16.mxu1 %v10901_v51  ;;  %v10959_v51 = vld [vmem:[%s14412_s5 + $0x51c] ss:$16 sps:$4 sm:$0xff]  }
 0x651   : > { %5094 = vmatpush1.bf16.msra.mxu1 %v10899_v27  ;;  %v10962_v27 = vld [vmem:[%s14412_s5 + $0x53c] ss:$16 sps:$4 sm:$0xff]  }
 0x652   : > { %5095 = vmatprep.subr.bf16.mxu1 %v10904_v38  ;;  %v10960_v38 = vld [vmem:[%s14412_s5 + $0x538] ss:$16 sps:$4 sm:$0xff]  }
 0x655   : > { %5096 = vmatpush1.bf16.msra.mxu1 %v10902_v14  ;;  %v10965_v14 = vld [vmem:[%s14412_s5 + $0x55c] ss:$16 sps:$4 sm:$0xff]  }
 0x656   : > { %5097 = vmatprep.subr.bf16.mxu1 %v10907_v22  ;;  %v10963_v22 = vld [vmem:[%s14412_s5 + $0x558] ss:$16 sps:$4 sm:$0xff]  }
 0x659   : > { %5098 = vmatpush1.bf16.msra.mxu1 %v10905_v44  ;;  %v10966_v44 = vld [vmem:[%s14412_s5 + $0x578] ss:$16 sps:$4 sm:$0xff]  }
 0x65a   : > { %9151 = vmatprep.subr.msk.bf16.mxu1 %vm3170_vm2, %v9148_v37  ;;  %v10971_v37 = vld [vmem:[%s14412_s5 + $0x59c] ss:$16 sps:$4 sm:$0xff]  }
 0x65d   : > { %5100 = vmatpush1.bf16.msra.mxu1 %v5027_v19  ;;  %v10974_v19 = vld [vmem:[%s14412_s5 + $0x5bc] ss:$16 sps:$4 sm:$0xff]  }
 0x65e   : > { %5442 = vmatprep.subr.bf16.mxu1 %v10912_v52  ;;  %v10972_v52 = vld [vmem:[%s14412_s5 + $0x5b8] ss:$16 sps:$4 sm:$0xff]  }
 0x660   : > { %5108 = vmatmul.mubr.bf16.vlgmr.msra.gmra.mrb[40].mxu1 %v12765_v36  ;;  %v10916_v36 = vld [vmem:[%s14412_s5 + $0x4f0] ss:$16 sps:$4 sm:$0xff]  }
 0x661   : > { %5443 = vmatpush1.bf16.msra.mxu1 %v10910_v46  ;;  %9256 = vmatprep.mubr.msk.bf16.mxu1 %vm4263_vm4, %v12792_v0  ;;  %v10977_v46 = vld [vmem:[%s14412_s5 + $0x5dc] ss:$16 sps:$4 sm:$0xff]  }
 0x662   : > { %5444 = vmatprep.subr.bf16.mxu1 %v10915_v12  ;;  %v10975_v12 = vld [vmem:[%s14412_s5 + $0x5d8] ss:$16 sps:$4 sm:$0xff]  }
 0x663   : > { %v13173_v28 = vpop.f32.mrb[136].mxu0 }
 0x664   : > { %v13175_v49 = vpop.f32.mrb[137].mxu0 }
 0x665   : > { %5445 = vmatpush1.bf16.msra.mxu1 %v10913_v21  ;;  %v13177_v61 = vpop.f32.mrb[138].mxu0  ;;  %v10980_v21 = vld [vmem:[%s14412_s5 + $0x5fc] ss:$16 sps:$4 sm:$0xff]  }
 0x666   : > { %v13182_v60 = vpop.f32.mrb[139].mxu0  ;;  %5446 = vmatprep.subr.bf16.mxu1 %v10918_v6  ;;  %v10978_v6 = vld [vmem:[%s14412_s5 + $0x5f8] ss:$16 sps:$4 sm:$0xff]  }
 0x669   : > { %5447 = vmatpush1.bf16.msra.mxu1 %v10916_v36  ;;  %v10983_v36 = vld [vmem:[%s14412_s5 + $0x61c] ss:$16 sps:$4 sm:$0xff]  }
 0x66a   : > { %5448 = vmatprep.subr.bf16.mxu1 %v10921_v20  ;;  %v9202_v20 = vld [vmem:[%s14412_s5 + $0x638] sm:$0xff] }
 0x66d   : > { %5449 = vmatpush1.bf16.msra.mxu1 %v10919_v55  ;;  %v10981_v55 = vld [vmem:[%s14412_s5 + $0x618] ss:$16 sps:$4 sm:$0xff]  }
 0x66e   : > { %5450 = vmatprep.subr.bf16.mxu1 %v10924_v42  ;;  %v9254_v42 = vcombine.high %v9202_v20, %v9202_v20 }
 0x671   : > { %5451 = vmatpush1.bf16.msra.mxu1 %v10922_v58  ;;  %v9253_v58 = vcombine.low %v9202_v20, %v9202_v20  ;;  %v11047_v20 = vld [vmem:[%s14412_s5 + $0x72c] ss:$16 sps:$4 sm:$0xff]  }
 0x672   : > { %5452 = vmatprep.subr.bf16.mxu1 %v10927_v34 }
 0x673   : > { %v5437_v34 = vsel %vm3170_vm2, %v9253_v58, 0  ;;  %v11048_v58 = vld [vmem:[%s14412_s5 + $0x748] ss:$16 sps:$4 sm:$0xff]  }
 0x675   : > { %5453 = vmatpush1.bf16.msra.mxu1 %v10925_v23  ;;  %v10988_v23 = vld [vmem:[%s14412_s5 + $0x644] ss:$16 sps:$4 sm:$0xff]  }
 0x676   : > { %5454 = vmatprep.subr.bf16.mxu1 %v10930_v1  ;;  %v10986_v1 = vld [vmem:[%s14412_s5 + $0x640] ss:$16 sps:$4 sm:$0xff]  }
 0x679   : > { %5455 = vmatpush1.bf16.msra.mxu1 %v10928_v35  ;;  %v10991_v35 = vld [vmem:[%s14412_s5 + $0x664] ss:$16 sps:$4 sm:$0xff]  }
 0x67a   : > { %5456 = vmatprep.subr.bf16.mxu1 %v10933_v8  ;;  %v10989_v8 = vld [vmem:[%s14412_s5 + $0x660] ss:$16 sps:$4 sm:$0xff]  }
 0x67d   : > { %5457 = vmatpush1.bf16.msra.mxu1 %v10931_v30  ;;  %v10994_v30 = vld [vmem:[%s14412_s5 + $0x684] ss:$16 sps:$4 sm:$0xff]  }
 0x67e   : > { %5458 = vmatprep.subr.bf16.mxu1 %v10936_v7  ;;  %v10992_v7 = vld [vmem:[%s14412_s5 + $0x680] ss:$16 sps:$4 sm:$0xff]  }
 0x681   : > { %5459 = vmatpush1.bf16.msra.mxu1 %v10934_v2  ;;  %v10995_v2 = vld [vmem:[%s14412_s5 + $0x6a0] ss:$16 sps:$4 sm:$0xff]  }
 0x682   : > { %5460 = vmatprep.subr.bf16.mxu1 %v10939_v41  ;;  %v11000_v41 = vld [vmem:[%s14412_s5 + $0x6c4] ss:$16 sps:$4 sm:$0xff]  }
 0x685   : > { %5461 = vmatpush1.bf16.msra.mxu1 %v10937_v17  ;;  %v10998_v17 = vld [vmem:[%s14412_s5 + $0x6c0] ss:$16 sps:$4 sm:$0xff]  }
 0x686   : > { %5462 = vmatprep.subr.bf16.mxu1 %v10942_v16  ;;  %v11003_v16 = vld [vmem:[%s14412_s5 + $0x6e4] ss:$16 sps:$4 sm:$0xff]  }
 0x689   : > { %5463 = vmatpush1.bf16.msra.mxu1 %v10940_v3  ;;  %v11001_v3 = vld [vmem:[%s14412_s5 + $0x6e0] ss:$16 sps:$4 sm:$0xff]  }
 0x68a   : > { %5464 = vmatprep.subr.bf16.mxu1 %v10945_v11  ;;  %v11006_v11 = vld [vmem:[%s14412_s5 + $0x704] ss:$16 sps:$4 sm:$0xff]  }
 0x68d   : > { %5465 = vmatpush1.bf16.msra.mxu1 %v10943_v53  ;;  %v11009_v53 = vld [vmem:[%s14412_s5 + $0x724] ss:$16 sps:$4 sm:$0xff]  }
 0x68e   : > { %9255 = vmatprep.subr.msk.bf16.mxu1 %vm3170_vm2, %v9252_v39  ;;  %v11007_v39 = vld [vmem:[%s14412_s5 + $0x720] ss:$16 sps:$4 sm:$0xff]  }
 0x691   : > { %5467 = vmatpush1.bf16.msra.mxu1 %v5431_v43  ;;  %v11010_v43 = vld [vmem:[%s14412_s5 + $0x740] ss:$16 sps:$4 sm:$0xff]  }
 0x692   : > { %5485 = vmatprep.subr.bf16.mxu1 %v10950_v48  ;;  %v11015_v48 = vld [vmem:[%s14412_s5 + $0x764] ss:$16 sps:$4 sm:$0xff]  }
 0x694   : > { %5475 = vmatmul.mubr.bf16.vlgmr.msra.gmra.mrb[44].mxu1 %v12789_v15 }
 0x695   : > { %5486 = vmatpush1.bf16.msra.mxu1 %v10948_v13  ;;  %9258 = vmatprep.mubr.msk.bf16.mxu1 %vm4263_vm4, %v12792_v0  ;;  %v10957_v0 = vld [vmem:[%s14412_s5 + $0x518] ss:$16 sps:$4 sm:$0xff]   ;;  %v11013_v13 = vld [vmem:[%s14412_s5 + $0x760] ss:$16 sps:$4 sm:$0xff]  }
 0x696   : > { %5487 = vmatprep.subr.bf16.mxu1 %v10953_v32  ;;  %v11018_v32 = vld [vmem:[%s14412_s5 + $0x784] ss:$16 sps:$4 sm:$0xff]  }
 0x699   : > { %5488 = vmatpush1.bf16.msra.mxu1 %v10951_v9  ;;  %v11016_v9 = vld [vmem:[%s14412_s5 + $0x780] ss:$16 sps:$4 sm:$0xff]  }
 0x69a   : > { %5489 = vmatprep.subr.bf16.mxu1 %v10956_v40  ;;  %v11021_v40 = vld [vmem:[%s14412_s5 + $0x7a4] ss:$16 sps:$4 sm:$0xff]  }
 0x69d   : > { %5490 = vmatpush1.bf16.msra.mxu1 %v10954_v29  ;;  %v9307_v29 = vld [vmem:[%s14412_s5 + $0x7c0] sm:$0xff] }
 0x69e   : > { %5491 = vmatprep.subr.bf16.mxu1 %v10959_v51  ;;  %v11019_v51 = vld [vmem:[%s14412_s5 + $0x7a0] ss:$16 sps:$4 sm:$0xff]  }
 0x6a1   : > { %5492 = vmatpush1.bf16.msra.mxu1 %v10957_v0  ;;  %v9358_v0 = vcombine.high %v9307_v29, %v9307_v29 }
 0x6a2   : > { %5493 = vmatprep.subr.bf16.mxu1 %v10962_v27  ;;  %v9357_v27 = vcombine.low %v9307_v29, %v9307_v29  ;;  %v11083_v29 = vld [vmem:[%s14412_s5 + $0x8b0] ss:$16 sps:$4 sm:$0xff]  }
 0x6a5   : > { %5494 = vmatpush1.bf16.msra.mxu1 %v10960_v38  ;;  %v5841_v38 = vsel %vm3170_vm2, %v9357_v27, 0  ;;  %v11091_v27 = vld [vmem:[%s14412_s5 + $0x8f4] ss:$16 sps:$4 sm:$0xff]  }
 0x6a6   : > { %5495 = vmatprep.subr.bf16.mxu1 %v10965_v14  ;;  %v11026_v14 = vld [vmem:[%s14412_s5 + $0x64c] ss:$16 sps:$4 sm:$0xff]  }
 0x6a9   : > { %5496 = vmatpush1.bf16.msra.mxu1 %v10963_v22  ;;  %v11024_v22 = vld [vmem:[%s14412_s5 + $0x648] ss:$16 sps:$4 sm:$0xff]  }
 0x6aa   : > { %5497 = vmatprep.subr.bf16.mxu1 %v10968_v45  ;;  %v11029_v45 = vld [vmem:[%s14412_s5 + $0x66c] ss:$16 sps:$4 sm:$0xff]  }
 0x6ad   : > { %5498 = vmatpush1.bf16.msra.mxu1 %v10966_v44  ;;  %v11027_v44 = vld [vmem:[%s14412_s5 + $0x668] ss:$16 sps:$4 sm:$0xff]  }
 0x6ae   : > { %5499 = vmatprep.subr.bf16.mxu1 %v10971_v37  ;;  %v11032_v37 = vld [vmem:[%s14412_s5 + $0x68c] ss:$16 sps:$4 sm:$0xff]  }
 0x6b1   : > { %5500 = vmatpush1.bf16.msra.mxu1 %v10969_v54  ;;  %v11030_v54 = vld [vmem:[%s14412_s5 + $0x688] ss:$16 sps:$4 sm:$0xff]  }
 0x6b2   : > { %5501 = vmatprep.subr.bf16.mxu1 %v10974_v19  ;;  %v11035_v19 = vld [vmem:[%s14412_s5 + $0x6ac] ss:$16 sps:$4 sm:$0xff]  }
 0x6b5   : > { %5502 = vmatpush1.bf16.msra.mxu1 %v10972_v52  ;;  %v11038_v52 = vld [vmem:[%s14412_s5 + $0x6cc] ss:$16 sps:$4 sm:$0xff]  }
 0x6b6   : > { %5503 = vmatprep.subr.bf16.mxu1 %v10977_v46  ;;  %v11036_v46 = vld [vmem:[%s14412_s5 + $0x6c8] ss:$16 sps:$4 sm:$0xff]  }
 0x6b9   : > { %5504 = vmatpush1.bf16.msra.mxu1 %v10975_v12  ;;  %v11041_v12 = vld [vmem:[%s14412_s5 + $0x6ec] ss:$16 sps:$4 sm:$0xff]  }
 0x6ba   : > { %5505 = vmatprep.subr.bf16.mxu1 %v10980_v21  ;;  %v11039_v21 = vld [vmem:[%s14412_s5 + $0x6e8] ss:$16 sps:$4 sm:$0xff]  }
 0x6bd   : > { %5506 = vmatpush1.bf16.msra.mxu1 %v10978_v6  ;;  %v11044_v6 = vld [vmem:[%s14412_s5 + $0x70c] ss:$16 sps:$4 sm:$0xff]  }
 0x6be   : > { %5507 = vmatprep.subr.bf16.mxu1 %v10983_v36  ;;  %v11042_v36 = vld [vmem:[%s14412_s5 + $0x708] ss:$16 sps:$4 sm:$0xff]  }
 0x6c1   : > { %5508 = vmatpush1.bf16.msra.mxu1 %v10981_v55  ;;  %v11045_v55 = vld [vmem:[%s14412_s5 + $0x728] ss:$16 sps:$4 sm:$0xff]  }
 0x6c2   : > { %9257 = vmatprep.subr.msk.bf16.mxu1 %vm3170_vm2, %v9254_v42  ;;  %v11050_v42 = vld [vmem:[%s14412_s5 + $0x74c] ss:$16 sps:$4 sm:$0xff]  }
 0x6c5   : > { %5510 = vmatpush1.bf16.msra.mxu1 %v5437_v34  ;;  %v11053_v34 = vld [vmem:[%s14412_s5 + $0x76c] ss:$16 sps:$4 sm:$0xff]  }
 0x6c6   : > { %5852 = vmatprep.subr.bf16.mxu1 %v10988_v23  ;;  %v11051_v23 = vld [vmem:[%s14412_s5 + $0x768] ss:$16 sps:$4 sm:$0xff]  }
 0x6c8   : > { %5518 = vmatmul.mubr.bf16.vlgmr.msra.gmra.mrb[40].mxu1 %v12789_v15  ;;  %v10997_v15 = vld [vmem:[%s14412_s5 + $0x6a4] ss:$16 sps:$4 sm:$0xff]  }
 0x6c9   : > { %5853 = vmatpush1.bf16.msra.mxu1 %v10986_v1  ;;  %9362 = vmatprep.mubr.msk.bf16.mxu1 %vm4263_vm4, %v12816_v62  ;;  %v11056_v1 = vld [vmem:[%s14412_s5 + $0x78c] ss:$16 sps:$4 sm:$0xff]  }
 0x6ca   : > { %5854 = vmatprep.subr.bf16.mxu1 %v10991_v35  ;;  %v11054_v35 = vld [vmem:[%s14412_s5 + $0x788] ss:$16 sps:$4 sm:$0xff]  }
 0x6cd   : > { %5855 = vmatpush1.bf16.msra.mxu1 %v10989_v8  ;;  %v11059_v8 = vld [vmem:[%s14412_s5 + $0x7ac] ss:$16 sps:$4 sm:$0xff]  }
 0x6ce   : > { %5856 = vmatprep.subr.bf16.mxu1 %v10994_v30  ;;  %v9308_v30 = vld [vmem:[%s14412_s5 + $0x7c8] sm:$0xff] }
 0x6d1   : > { %5857 = vmatpush1.bf16.msra.mxu1 %v10992_v7  ;;  %v11057_v7 = vld [vmem:[%s14412_s5 + $0x7a8] ss:$16 sps:$4 sm:$0xff]  }
 0x6d2   : > { %5858 = vmatprep.subr.bf16.mxu1 %v10997_v15  ;;  %v9360_v15 = vcombine.high %v9308_v30, %v9308_v30 }
 0x6d5   : > { %5859 = vmatpush1.bf16.msra.mxu1 %v10995_v2  ;;  %v9359_v2 = vcombine.low %v9308_v30, %v9308_v30  ;;  %v11126_v30 = vld [vmem:[%s14412_s5 + $0x8dc] ss:$16 sps:$4 sm:$0xff]  }
 0x6d6   : > { %5860 = vmatprep.subr.bf16.mxu1 %v11000_v41 }
 0x6d7   : > { %v5847_v41 = vsel %vm3170_vm2, %v9359_v2, 0  ;;  %v11127_v2 = vld [vmem:[%s14412_s5 + $0x8f8] ss:$16 sps:$4 sm:$0xff]  }
 0x6d9   : > { %5861 = vmatpush1.bf16.msra.mxu1 %v10998_v17  ;;  %v11064_v17 = vld [vmem:[%s14412_s5 + $0x7d4] ss:$16 sps:$4 sm:$0xff]  }
 0x6da   : > { %5862 = vmatprep.subr.bf16.mxu1 %v11003_v16  ;;  %v11062_v16 = vld [vmem:[%s14412_s5 + $0x7d0] ss:$16 sps:$4 sm:$0xff]  }
 0x6dd   : > { %5863 = vmatpush1.bf16.msra.mxu1 %v11001_v3  ;;  %v11067_v3 = vld [vmem:[%s14412_s5 + $0x7f4] ss:$16 sps:$4 sm:$0xff]  }
 0x6de   : > { %5864 = vmatprep.subr.bf16.mxu1 %v11006_v11  ;;  %v11065_v11 = vld [vmem:[%s14412_s5 + $0x7f0] ss:$16 sps:$4 sm:$0xff]  }
 0x6e1   : > { %5865 = vmatpush1.bf16.msra.mxu1 %v11004_v50  ;;  %v11070_v50 = vld [vmem:[%s14412_s5 + $0x814] ss:$16 sps:$4 sm:$0xff]  }
 0x6e2   : > { %5866 = vmatprep.subr.bf16.mxu1 %v11009_v53  ;;  %v11068_v53 = vld [vmem:[%s14412_s5 + $0x810] ss:$16 sps:$4 sm:$0xff]  }
 0x6e5   : > { %5867 = vmatpush1.bf16.msra.mxu1 %v11007_v39  ;;  %v11071_v39 = vld [vmem:[%s14412_s5 + $0x830] ss:$16 sps:$4 sm:$0xff]  }
 0x6e6   : > { %5868 = vmatprep.subr.bf16.mxu1 %v11012_v47  ;;  %v11076_v47 = vld [vmem:[%s14412_s5 + $0x854] ss:$16 sps:$4 sm:$0xff]  }
 0x6e9   : > { %5869 = vmatpush1.bf16.msra.mxu1 %v11010_v43  ;;  %v11074_v43 = vld [vmem:[%s14412_s5 + $0x850] ss:$16 sps:$4 sm:$0xff]  }
 0x6ea   : > { %5870 = vmatprep.subr.bf16.mxu1 %v11015_v48  ;;  %v11079_v48 = vld [vmem:[%s14412_s5 + $0x874] ss:$16 sps:$4 sm:$0xff]  }
 0x6ed   : > { %5871 = vmatpush1.bf16.msra.mxu1 %v11013_v13  ;;  %v11077_v13 = vld [vmem:[%s14412_s5 + $0x870] ss:$16 sps:$4 sm:$0xff]  }
 0x6ee   : > { %5872 = vmatprep.subr.bf16.mxu1 %v11018_v32  ;;  %v11082_v32 = vld [vmem:[%s14412_s5 + $0x894] ss:$16 sps:$4 sm:$0xff]  }
 0x6f1   : > { %5873 = vmatpush1.bf16.msra.mxu1 %v11016_v9  ;;  %v11080_v9 = vld [vmem:[%s14412_s5 + $0x890] ss:$16 sps:$4 sm:$0xff]  }
 0x6f2   : > { %5874 = vmatprep.subr.bf16.mxu1 %v11021_v40  ;;  %v11085_v40 = vld [vmem:[%s14412_s5 + $0x8b4] ss:$16 sps:$4 sm:$0xff]  }
 0x6f5   : > { %5875 = vmatpush1.bf16.msra.mxu1 %v11019_v51  ;;  %v11088_v51 = vld [vmem:[%s14412_s5 + $0x8d4] ss:$16 sps:$4 sm:$0xff]  }
 0x6f6   : > { %9361 = vmatprep.subr.msk.bf16.mxu1 %vm3170_vm2, %v9358_v0  ;;  %v11086_v0 = vld [vmem:[%s14412_s5 + $0x8d0] ss:$16 sps:$4 sm:$0xff]  }
 0x6f9   : > { %5877 = vmatpush1.bf16.msra.mxu1 %v5841_v38  ;;  %v11089_v38 = vld [vmem:[%s14412_s5 + $0x8f0] ss:$16 sps:$4 sm:$0xff]  }
 0x6fa   : > { %5895 = vmatprep.subr.bf16.mxu1 %v11026_v14  ;;  %v11094_v14 = vld [vmem:[%s14412_s5 + $0x914] ss:$16 sps:$4 sm:$0xff]  }
 0x6fc   : > { %5885 = vmatmul.mubr.bf16.vlgmr.msra.gmra.mrb[44].mxu1 %v12813_v10 }
 0x6fd   : > { %5896 = vmatpush1.bf16.msra.mxu1 %v11024_v22  ;;  %9364 = vmatprep.mubr.msk.bf16.mxu1 %vm4263_vm4, %v12816_v62  ;;  %v11033_v62 = vld [vmem:[%s14412_s5 + $0x6a8] ss:$16 sps:$4 sm:$0xff]   ;;  %v11092_v22 = vld [vmem:[%s14412_s5 + $0x910] ss:$16 sps:$4 sm:$0xff]  }
 0x6fe   : > { %5897 = vmatprep.subr.bf16.mxu1 %v11029_v45  ;;  %v11097_v45 = vld [vmem:[%s14412_s5 + $0x934] ss:$16 sps:$4 sm:$0xff]  }
 0x701   : > { %5898 = vmatpush1.bf16.msra.mxu1 %v11027_v44  ;;  %v9413_v44 = vld [vmem:[%s14412_s5 + $0x950] sm:$0xff] }
 0x702   : > { %5899 = vmatprep.subr.bf16.mxu1 %v11032_v37  ;;  %v11095_v37 = vld [vmem:[%s14412_s5 + $0x930] ss:$16 sps:$4 sm:$0xff]  }
 0x705   : > { %5900 = vmatpush1.bf16.msra.mxu1 %v11030_v54  ;;  %v9464_v54 = vcombine.high %v9413_v44, %v9413_v44 }
 0x706   : > { %5901 = vmatprep.subr.bf16.mxu1 %v11035_v19  ;;  %v9463_v19 = vcombine.low %v9413_v44, %v9413_v44  ;;  %v11162_v44 = vld [vmem:[%s14412_s5 + $0xa60] ss:$16 sps:$4 sm:$0xff]  }
 0x709   : > { %5902 = vmatpush1.bf16.msra.mxu1 %v11033_v62  ;;  %v6251_v62 = vsel %vm3170_vm2, %v9463_v19, 0  ;;  %v11170_v19 = vld [vmem:[%s14412_s5 + $0xaa4] ss:$16 sps:$4 sm:$0xff]  }
 0x70a   : > { %5903 = vmatprep.subr.bf16.mxu1 %v11038_v52  ;;  %v11102_v52 = vld [vmem:[%s14412_s5 + $0x7dc] ss:$16 sps:$4 sm:$0xff]  }
 0x70d   : > { %5904 = vmatpush1.bf16.msra.mxu1 %v11036_v46  ;;  %v11100_v46 = vld [vmem:[%s14412_s5 + $0x7d8] ss:$16 sps:$4 sm:$0xff]  }
 0x70e   : > { %5905 = vmatprep.subr.bf16.mxu1 %v11041_v12  ;;  %v11105_v12 = vld [vmem:[%s14412_s5 + $0x7fc] ss:$16 sps:$4 sm:$0xff]  }
 0x711   : > { %5906 = vmatpush1.bf16.msra.mxu1 %v11039_v21  ;;  %v11103_v21 = vld [vmem:[%s14412_s5 + $0x7f8] ss:$16 sps:$4 sm:$0xff]  }
 0x712   : > { %5907 = vmatprep.subr.bf16.mxu1 %v11044_v6  ;;  %v11108_v6 = vld [vmem:[%s14412_s5 + $0x81c] ss:$16 sps:$4 sm:$0xff]  }
 0x715   : > { %5908 = vmatpush1.bf16.msra.mxu1 %v11042_v36  ;;  %v11106_v36 = vld [vmem:[%s14412_s5 + $0x818] ss:$16 sps:$4 sm:$0xff]  }
 0x716   : > { %5909 = vmatprep.subr.bf16.mxu1 %v11047_v20  ;;  %v11111_v20 = vld [vmem:[%s14412_s5 + $0x83c] ss:$16 sps:$4 sm:$0xff]  }
 0x719   : > { %5910 = vmatpush1.bf16.msra.mxu1 %v11045_v55  ;;  %v11114_v55 = vld [vmem:[%s14412_s5 + $0x85c] ss:$16 sps:$4 sm:$0xff]  }
 0x71a   : > { %5911 = vmatprep.subr.bf16.mxu1 %v11050_v42  ;;  %v11112_v42 = vld [vmem:[%s14412_s5 + $0x858] ss:$16 sps:$4 sm:$0xff]  }
 0x71d   : > { %5912 = vmatpush1.bf16.msra.mxu1 %v11048_v58  ;;  %v11117_v58 = vld [vmem:[%s14412_s5 + $0x87c] ss:$16 sps:$4 sm:$0xff]  }
 0x71e   : > { %5913 = vmatprep.subr.bf16.mxu1 %v11053_v34  ;;  %v11115_v34 = vld [vmem:[%s14412_s5 + $0x878] ss:$16 sps:$4 sm:$0xff]  }
 0x721   : > { %5914 = vmatpush1.bf16.msra.mxu1 %v11051_v23  ;;  %v11120_v23 = vld [vmem:[%s14412_s5 + $0x89c] ss:$16 sps:$4 sm:$0xff]  }
 0x722   : > { %5915 = vmatprep.subr.bf16.mxu1 %v11056_v1  ;;  %v11118_v1 = vld [vmem:[%s14412_s5 + $0x898] ss:$16 sps:$4 sm:$0xff]  }
 0x725   : > { %5916 = vmatpush1.bf16.msra.mxu1 %v11054_v35  ;;  %v11123_v35 = vld [vmem:[%s14412_s5 + $0x8bc] ss:$16 sps:$4 sm:$0xff]  }
 0x726   : > { %5917 = vmatprep.subr.bf16.mxu1 %v11059_v8  ;;  %v11121_v8 = vld [vmem:[%s14412_s5 + $0x8b8] ss:$16 sps:$4 sm:$0xff]  }
 0x729   : > { %5918 = vmatpush1.bf16.msra.mxu1 %v11057_v7  ;;  %v11124_v7 = vld [vmem:[%s14412_s5 + $0x8d8] ss:$16 sps:$4 sm:$0xff]  }
 0x72a   : > { %9363 = vmatprep.subr.msk.bf16.mxu1 %vm3170_vm2, %v9360_v15  ;;  %v11129_v15 = vld [vmem:[%s14412_s5 + $0x8fc] ss:$16 sps:$4 sm:$0xff]  }
 0x72d   : > { %5920 = vmatpush1.bf16.msra.mxu1 %v5847_v41  ;;  %v11132_v41 = vld [vmem:[%s14412_s5 + $0x91c] ss:$16 sps:$4 sm:$0xff]  }
 0x72e   : > { %6262 = vmatprep.subr.bf16.mxu1 %v11064_v17  ;;  %v11130_v17 = vld [vmem:[%s14412_s5 + $0x918] ss:$16 sps:$4 sm:$0xff]  }
 0x730   : > { %5928 = vmatmul.mubr.bf16.vlgmr.msra.gmra.mrb[40].mxu1 %v12813_v10  ;;  %v11073_v10 = vld [vmem:[%s14412_s5 + $0x834] ss:$16 sps:$4 sm:$0xff]  }
 0x731   : > { %6263 = vmatpush1.bf16.msra.mxu1 %v11062_v16  ;;  %9468 = vmatprep.mubr.msk.bf16.mxu1 %vm4263_vm4, %v12840_v24  ;;  %v11135_v16 = vld [vmem:[%s14412_s5 + $0x93c] ss:$16 sps:$4 sm:$0xff]  }
 0x732   : > { %6264 = vmatprep.subr.bf16.mxu1 %v11067_v3  ;;  %v9414_v3 = vld [vmem:[%s14412_s5 + $0x958] sm:$0xff] }
 0x735   : > { %6265 = vmatpush1.bf16.msra.mxu1 %v11065_v11  ;;  %v11133_v11 = vld [vmem:[%s14412_s5 + $0x938] ss:$16 sps:$4 sm:$0xff]  }
 0x736   : > { %6266 = vmatprep.subr.bf16.mxu1 %v11070_v50  ;;  %v9466_v50 = vcombine.high %v9414_v3, %v9414_v3 }
 0x739   : > { %6267 = vmatpush1.bf16.msra.mxu1 %v11068_v53  ;;  %v9465_v53 = vcombine.low %v9414_v3, %v9414_v3  ;;  %v11205_v3 = vld [vmem:[%s14412_s5 + $0xa8c] ss:$16 sps:$4 sm:$0xff]  }
 0x73a   : > { %6268 = vmatprep.subr.bf16.mxu1 %v11073_v10 }
 0x73b   : > { %v6257_v10 = vsel %vm3170_vm2, %v9465_v53, 0  ;;  %v11206_v53 = vld [vmem:[%s14412_s5 + $0xaa8] ss:$16 sps:$4 sm:$0xff]  }
 0x73d   : > { %6269 = vmatpush1.bf16.msra.mxu1 %v11071_v39  ;;  %v11140_v39 = vld [vmem:[%s14412_s5 + $0x964] ss:$16 sps:$4 sm:$0xff]  }
 0x73e   : > { %6270 = vmatprep.subr.bf16.mxu1 %v11076_v47  ;;  %v11138_v47 = vld [vmem:[%s14412_s5 + $0x960] ss:$16 sps:$4 sm:$0xff]  }
 0x741   : > { %6271 = vmatpush1.bf16.msra.mxu1 %v11074_v43  ;;  %v11143_v43 = vld [vmem:[%s14412_s5 + $0x984] ss:$16 sps:$4 sm:$0xff]  }
 0x742   : > { %6272 = vmatprep.subr.bf16.mxu1 %v11079_v48  ;;  %v11141_v48 = vld [vmem:[%s14412_s5 + $0x980] ss:$16 sps:$4 sm:$0xff]  }
 0x745   : > { %6273 = vmatpush1.bf16.msra.mxu1 %v11077_v13  ;;  %v11146_v13 = vld [vmem:[%s14412_s5 + $0x9a4] ss:$16 sps:$4 sm:$0xff]  }
 0x746   : > { %6274 = vmatprep.subr.bf16.mxu1 %v11082_v32  ;;  %v11144_v32 = vld [vmem:[%s14412_s5 + $0x9a0] ss:$16 sps:$4 sm:$0xff]  }
 0x749   : > { %6275 = vmatpush1.bf16.msra.mxu1 %v11080_v9  ;;  %v11147_v9 = vld [vmem:[%s14412_s5 + $0x9c0] ss:$16 sps:$4 sm:$0xff]  }
 0x74a   : > { %6276 = vmatprep.subr.bf16.mxu1 %v11085_v40  ;;  %v11152_v40 = vld [vmem:[%s14412_s5 + $0x9e4] ss:$16 sps:$4 sm:$0xff]  }
 0x74d   : > { %6277 = vmatpush1.bf16.msra.mxu1 %v11083_v29  ;;  %v11150_v29 = vld [vmem:[%s14412_s5 + $0x9e0] ss:$16 sps:$4 sm:$0xff]  }
 0x74e   : > { %6278 = vmatprep.subr.bf16.mxu1 %v11088_v51  ;;  %v11155_v51 = vld [vmem:[%s14412_s5 + $0xa04] ss:$16 sps:$4 sm:$0xff]  }
 0x751   : > { %6279 = vmatpush1.bf16.msra.mxu1 %v11086_v0  ;;  %v11153_v0 = vld [vmem:[%s14412_s5 + $0xa00] ss:$16 sps:$4 sm:$0xff]  }
 0x752   : > { %6280 = vmatprep.subr.bf16.mxu1 %v11091_v27  ;;  %v11158_v27 = vld [vmem:[%s14412_s5 + $0xa24] ss:$16 sps:$4 sm:$0xff]  }
 0x755   : > { %6281 = vmatpush1.bf16.msra.mxu1 %v11089_v38  ;;  %v11156_v38 = vld [vmem:[%s14412_s5 + $0xa20] ss:$16 sps:$4 sm:$0xff]  }
 0x756   : > { %6282 = vmatprep.subr.bf16.mxu1 %v11094_v14  ;;  %v11161_v14 = vld [vmem:[%s14412_s5 + $0xa44] ss:$16 sps:$4 sm:$0xff]  }
 0x759   : > { %6283 = vmatpush1.bf16.msra.mxu1 %v11092_v22  ;;  %v11159_v22 = vld [vmem:[%s14412_s5 + $0xa40] ss:$16 sps:$4 sm:$0xff]  }
 0x75a   : > { %6284 = vmatprep.subr.bf16.mxu1 %v11097_v45  ;;  %v11164_v45 = vld [vmem:[%s14412_s5 + $0xa64] ss:$16 sps:$4 sm:$0xff]  }
 0x75d   : > { %6285 = vmatpush1.bf16.msra.mxu1 %v11095_v37  ;;  %v11167_v37 = vld [vmem:[%s14412_s5 + $0xa84] ss:$16 sps:$4 sm:$0xff]  }
 0x75e   : > { %9467 = vmatprep.subr.msk.bf16.mxu1 %vm3170_vm2, %v9464_v54  ;;  %v11165_v54 = vld [vmem:[%s14412_s5 + $0xa80] ss:$16 sps:$4 sm:$0xff]  }
 0x761   : > { %6287 = vmatpush1.bf16.msra.mxu1 %v6251_v62  ;;  %v11168_v62 = vld [vmem:[%s14412_s5 + $0xaa0] ss:$16 sps:$4 sm:$0xff]  }
 0x762   : > { %6305 = vmatprep.subr.bf16.mxu1 %v11102_v52  ;;  %v11173_v52 = vld [vmem:[%s14412_s5 + $0xac4] ss:$16 sps:$4 sm:$0xff]  }
 0x764   : > { %6295 = vmatmul.mubr.bf16.vlgmr.msra.gmra.mrb[44].mxu1 %v12837_v5 }
 0x765   : > { %6306 = vmatpush1.bf16.msra.mxu1 %v11100_v46  ;;  %9470 = vmatprep.mubr.msk.bf16.mxu1 %vm4263_vm4, %v12840_v24  ;;  %v11109_v24 = vld [vmem:[%s14412_s5 + $0x838] ss:$16 sps:$4 sm:$0xff]   ;;  %v9519_v46 = vld [vmem:[%s14412_s5 + $0xae0] sm:$0xff] }
 0x766   : > { %6307 = vmatprep.subr.bf16.mxu1 %v11105_v12  ;;  %v11171_v12 = vld [vmem:[%s14412_s5 + $0xac0] ss:$16 sps:$4 sm:$0xff]  }
 0x769   : > { %6308 = vmatpush1.bf16.msra.mxu1 %v11103_v21  ;;  %v9570_v21 = vcombine.high %v9519_v46, %v9519_v46 }
 0x76a   : > { %6309 = vmatprep.subr.bf16.mxu1 %v11108_v6  ;;  %v9569_v6 = vcombine.low %v9519_v46, %v9519_v46  ;;  %v11241_v46 = vld [vmem:[%s14412_s5 + $0xc10] ss:$16 sps:$4 sm:$0xff]  }
 0x76d   : > { %6310 = vmatpush1.bf16.msra.mxu1 %v11106_v36  ;;  %v6661_v36 = vsel %vm3170_vm2, %v9569_v6, 0  ;;  %v11249_v6 = vld [vmem:[%s14412_s5 + $0xc54] ss:$16 sps:$4 sm:$0xff]  }
 0x76e   : > { %6311 = vmatprep.subr.bf16.mxu1 %v11111_v20  ;;  %v11178_v20 = vld [vmem:[%s14412_s5 + $0x96c] ss:$16 sps:$4 sm:$0xff]  }
 0x771   : > { %6312 = vmatpush1.bf16.msra.mxu1 %v11109_v24  ;;  %v11176_v24 = vld [vmem:[%s14412_s5 + $0x968] ss:$16 sps:$4 sm:$0xff]  }
 0x772   : > { %6313 = vmatprep.subr.bf16.mxu1 %v11114_v55  ;;  %v11181_v55 = vld [vmem:[%s14412_s5 + $0x98c] ss:$16 sps:$4 sm:$0xff]  }
 0x775   : > { %6314 = vmatpush1.bf16.msra.mxu1 %v11112_v42  ;;  %v11179_v42 = vld [vmem:[%s14412_s5 + $0x988] ss:$16 sps:$4 sm:$0xff]  }
 0x776   : > { %6315 = vmatprep.subr.bf16.mxu1 %v11117_v58  ;;  %v11184_v58 = vld [vmem:[%s14412_s5 + $0x9ac] ss:$16 sps:$4 sm:$0xff]  }
 0x779   : > { %6316 = vmatpush1.bf16.msra.mxu1 %v11115_v34  ;;  %v11182_v34 = vld [vmem:[%s14412_s5 + $0x9a8] ss:$16 sps:$4 sm:$0xff]  }
 0x77a   : > { %6317 = vmatprep.subr.bf16.mxu1 %v11120_v23  ;;  %v11187_v23 = vld [vmem:[%s14412_s5 + $0x9cc] ss:$16 sps:$4 sm:$0xff]  }
 0x77d   : > { %6318 = vmatpush1.bf16.msra.mxu1 %v11118_v1  ;;  %v11190_v1 = vld [vmem:[%s14412_s5 + $0x9ec] ss:$16 sps:$4 sm:$0xff]  }
 0x77e   : > { %6319 = vmatprep.subr.bf16.mxu1 %v11123_v35  ;;  %v11188_v35 = vld [vmem:[%s14412_s5 + $0x9e8] ss:$16 sps:$4 sm:$0xff]  }
 0x781   : > { %6320 = vmatpush1.bf16.msra.mxu1 %v11121_v8  ;;  %v11193_v8 = vld [vmem:[%s14412_s5 + $0xa0c] ss:$16 sps:$4 sm:$0xff]  }
 0x782   : > { %6321 = vmatprep.subr.bf16.mxu1 %v11126_v30  ;;  %v11191_v30 = vld [vmem:[%s14412_s5 + $0xa08] ss:$16 sps:$4 sm:$0xff]  }
 0x785   : > { %6322 = vmatpush1.bf16.msra.mxu1 %v11124_v7  ;;  %v11196_v7 = vld [vmem:[%s14412_s5 + $0xa2c] ss:$16 sps:$4 sm:$0xff]  }
 0x786   : > { %6323 = vmatprep.subr.bf16.mxu1 %v11129_v15  ;;  %v11194_v15 = vld [vmem:[%s14412_s5 + $0xa28] ss:$16 sps:$4 sm:$0xff]  }
 0x789   : > { %6324 = vmatpush1.bf16.msra.mxu1 %v11127_v2  ;;  %v11199_v2 = vld [vmem:[%s14412_s5 + $0xa4c] ss:$16 sps:$4 sm:$0xff]  }
 0x78a   : > { %6325 = vmatprep.subr.bf16.mxu1 %v11132_v41  ;;  %v11197_v41 = vld [vmem:[%s14412_s5 + $0xa48] ss:$16 sps:$4 sm:$0xff]  }
 0x78d   : > { %6326 = vmatpush1.bf16.msra.mxu1 %v11130_v17  ;;  %v11202_v17 = vld [vmem:[%s14412_s5 + $0xa6c] ss:$16 sps:$4 sm:$0xff]  }
 0x78e   : > { %6327 = vmatprep.subr.bf16.mxu1 %v11135_v16  ;;  %v11200_v16 = vld [vmem:[%s14412_s5 + $0xa68] ss:$16 sps:$4 sm:$0xff]  }
 0x791   : > { %6328 = vmatpush1.bf16.msra.mxu1 %v11133_v11  ;;  %v11203_v11 = vld [vmem:[%s14412_s5 + $0xa88] ss:$16 sps:$4 sm:$0xff]  }
 0x792   : > { %9469 = vmatprep.subr.msk.bf16.mxu1 %vm3170_vm2, %v9466_v50  ;;  %v11208_v50 = vld [vmem:[%s14412_s5 + $0xaac] ss:$16 sps:$4 sm:$0xff]  }
 0x795   : > { %6330 = vmatpush1.bf16.msra.mxu1 %v6257_v10  ;;  %v11211_v10 = vld [vmem:[%s14412_s5 + $0xacc] ss:$16 sps:$4 sm:$0xff]  }
 0x796   : > { %6672 = vmatprep.subr.bf16.mxu1 %v11140_v39  ;;  %v9520_v39 = vld [vmem:[%s14412_s5 + $0xae8] sm:$0xff] }
 0x798   : > { %6338 = vmatmul.mubr.bf16.vlgmr.msra.gmra.mrb[40].mxu1 %v12837_v5  ;;  %v11149_v5 = vld [vmem:[%s14412_s5 + $0x9c4] ss:$16 sps:$4 sm:$0xff]  }
 0x799   : > { %6673 = vmatpush1.bf16.msra.mxu1 %v11138_v47  ;;  %9574 = vmatprep.mubr.msk.bf16.mxu1 %vm4263_vm4, %v12864_v63  ;;  %v11209_v47 = vld [vmem:[%s14412_s5 + $0xac8] ss:$16 sps:$4 sm:$0xff]  }
 0x79a   : > { %6674 = vmatprep.subr.bf16.mxu1 %v11143_v43  ;;  %v9572_v43 = vcombine.high %v9520_v39, %v9520_v39 }
 0x79d   : > { %6675 = vmatpush1.bf16.msra.mxu1 %v11141_v48  ;;  %v9571_v48 = vcombine.low %v9520_v39, %v9520_v39  ;;  %v11284_v39 = vld [vmem:[%s14412_s5 + $0xc3c] ss:$16 sps:$4 sm:$0xff]  }
 0x79e   : > { %6676 = vmatprep.subr.bf16.mxu1 %v11146_v13 }
 0x79f   : > { %v6667_v13 = vsel %vm3170_vm2, %v9571_v48, 0  ;;  %v9626_v48 = vld [vmem:[%s14412_s5 + $0xc78] sm:$0xff] }
 0x7a1   : > { %6677 = vmatpush1.bf16.msra.mxu1 %v11144_v32  ;;  %v11216_v32 = vld [vmem:[%s14412_s5 + $0xaf4] ss:$16 sps:$4 sm:$0xff]  }
 0x7a2   : > { %6678 = vmatprep.subr.bf16.mxu1 %v11149_v5  ;;  %v11214_v5 = vld [vmem:[%s14412_s5 + $0xaf0] ss:$16 sps:$4 sm:$0xff]  }
 0x7a5   : > { %6679 = vmatpush1.bf16.msra.mxu1 %v11147_v9  ;;  %v11219_v9 = vld [vmem:[%s14412_s5 + $0xb14] ss:$16 sps:$4 sm:$0xff]  }
 0x7a6   : > { %6680 = vmatprep.subr.bf16.mxu1 %v11152_v40  ;;  %v11217_v40 = vld [vmem:[%s14412_s5 + $0xb10] ss:$16 sps:$4 sm:$0xff]  }
 0x7a9   : > { %6681 = vmatpush1.bf16.msra.mxu1 %v11150_v29  ;;  %v11222_v29 = vld [vmem:[%s14412_s5 + $0xb34] ss:$16 sps:$4 sm:$0xff]  }
 0x7aa   : > { %6682 = vmatprep.subr.bf16.mxu1 %v11155_v51  ;;  %v11220_v51 = vld [vmem:[%s14412_s5 + $0xb30] ss:$16 sps:$4 sm:$0xff]  }
 0x7ad   : > { %6683 = vmatpush1.bf16.msra.mxu1 %v11153_v0  ;;  %v11223_v0 = vld [vmem:[%s14412_s5 + $0xb50] ss:$16 sps:$4 sm:$0xff]  }
 0x7ae   : > { %6684 = vmatprep.subr.bf16.mxu1 %v11158_v27  ;;  %v11228_v27 = vld [vmem:[%s14412_s5 + $0xb74] ss:$16 sps:$4 sm:$0xff]  }
 0x7b1   : > { %6685 = vmatpush1.bf16.msra.mxu1 %v11156_v38  ;;  %v11226_v38 = vld [vmem:[%s14412_s5 + $0xb70] ss:$16 sps:$4 sm:$0xff]  }
 0x7b2   : > { %6686 = vmatprep.subr.bf16.mxu1 %v11161_v14  ;;  %v11231_v14 = vld [vmem:[%s14412_s5 + $0xb94] ss:$16 sps:$4 sm:$0xff]  }
 0x7b5   : > { %6687 = vmatpush1.bf16.msra.mxu1 %v11159_v22  ;;  %v11229_v22 = vld [vmem:[%s14412_s5 + $0xb90] ss:$16 sps:$4 sm:$0xff]  }
 0x7b6   : > { %6688 = vmatprep.subr.bf16.mxu1 %v11164_v45  ;;  %v11234_v45 = vld [vmem:[%s14412_s5 + $0xbb4] ss:$16 sps:$4 sm:$0xff]  }
 0x7b9   : > { %6689 = vmatpush1.bf16.msra.mxu1 %v11162_v44  ;;  %v11232_v44 = vld [vmem:[%s14412_s5 + $0xbb0] ss:$16 sps:$4 sm:$0xff]  }
 0x7ba   : > { %6690 = vmatprep.subr.bf16.mxu1 %v11167_v37  ;;  %v11237_v37 = vld [vmem:[%s14412_s5 + $0xbd4] ss:$16 sps:$4 sm:$0xff]  }
 0x7bd   : > { %6691 = vmatpush1.bf16.msra.mxu1 %v11165_v54  ;;  %v11235_v54 = vld [vmem:[%s14412_s5 + $0xbd0] ss:$16 sps:$4 sm:$0xff]  }
 0x7be   : > { %6692 = vmatprep.subr.bf16.mxu1 %v11170_v19  ;;  %v11240_v19 = vld [vmem:[%s14412_s5 + $0xbf4] ss:$16 sps:$4 sm:$0xff]  }
 0x7c1   : > { %6693 = vmatpush1.bf16.msra.mxu1 %v11168_v62  ;;  %v11238_v62 = vld [vmem:[%s14412_s5 + $0xbf0] ss:$16 sps:$4 sm:$0xff]  }
 0x7c2   : > { %6694 = vmatprep.subr.bf16.mxu1 %v11173_v52  ;;  %v11243_v52 = vld [vmem:[%s14412_s5 + $0xc14] ss:$16 sps:$4 sm:$0xff]  }
 0x7c5   : > { %6695 = vmatpush1.bf16.msra.mxu1 %v11171_v12  ;;  %v11246_v12 = vld [vmem:[%s14412_s5 + $0xc34] ss:$16 sps:$4 sm:$0xff]  }
 0x7c6   : > { %9573 = vmatprep.subr.msk.bf16.mxu1 %vm3170_vm2, %v9570_v21  ;;  %v11244_v21 = vld [vmem:[%s14412_s5 + $0xc30] ss:$16 sps:$4 sm:$0xff]  }
 0x7c9   : > { %6697 = vmatpush1.bf16.msra.mxu1 %v6661_v36  ;;  %v9625_v36 = vld [vmem:[%s14412_s5 + $0xc70] sm:$0xff] }
 0x7ca   : > { %6715 = vmatprep.subr.bf16.mxu1 %v11178_v20  ;;  %v11247_v20 = vld [vmem:[%s14412_s5 + $0xc50] ss:$16 sps:$4 sm:$0xff]  }
 0x7cc   : > { %6705 = vmatmul.mubr.bf16.vlgmr.msra.gmra.mrb[44].mxu1 %v12861_v56 }
 0x7cd   : > { %6716 = vmatpush1.bf16.msra.mxu1 %v11176_v24  ;;  %9576 = vmatprep.mubr.msk.bf16.mxu1 %vm4263_vm4, %v12864_v63  ;;  %v11185_v63 = vld [vmem:[%s14412_s5 + $0x9c8] ss:$16 sps:$4 sm:$0xff]   ;;  %v9676_v24 = vcombine.high %v9625_v36, %v9625_v36 }
 0x7ce   : > { %6717 = vmatprep.subr.bf16.mxu1 %v11181_v55  ;;  %v9675_v55 = vcombine.low %v9625_v36, %v9625_v36  ;;  %v11320_v36 = vld [vmem:[%s14412_s5 + $0xdc0] ss:$16 sps:$4 sm:$0xff]  }
 0x7d1   : > { %6718 = vmatpush1.bf16.msra.mxu1 %v11179_v42  ;;  %v7071_v42 = vsel %vm3170_vm2, %v9675_v55, 0  ;;  %v11323_v55 = vld [vmem:[%s14412_s5 + $0xde0] ss:$16 sps:$4 sm:$0xff]  }
 0x7d2   : > { %6719 = vmatprep.subr.bf16.mxu1 %v11184_v58  ;;  %v11254_v58 = vld [vmem:[%s14412_s5 + $0xafc] ss:$16 sps:$4 sm:$0xff]  }
 0x7d5   : > { %6720 = vmatpush1.bf16.msra.mxu1 %v11182_v34  ;;  %v11252_v34 = vld [vmem:[%s14412_s5 + $0xaf8] ss:$16 sps:$4 sm:$0xff]  }
 0x7d6   : > { %6721 = vmatprep.subr.bf16.mxu1 %v11187_v23  ;;  %v11257_v23 = vld [vmem:[%s14412_s5 + $0xb1c] ss:$16 sps:$4 sm:$0xff]  }
 0x7d9   : > { %6722 = vmatpush1.bf16.msra.mxu1 %v11185_v63  ;;  %v11255_v63 = vld [vmem:[%s14412_s5 + $0xb18] ss:$16 sps:$4 sm:$0xff]  }
 0x7da   : > { %6723 = vmatprep.subr.bf16.mxu1 %v11190_v1  ;;  %v11260_v1 = vld [vmem:[%s14412_s5 + $0xb3c] ss:$16 sps:$4 sm:$0xff]  }
 0x7dd   : > { %6724 = vmatpush1.bf16.msra.mxu1 %v11188_v35  ;;  %v11258_v35 = vld [vmem:[%s14412_s5 + $0xb38] ss:$16 sps:$4 sm:$0xff]  }
 0x7de   : > { %6725 = vmatprep.subr.bf16.mxu1 %v11193_v8  ;;  %v11263_v8 = vld [vmem:[%s14412_s5 + $0xb5c] ss:$16 sps:$4 sm:$0xff]  }
 0x7e1   : > { %6726 = vmatpush1.bf16.msra.mxu1 %v11191_v30  ;;  %v11266_v30 = vld [vmem:[%s14412_s5 + $0xb7c] ss:$16 sps:$4 sm:$0xff]  }
 0x7e2   : > { %6727 = vmatprep.subr.bf16.mxu1 %v11196_v7  ;;  %v11264_v7 = vld [vmem:[%s14412_s5 + $0xb78] ss:$16 sps:$4 sm:$0xff]  }
 0x7e5   : > { %6728 = vmatpush1.bf16.msra.mxu1 %v11194_v15  ;;  %v11269_v15 = vld [vmem:[%s14412_s5 + $0xb9c] ss:$16 sps:$4 sm:$0xff]  }
 0x7e6   : > { %6729 = vmatprep.subr.bf16.mxu1 %v11199_v2  ;;  %v11267_v2 = vld [vmem:[%s14412_s5 + $0xb98] ss:$16 sps:$4 sm:$0xff]  }
 0x7e9   : > { %6730 = vmatpush1.bf16.msra.mxu1 %v11197_v41  ;;  %v11272_v41 = vld [vmem:[%s14412_s5 + $0xbbc] ss:$16 sps:$4 sm:$0xff]  }
 0x7ea   : > { %6731 = vmatprep.subr.bf16.mxu1 %v11202_v17  ;;  %v11270_v17 = vld [vmem:[%s14412_s5 + $0xbb8] ss:$16 sps:$4 sm:$0xff]  }
 0x7ed   : > { %6732 = vmatpush1.bf16.msra.mxu1 %v11200_v16  ;;  %v11275_v16 = vld [vmem:[%s14412_s5 + $0xbdc] ss:$16 sps:$4 sm:$0xff]  }
 0x7ee   : > { %6733 = vmatprep.subr.bf16.mxu1 %v11205_v3  ;;  %v11273_v3 = vld [vmem:[%s14412_s5 + $0xbd8] ss:$16 sps:$4 sm:$0xff]  }
 0x7f1   : > { %6734 = vmatpush1.bf16.msra.mxu1 %v11203_v11  ;;  %v11278_v11 = vld [vmem:[%s14412_s5 + $0xbfc] ss:$16 sps:$4 sm:$0xff]  }
 0x7f2   : > { %6735 = vmatprep.subr.bf16.mxu1 %v11208_v50  ;;  %v11276_v50 = vld [vmem:[%s14412_s5 + $0xbf8] ss:$16 sps:$4 sm:$0xff]  }
 0x7f5   : > { %6736 = vmatpush1.bf16.msra.mxu1 %v11206_v53  ;;  %v11281_v53 = vld [vmem:[%s14412_s5 + $0xc1c] ss:$16 sps:$4 sm:$0xff]  }
 0x7f6   : > { %6737 = vmatprep.subr.bf16.mxu1 %v11211_v10  ;;  %v11279_v10 = vld [vmem:[%s14412_s5 + $0xc18] ss:$16 sps:$4 sm:$0xff]  }
 0x7f9   : > { %6738 = vmatpush1.bf16.msra.mxu1 %v11209_v47  ;;  %v11282_v47 = vld [vmem:[%s14412_s5 + $0xc38] ss:$16 sps:$4 sm:$0xff]  }
 0x7fa   : > { %9575 = vmatprep.subr.msk.bf16.mxu1 %vm3170_vm2, %v9572_v43  ;;  %v11287_v43 = vld [vmem:[%s14412_s5 + $0xc5c] ss:$16 sps:$4 sm:$0xff]  }
 0x7fd   : > { %6740 = vmatpush1.bf16.msra.mxu1 %v6667_v13  ;;  %v11285_v13 = vld [vmem:[%s14412_s5 + $0xc58] ss:$16 sps:$4 sm:$0xff]  }
 0x7fe   : > { %7082 = vmatprep.subr.bf16.mxu1 %v11216_v32  ;;  %v9678_v32 = vcombine.high %v9626_v48, %v9626_v48 }
 0x800   : > { %6748 = vmatmul.mubr.bf16.vlgmr.msra.gmra.mrb[40].mxu1 %v12861_v56  ;;  %v11225_v56 = vld [vmem:[%s14412_s5 + $0xb54] ss:$16 sps:$4 sm:$0xff]  }
 0x801   : > { %7083 = vmatpush1.bf16.msra.mxu1 %v11214_v5  ;;  %9680 = vmatprep.mubr.msk.bf16.mxu1 %vm4263_vm4, %v12888_v26  ;;  %v9677_v5 = vcombine.low %v9626_v48, %v9626_v48  ;;  %v11445_v48 = vld [vmem:[%s14414_s7 + $0x8] sm:$0xff]  }
 0x802   : > { %7084 = vmatprep.subr.bf16.mxu1 %v11219_v9 }
 0x803   : > { %v7077_v9 = vsel %vm3170_vm2, %v9677_v5, 0  ;;  %v11360_v5 = vld [vmem:[%s14412_s5 + $0xdcc] ss:$16 sps:$4 sm:$0xff]  }
 0x805   : > { %7085 = vmatpush1.bf16.msra.mxu1 %v11217_v40  ;;  %v11292_v40 = vld [vmem:[%s14412_s5 + $0xc84] ss:$16 sps:$4 sm:$0xff]  }
 0x806   : > { %7086 = vmatprep.subr.bf16.mxu1 %v11222_v29  ;;  %v11290_v29 = vld [vmem:[%s14412_s5 + $0xc80] ss:$16 sps:$4 sm:$0xff]  }
 0x809   : > { %7087 = vmatpush1.bf16.msra.mxu1 %v11220_v51  ;;  %v11295_v51 = vld [vmem:[%s14412_s5 + $0xca4] ss:$16 sps:$4 sm:$0xff]  }
 0x80a   : > { %7088 = vmatprep.subr.bf16.mxu1 %v11225_v56  ;;  %v11293_v56 = vld [vmem:[%s14412_s5 + $0xca0] ss:$16 sps:$4 sm:$0xff]  }
 0x80d   : > { %7089 = vmatpush1.bf16.msra.mxu1 %v11223_v0  ;;  %v11298_v0 = vld [vmem:[%s14412_s5 + $0xcc4] ss:$16 sps:$4 sm:$0xff]  }
 0x80e   : > { %7090 = vmatprep.subr.bf16.mxu1 %v11228_v27  ;;  %v11296_v27 = vld [vmem:[%s14412_s5 + $0xcc0] ss:$16 sps:$4 sm:$0xff]  }
 0x811   : > { %7091 = vmatpush1.bf16.msra.mxu1 %v11226_v38  ;;  %v11299_v38 = vld [vmem:[%s14412_s5 + $0xce0] ss:$16 sps:$4 sm:$0xff]  }
 0x812   : > { %7092 = vmatprep.subr.bf16.mxu1 %v11231_v14  ;;  %v11304_v14 = vld [vmem:[%s14412_s5 + $0xd04] ss:$16 sps:$4 sm:$0xff]  }
 0x815   : > { %7093 = vmatpush1.bf16.msra.mxu1 %v11229_v22  ;;  %v11302_v22 = vld [vmem:[%s14412_s5 + $0xd00] ss:$16 sps:$4 sm:$0xff]  }
 0x816   : > { %7094 = vmatprep.subr.bf16.mxu1 %v11234_v45  ;;  %v11307_v45 = vld [vmem:[%s14412_s5 + $0xd24] ss:$16 sps:$4 sm:$0xff]  }
 0x819   : > { %7095 = vmatpush1.bf16.msra.mxu1 %v11232_v44  ;;  %v11305_v44 = vld [vmem:[%s14412_s5 + $0xd20] ss:$16 sps:$4 sm:$0xff]  }
 0x81a   : > { %7096 = vmatprep.subr.bf16.mxu1 %v11237_v37  ;;  %v11310_v37 = vld [vmem:[%s14412_s5 + $0xd44] ss:$16 sps:$4 sm:$0xff]  }
 0x81d   : > { %7097 = vmatpush1.bf16.msra.mxu1 %v11235_v54  ;;  %v11308_v54 = vld [vmem:[%s14412_s5 + $0xd40] ss:$16 sps:$4 sm:$0xff]  }
 0x81e   : > { %7098 = vmatprep.subr.bf16.mxu1 %v11240_v19  ;;  %v11313_v19 = vld [vmem:[%s14412_s5 + $0xd64] ss:$16 sps:$4 sm:$0xff]  }
 0x821   : > { %7099 = vmatpush1.bf16.msra.mxu1 %v11238_v62  ;;  %v11311_v62 = vld [vmem:[%s14412_s5 + $0xd60] ss:$16 sps:$4 sm:$0xff]  }
 0x822   : > { %7100 = vmatprep.subr.bf16.mxu1 %v11243_v52  ;;  %v11316_v52 = vld [vmem:[%s14412_s5 + $0xd84] ss:$16 sps:$4 sm:$0xff]  }
 0x825   : > { %7101 = vmatpush1.bf16.msra.mxu1 %v11241_v46  ;;  %v11314_v46 = vld [vmem:[%s14412_s5 + $0xd80] ss:$16 sps:$4 sm:$0xff]  }
 0x826   : > { %7102 = vmatprep.subr.bf16.mxu1 %v11246_v12  ;;  %v11319_v12 = vld [vmem:[%s14412_s5 + $0xda4] ss:$16 sps:$4 sm:$0xff]  }
 0x829   : > { %7103 = vmatpush1.bf16.msra.mxu1 %v11244_v21  ;;  %v11317_v21 = vld [vmem:[%s14412_s5 + $0xda0] ss:$16 sps:$4 sm:$0xff]  }
 0x82a   : > { %7104 = vmatprep.subr.bf16.mxu1 %v11249_v6  ;;  %v11322_v6 = vld [vmem:[%s14412_s5 + $0xdc4] ss:$16 sps:$4 sm:$0xff]  }
 0x82d   : > { %7105 = vmatpush1.bf16.msra.mxu1 %v11247_v20  ;;  %v11325_v20 = vld [vmem:[%s14412_s5 + $0xde4] ss:$16 sps:$4 sm:$0xff]  }
 0x82e   : > { %9679 = vmatprep.subr.msk.bf16.mxu1 %vm3170_vm2, %v9676_v24  ;;  %v9731_v24 = vld [vmem:[%s14412_s5 + $0xe00] sm:$0xff] }
 0x831   : > { %7107 = vmatpush1.bf16.msra.mxu1 %v7071_v42  ;;  %v9782_v42 = vcombine.high %v9731_v24, %v9731_v24 }
 0x832   : > { %7125 = vmatprep.subr.bf16.mxu1 %v11254_v58  ;;  %v9781_v58 = vcombine.low %v9731_v24, %v9731_v24  ;;  %v11384_v24 = vld [vmem:[%s14412_s5 + $0xed0] ss:$16 sps:$4 sm:$0xff]  }
 0x834   : > { %7115 = vmatmul.mubr.bf16.vlgmr.msra.gmra.mrb[44].mxu1 %v12885_v33 }
 0x835   : > { %7126 = vmatpush1.bf16.msra.mxu1 %v11252_v34  ;;  %9682 = vmatprep.mubr.msk.bf16.mxu1 %vm4263_vm4, %v12888_v26  ;;  %v11261_v26 = vld [vmem:[%s14412_s5 + $0xb58] ss:$16 sps:$4 sm:$0xff]   ;;  %v7481_v34 = vsel %vm3170_vm2, %v9781_v58, 0  ;;  %v11392_v58 = vld [vmem:[%s14412_s5 + $0xf14] ss:$16 sps:$4 sm:$0xff]  }
 0x836   : > { %7127 = vmatprep.subr.bf16.mxu1 %v11257_v23  ;;  %v11330_v23 = vld [vmem:[%s14412_s5 + $0xc8c] ss:$16 sps:$4 sm:$0xff]  }
 0x839   : > { %7128 = vmatpush1.bf16.msra.mxu1 %v11255_v63  ;;  %v11328_v63 = vld [vmem:[%s14412_s5 + $0xc88] ss:$16 sps:$4 sm:$0xff]  }
 0x83a   : > { %7129 = vmatprep.subr.bf16.mxu1 %v11260_v1  ;;  %v11333_v1 = vld [vmem:[%s14412_s5 + $0xcac] ss:$16 sps:$4 sm:$0xff]  }
 0x83d   : > { %7130 = vmatpush1.bf16.msra.mxu1 %v11258_v35  ;;  %v11331_v35 = vld [vmem:[%s14412_s5 + $0xca8] ss:$16 sps:$4 sm:$0xff]  }
 0x83e   : > { %7131 = vmatprep.subr.bf16.mxu1 %v11263_v8  ;;  %v11336_v8 = vld [vmem:[%s14412_s5 + $0xccc] ss:$16 sps:$4 sm:$0xff]  }
 0x841   : > { %7132 = vmatpush1.bf16.msra.mxu1 %v11261_v26  ;;  %v11334_v26 = vld [vmem:[%s14412_s5 + $0xcc8] ss:$16 sps:$4 sm:$0xff]  }
 0x842   : > { %7133 = vmatprep.subr.bf16.mxu1 %v11266_v30  ;;  %v11339_v30 = vld [vmem:[%s14412_s5 + $0xcec] ss:$16 sps:$4 sm:$0xff]  }
 0x845   : > { %7134 = vmatpush1.bf16.msra.mxu1 %v11264_v7  ;;  %v11342_v7 = vld [vmem:[%s14412_s5 + $0xd0c] ss:$16 sps:$4 sm:$0xff]  }
 0x846   : > { %7135 = vmatprep.subr.bf16.mxu1 %v11269_v15  ;;  %v11340_v15 = vld [vmem:[%s14412_s5 + $0xd08] ss:$16 sps:$4 sm:$0xff]  }
 0x849   : > { %7136 = vmatpush1.bf16.msra.mxu1 %v11267_v2  ;;  %v11345_v2 = vld [vmem:[%s14412_s5 + $0xd2c] ss:$16 sps:$4 sm:$0xff]  }
 0x84a   : > { %7137 = vmatprep.subr.bf16.mxu1 %v11272_v41  ;;  %v11343_v41 = vld [vmem:[%s14412_s5 + $0xd28] ss:$16 sps:$4 sm:$0xff]  }
 0x84d   : > { %7138 = vmatpush1.bf16.msra.mxu1 %v11270_v17  ;;  %v11348_v17 = vld [vmem:[%s14412_s5 + $0xd4c] ss:$16 sps:$4 sm:$0xff]  }
 0x84e   : > { %7139 = vmatprep.subr.bf16.mxu1 %v11275_v16  ;;  %v11346_v16 = vld [vmem:[%s14412_s5 + $0xd48] ss:$16 sps:$4 sm:$0xff]  }
 0x851   : > { %7140 = vmatpush1.bf16.msra.mxu1 %v11273_v3  ;;  %v11351_v3 = vld [vmem:[%s14412_s5 + $0xd6c] ss:$16 sps:$4 sm:$0xff]  }
 0x852   : > { %7141 = vmatprep.subr.bf16.mxu1 %v11278_v11  ;;  %v11349_v11 = vld [vmem:[%s14412_s5 + $0xd68] ss:$16 sps:$4 sm:$0xff]  }
 0x855   : > { %7142 = vmatpush1.bf16.msra.mxu1 %v11276_v50  ;;  %v11354_v50 = vld [vmem:[%s14412_s5 + $0xd8c] ss:$16 sps:$4 sm:$0xff]  }
 0x856   : > { %7143 = vmatprep.subr.bf16.mxu1 %v11281_v53  ;;  %v11442_v53 = vld [vmem:[%s14414_s7 + $0x40] sm:$0xff]  }
 0x857   : > { %9931 = vmatprep.subr.bf16.mxu0 %v11442_v53  ;;  %v11418_v53 = vld [vmem:[%s14412_s5 + $0xe9c] ss:$16 sps:$4 sm:$0xff]  }
 0x859   : > { %7144 = vmatpush1.bf16.msra.mxu1 %v11279_v10  ;;  %v11443_v10 = vld [vmem:[%s14414_s7] sm:$0xff]  }
 0x85a   : > { %7145 = vmatprep.subr.bf16.mxu1 %v11284_v39  ;;  %v11444_v39 = vld [vmem:[%s14414_s7 + $0x48] sm:$0xff]   ;;  %9932 = vmatpush3.bf16.msra.mxu0 %v11443_v10 }
 0x85b   : > { %9933 = vmatprep.subr.bf16.mxu0 %v11444_v39  ;;  %v11416_v10 = vld [vmem:[%s14412_s5 + $0xe98] ss:$16 sps:$4 sm:$0xff]   ;;  %v11421_v39 = vld [vmem:[%s14412_s5 + $0xebc] ss:$16 sps:$4 sm:$0xff]  }
 0x85d   : > { %7146 = vmatpush1.bf16.msra.mxu1 %v11282_v47  ;;  %v11352_v47 = vld [vmem:[%s14412_s5 + $0xd88] ss:$16 sps:$4 sm:$0xff]  }
 0x85e   : > { %7147 = vmatprep.subr.bf16.mxu1 %v11287_v43  ;;  %v11357_v43 = vld [vmem:[%s14412_s5 + $0xdac] ss:$16 sps:$4 sm:$0xff]   ;;  %9934 = vmatpush3.bf16.msra.mxu0 %v11445_v48  ;;  %v11422_v48 = vld [vmem:[%s14412_s5 + $0xed8] ss:$16 sps:$4 sm:$0xff]  }
 0x861   : > { %7148 = vmatpush1.bf16.msra.mxu1 %v11285_v13  ;;  %v11446_v13 = vld [vmem:[%s14414_s7 + $0x50] sm:$0xff]  }
 0x862   : > { %9681 = vmatprep.subr.msk.bf16.mxu1 %vm3170_vm2, %v9678_v32  ;;  %v11355_v32 = vld [vmem:[%s14412_s5 + $0xda8] ss:$16 sps:$4 sm:$0xff]   ;;  %9935 = vmatprep.subr.bf16.mxu0 %v11446_v13  ;;  %v11427_v13 = vld [vmem:[%s14412_s5 + $0xefc] ss:$16 sps:$4 sm:$0xff]  }
 0x865   : > { %7150 = vmatpush1.bf16.msra.mxu1 %v7077_v9  ;;  %v11447_v9 = vld [vmem:[%s14414_s7 + $0x10] sm:$0xff]  }
 0x866   : > { %7492 = vmatprep.subr.bf16.mxu1 %v11292_v40  ;;  %v11448_v40 = vld [vmem:[%s14414_s7 + $0x58] sm:$0xff]   ;;  %9936 = vmatpush3.bf16.msra.mxu0 %v11447_v9 }
 0x867   : > { %9937 = vmatprep.subr.bf16.mxu0 %v11448_v40  ;;  %v11428_v9 = vld [vmem:[%s14412_s5 + $0xf18] ss:$16 sps:$4 sm:$0xff]   ;;  %v11433_v40 = vld [vmem:[%s14412_s5 + $0xf3c] ss:$16 sps:$4 sm:$0xff]  }
 0x868   : > { %7158 = vmatmul.mubr.bf16.vlgmr.msra.gmra.mrb[40].mxu1 %v12885_v33  ;;  %v11301_v33 = vld [vmem:[%s14412_s5 + $0xce4] ss:$16 sps:$4 sm:$0xff]  }
 0x869   : > { %7493 = vmatpush1.bf16.msra.mxu1 %v11290_v29  ;;  %9786 = vmatprep.mubr.msk.bf16.mxu1 %vm4263_vm4, %v12912_v4  ;;  %v11358_v29 = vld [vmem:[%s14412_s5 + $0xdc8] ss:$16 sps:$4 sm:$0xff]  }
 0x86a   : > { %7494 = vmatprep.subr.bf16.mxu1 %v11295_v51  ;;  %v11363_v51 = vld [vmem:[%s14412_s5 + $0xdec] ss:$16 sps:$4 sm:$0xff]  }
 0x86d   : > { %7495 = vmatpush1.bf16.msra.mxu1 %v11293_v56  ;;  %v9732_v56 = vld [vmem:[%s14412_s5 + $0xe08] sm:$0xff] }
 0x86e   : > { %7496 = vmatprep.subr.bf16.mxu1 %v11298_v0  ;;  %v11449_v0 = vld [vmem:[%s14414_s7 + $0x18] sm:$0xff]  }
 0x86f   : > { %9938 = vmatpush3.bf16.msra.mxu0 %v11449_v0  ;;  %v11439_v0 = vld [vmem:[%s14412_s5 + $0xf7c] ss:$16 sps:$4 sm:$0xff]  }
 0x871   : > { %7497 = vmatpush1.bf16.msra.mxu1 %v11296_v27  ;;  %v11450_v27 = vld [vmem:[%s14414_s7 + $0x60] sm:$0xff]  }
 0x872   : > { %7498 = vmatprep.subr.bf16.mxu1 %v11301_v33  ;;  %v11361_v33 = vld [vmem:[%s14412_s5 + $0xde8] ss:$16 sps:$4 sm:$0xff]   ;;  %9939 = vmatprep.subr.bf16.mxu0 %v11450_v27 }
 0x873   : > { %v9838_v27 = vld [vmem:[%s14412_s5 + $0xf98] sm:$0xff] }
 0x875   : > { %7499 = vmatpush1.bf16.msra.mxu1 %v11299_v38  ;;  %v9784_v38 = vcombine.high %v9732_v56, %v9732_v56 }
 0x876   : > { %7500 = vmatprep.subr.bf16.mxu1 %v11304_v14  ;;  %v9783_v14 = vcombine.low %v9732_v56, %v9732_v56  ;;  %v11434_v56 = vld [vmem:[%s14412_s5 + $0xf58] ss:$16 sps:$4 sm:$0xff]  }
 0x879   : > { %7501 = vmatpush1.bf16.msra.mxu1 %v11302_v22  ;;  %v11451_v22 = vld [vmem:[%s14414_s7 + $0x20] sm:$0xff]  }
 0x87a   : > { %7502 = vmatprep.subr.bf16.mxu1 %v11307_v45  ;;  %v7487_v45 = vsel %vm3170_vm2, %v9783_v14, 0  ;;  %9940 = vmatpush3.bf16.msra.mxu0 %v11451_v22  ;;  %v9889_v14 = vcombine.low %v9838_v27, %v9838_v27 }
 0x87c   : > { %v7897_v22 = vsel %vm3170_vm2, %v9889_v14, 0 }
 0x87d   : > { %7503 = vmatpush1.bf16.msra.mxu1 %v11305_v44  ;;  %v11368_v44 = vld [vmem:[%s14412_s5 + $0xe14] ss:$16 sps:$4 sm:$0xff]  }
 0x87e   : > { %7504 = vmatprep.subr.bf16.mxu1 %v11310_v37  ;;  %v11366_v37 = vld [vmem:[%s14412_s5 + $0xe10] ss:$16 sps:$4 sm:$0xff]  }
 0x881   : > { %7505 = vmatpush1.bf16.msra.mxu1 %v11308_v54  ;;  %v11371_v54 = vld [vmem:[%s14412_s5 + $0xe34] ss:$16 sps:$4 sm:$0xff]  }
 0x882   : > { %7506 = vmatprep.subr.bf16.mxu1 %v11313_v19  ;;  %v11369_v19 = vld [vmem:[%s14412_s5 + $0xe30] ss:$16 sps:$4 sm:$0xff]  }
 0x885   : > { %7507 = vmatpush1.bf16.msra.mxu1 %v11311_v62  ;;  %v11374_v62 = vld [vmem:[%s14412_s5 + $0xe54] ss:$16 sps:$4 sm:$0xff]  }
 0x886   : > { %7508 = vmatprep.subr.bf16.mxu1 %v11316_v52  ;;  %v11372_v52 = vld [vmem:[%s14412_s5 + $0xe50] ss:$16 sps:$4 sm:$0xff]  }
 0x889   : > { %7509 = vmatpush1.bf16.msra.mxu1 %v11314_v46  ;;  %v11375_v46 = vld [vmem:[%s14412_s5 + $0xe70] ss:$16 sps:$4 sm:$0xff]  }
 0x88a   : > { %7510 = vmatprep.subr.bf16.mxu1 %v11319_v12  ;;  %v11380_v12 = vld [vmem:[%s14412_s5 + $0xe94] ss:$16 sps:$4 sm:$0xff]  }
 0x88d   : > { %7511 = vmatpush1.bf16.msra.mxu1 %v11317_v21  ;;  %v11378_v21 = vld [vmem:[%s14412_s5 + $0xe90] ss:$16 sps:$4 sm:$0xff]  }
 0x88e   : > { %7512 = vmatprep.subr.bf16.mxu1 %v11322_v6  ;;  %v11383_v6 = vld [vmem:[%s14412_s5 + $0xeb4] ss:$16 sps:$4 sm:$0xff]  }
 0x891   : > { %7513 = vmatpush1.bf16.msra.mxu1 %v11320_v36  ;;  %v11381_v36 = vld [vmem:[%s14412_s5 + $0xeb0] ss:$16 sps:$4 sm:$0xff]  }
 0x892   : > { %7514 = vmatprep.subr.bf16.mxu1 %v11325_v20  ;;  %v11386_v20 = vld [vmem:[%s14412_s5 + $0xed4] ss:$16 sps:$4 sm:$0xff]  }
 0x895   : > { %7515 = vmatpush1.bf16.msra.mxu1 %v11323_v55  ;;  %v11389_v55 = vld [vmem:[%s14412_s5 + $0xef4] ss:$16 sps:$4 sm:$0xff]  }
 0x896   : > { %9785 = vmatprep.subr.msk.bf16.mxu1 %vm3170_vm2, %v9782_v42  ;;  %v11387_v42 = vld [vmem:[%s14412_s5 + $0xef0] ss:$16 sps:$4 sm:$0xff]  }
 0x899   : > { %7517 = vmatpush1.bf16.msra.mxu1 %v7481_v34  ;;  %v11390_v34 = vld [vmem:[%s14412_s5 + $0xf10] ss:$16 sps:$4 sm:$0xff]  }
 0x89a   : > { %7535 = vmatprep.subr.bf16.mxu1 %v11330_v23  ;;  %v11395_v23 = vld [vmem:[%s14412_s5 + $0xf34] ss:$16 sps:$4 sm:$0xff]  }
 0x89c   : > { %7525 = vmatmul.mubr.bf16.vlgmr.msra.gmra.mrb[44].mxu1 %v12908_v57 }
 0x89d   : > { %7536 = vmatpush1.bf16.msra.mxu1 %v11328_v63  ;;  %9788 = vmatprep.mubr.msk.bf16.mxu1 %vm4263_vm4, %v12912_v4  ;;  %v11337_v4 = vld [vmem:[%s14412_s5 + $0xce8] ss:$16 sps:$4 sm:$0xff]   ;;  %v11393_v63 = vld [vmem:[%s14412_s5 + $0xf30] ss:$16 sps:$4 sm:$0xff]  }
 0x89e   : > { %7537 = vmatprep.subr.bf16.mxu1 %v11333_v1  ;;  %v11398_v1 = vld [vmem:[%s14412_s5 + $0xf54] ss:$16 sps:$4 sm:$0xff]  }
 0x8a1   : > { %7538 = vmatpush1.bf16.msra.mxu1 %v11331_v35  ;;  %v11396_v35 = vld [vmem:[%s14412_s5 + $0xf50] ss:$16 sps:$4 sm:$0xff]  }
 0x8a2   : > { %7539 = vmatprep.subr.bf16.mxu1 %v11336_v8  ;;  %v11401_v8 = vld [vmem:[%s14412_s5 + $0xf74] ss:$16 sps:$4 sm:$0xff]  }
 0x8a5   : > { %7540 = vmatpush1.bf16.msra.mxu1 %v11334_v26  ;;  %v9837_v26 = vld [vmem:[%s14412_s5 + $0xf90] sm:$0xff] }
 0x8a6   : > { %7541 = vmatprep.subr.bf16.mxu1 %v11339_v30  ;;  %v11399_v30 = vld [vmem:[%s14412_s5 + $0xf70] ss:$16 sps:$4 sm:$0xff]  }
 0x8a9   : > { %7542 = vmatpush1.bf16.msra.mxu1 %v11337_v4  ;;  %v9888_v4 = vcombine.high %v9837_v26, %v9837_v26 }
 0x8aa   : > { %7543 = vmatprep.subr.bf16.mxu1 %v11342_v7  ;;  %v9887_v7 = vcombine.low %v9837_v26, %v9837_v26 }
 0x8ad   : > { %7544 = vmatpush1.bf16.msra.mxu1 %v11340_v15  ;;  %v7891_v15 = vsel %vm3170_vm2, %v9887_v7, 0  ;;  %v11465_v7 = vld [vmem:[%s14414_s7 + $0x98] sm:$0xff]  }
 0x8ae   : > { %7545 = vmatprep.subr.bf16.mxu1 %v11345_v2  ;;  %v11406_v2 = vld [vmem:[%s14412_s5 + $0xe1c] ss:$16 sps:$4 sm:$0xff]  }
 0x8b1   : > { %7546 = vmatpush1.bf16.msra.mxu1 %v11343_v41  ;;  %v11404_v41 = vld [vmem:[%s14412_s5 + $0xe18] ss:$16 sps:$4 sm:$0xff]  }
 0x8b2   : > { %7547 = vmatprep.subr.bf16.mxu1 %v11348_v17  ;;  %v11409_v17 = vld [vmem:[%s14412_s5 + $0xe3c] ss:$16 sps:$4 sm:$0xff]  }
 0x8b5   : > { %7548 = vmatpush1.bf16.msra.mxu1 %v11346_v16  ;;  %v11407_v16 = vld [vmem:[%s14412_s5 + $0xe38] ss:$16 sps:$4 sm:$0xff]  }
 0x8b6   : > { %7549 = vmatprep.subr.bf16.mxu1 %v11351_v3  ;;  %v11412_v3 = vld [vmem:[%s14412_s5 + $0xe5c] ss:$16 sps:$4 sm:$0xff]  }
 0x8b9   : > { %7550 = vmatpush1.bf16.msra.mxu1 %v11349_v11  ;;  %v11410_v11 = vld [vmem:[%s14412_s5 + $0xe58] ss:$16 sps:$4 sm:$0xff]  }
 0x8ba   : > { %7551 = vmatprep.subr.bf16.mxu1 %v11354_v50  ;;  %v11415_v50 = vld [vmem:[%s14412_s5 + $0xe7c] ss:$16 sps:$4 sm:$0xff]  }
 0x8bd   : > { %7552 = vmatpush1.bf16.msra.mxu1 %v11352_v47  ;;  %v11419_v47 = vld [vmem:[%s14412_s5 + $0xeb8] ss:$16 sps:$4 sm:$0xff]  }
 0x8be   : > { %7553 = vmatprep.subr.bf16.mxu1 %v11357_v43  ;;  %v11424_v43 = vld [vmem:[%s14412_s5 + $0xedc] ss:$16 sps:$4 sm:$0xff]  }
 0x8c1   : > { %7554 = vmatpush1.bf16.msra.mxu1 %v11355_v32  ;;  %v11425_v32 = vld [vmem:[%s14412_s5 + $0xef8] ss:$16 sps:$4 sm:$0xff]  }
 0x8c2   : > { %7555 = vmatprep.subr.bf16.mxu1 %v11360_v5  ;;  %v11430_v5 = vld [vmem:[%s14412_s5 + $0xf1c] ss:$16 sps:$4 sm:$0xff]  }
 0x8c5   : > { %7556 = vmatpush1.bf16.msra.mxu1 %v11358_v29  ;;  %v11431_v29 = vld [vmem:[%s14412_s5 + $0xf38] ss:$16 sps:$4 sm:$0xff]  }
 0x8c6   : > { %7557 = vmatprep.subr.bf16.mxu1 %v11363_v51  ;;  %v11436_v51 = vld [vmem:[%s14412_s5 + $0xf5c] ss:$16 sps:$4 sm:$0xff]  }
 0x8c9   : > { %7558 = vmatpush1.bf16.msra.mxu1 %v11361_v33  ;;  %v11437_v33 = vld [vmem:[%s14412_s5 + $0xf78] ss:$16 sps:$4 sm:$0xff]  }
 0x8ca   : > { %9787 = vmatprep.subr.msk.bf16.mxu1 %vm3170_vm2, %v9784_v38  ;;  %v9890_v38 = vcombine.high %v9838_v27, %v9838_v27 }
 0x8cd   : > { %7560 = vmatpush1.bf16.msra.mxu1 %v7487_v45  ;;  %v11452_v45 = vld [vmem:[%s14414_s7 + $0x68] sm:$0xff]  }
 0x8ce   : > { %7902 = vmatprep.subr.bf16.mxu1 %v11368_v44  ;;  %v11453_v44 = vld [vmem:[%s14414_s7 + $0x28] sm:$0xff]   ;;  %9941 = vmatprep.subr.bf16.mxu0 %v11452_v45 }
 0x8cf   : > { %9942 = vmatpush3.bf16.msra.mxu0 %v11453_v44 }
 0x8d0   : > { %7568 = vmatmul.mubr.bf16.vlgmr.msra.gmra.mrb[40].mxu1 %v12908_v57  ;;  %v11377_v57 = vld [vmem:[%s14412_s5 + $0xe74] ss:$16 sps:$4 sm:$0xff]  }
 0x8d1   : > { %7903 = vmatpush1.bf16.msra.mxu1 %v11366_v37  ;;  %9892 = vmatprep.mubr.msk.bf16.mxu1 %vm4263_vm4, %v12937_v18  ;;  %v11454_v37 = vld [vmem:[%s14414_s7 + $0x70] sm:$0xff]  }
 0x8d2   : > { %7904 = vmatprep.subr.bf16.mxu1 %v11371_v54  ;;  %v11455_v54 = vld [vmem:[%s14414_s7 + $0x30] sm:$0xff]   ;;  %9943 = vmatprep.subr.bf16.mxu0 %v11454_v37 }
 0x8d3   : > { %9944 = vmatpush3.bf16.msra.mxu0 %v11455_v54 }
 0x8d5   : > { %7905 = vmatpush1.bf16.msra.mxu1 %v11369_v19  ;;  %v11457_v19 = vld [vmem:[%s14414_s7 + $0x38] sm:$0xff]  }
 0x8d6   : > { %7906 = vmatprep.subr.bf16.mxu1 %v11374_v62  ;;  %v11458_v62 = vld [vmem:[%s14414_s7 + $0xc0] sm:$0xff]  }
 0x8d9   : > { %7907 = vmatpush1.bf16.msra.mxu1 %v11372_v52  ;;  %v7996_v52 = vld [vmem:[%s14413_s6] sm:$0xf] }
 0x8da   : > { %7908 = vmatprep.subr.bf16.mxu1 %v11377_v57  ;;  %v8001_v57 = vrot.slane %v7996_v52, %v14439_v59 }
 0x8dd   : > { %7909 = vmatpush1.bf16.msra.mxu1 %v11375_v46 }
 0x8de   : > { %7910 = vmatprep.subr.bf16.mxu1 %v11380_v12  ;;  %v8005_v12 = vrot.slane %v7996_v52, %v14440_v25 }
 0x8e1   : > { %7911 = vmatpush1.bf16.msra.mxu1 %v11378_v21 }
 0x8e2   : > { %7912 = vmatprep.subr.bf16.mxu1 %v11383_v6 }
 0x8e5   : > { %7913 = vmatpush1.bf16.msra.mxu1 %v11381_v36 }
 0x8e6   : > { %7914 = vmatprep.subr.bf16.mxu1 %v11386_v20 }
 0x8e9   : > { %7915 = vmatpush1.bf16.msra.mxu1 %v11384_v24 }
 0x8ea   : > { %7916 = vmatprep.subr.bf16.mxu1 %v11389_v55 }
 0x8ed   : > { %7917 = vmatpush1.bf16.msra.mxu1 %v11387_v42 }
 0x8ee   : > { %7918 = vmatprep.subr.bf16.mxu1 %v11392_v58 }
 0x8f1   : > { %7919 = vmatpush1.bf16.msra.mxu1 %v11390_v34 }
 0x8f2   : > { %7920 = vmatprep.subr.bf16.mxu1 %v11395_v23 }
 0x8f5   : > { %7921 = vmatpush1.bf16.msra.mxu1 %v11393_v63 }
 0x8f6   : > { %7922 = vmatprep.subr.bf16.mxu1 %v11398_v1 }
 0x8f9   : > { %7923 = vmatpush1.bf16.msra.mxu1 %v11396_v35 }
 0x8fa   : > { %7924 = vmatprep.subr.bf16.mxu1 %v11401_v8 }
 0x8fd   : > { %7925 = vmatpush1.bf16.msra.mxu1 %v11399_v30  ;;  %v11463_v30 = vld [vmem:[%s14414_s7 + $0x90] sm:$0xff]  }
 0x8fe   : > { %9891 = vmatprep.subr.msk.bf16.mxu1 %vm3170_vm2, %v9888_v4  ;;  %v11464_v4 = vld [vmem:[%s14414_s7 + $0xd8] sm:$0xff]  }
 0x901   : > { %7927 = vmatpush1.bf16.msra.mxu1 %v7891_v15  ;;  %v11466_v15 = vld [vmem:[%s14414_s7 + $0xe0] sm:$0xff]  }
 0x902   : > { %7945 = vmatprep.subr.bf16.mxu1 %v11406_v2  ;;  %v11467_v2 = vld [vmem:[%s14414_s7 + $0xa0] sm:$0xff]  }
 0x904   : > { %7935 = vmatmul.mubr.bf16.vlgmr.msra.gmra.mrb[44].mxu1 %v12935_v31 }
 0x905   : > { %7946 = vmatpush1.bf16.msra.mxu1 %v11404_v41  ;;  %9894 = vmatprep.mubr.msk.bf16.mxu1 %vm4263_vm4, %v12937_v18  ;;  %v11413_v18 = vld [vmem:[%s14412_s5 + $0xe78] ss:$16 sps:$4 sm:$0xff]  }
 0x906   : > { %7947 = vmatprep.subr.bf16.mxu1 %v11409_v17  ;;  %v11468_v41 = vld [vmem:[%s14414_s7 + $0xe8] sm:$0xff]  }
 0x907   : > { %v11469_v17 = vld [vmem:[%s14414_s7 + $0xa8] sm:$0xff]  }
 0x909   : > { %7948 = vmatpush1.bf16.msra.mxu1 %v11407_v16  ;;  %v11470_v16 = vld [vmem:[%s14414_s7 + $0xf0] sm:$0xff]  }
 0x90a   : > { %7949 = vmatprep.subr.bf16.mxu1 %v11412_v3  ;;  %v11471_v3 = vld [vmem:[%s14414_s7 + $0xb0] sm:$0xff]  }
 0x90d   : > { %7950 = vmatpush1.bf16.msra.mxu1 %v11410_v11  ;;  %v11472_v11 = vld [vmem:[%s14414_s7 + $0xf8] ss:$0 sps:$4 sm:$0x33]  }
 0x90e   : > { %7951 = vmatprep.subr.bf16.mxu1 %v11415_v50  ;;  %v11473_v50 = vld [vmem:[%s14414_s7 + $0xb8] sm:$0xff]  }
 0x911   : > { %7952 = vmatpush1.bf16.msra.mxu1 %v11413_v18  ;;  %v14441_v18 = vld [vmem:[#allocation2_spill] sm:$0xff] }
 0x912   : > { %7953 = vmatprep.subr.bf16.mxu1 %v11418_v53  ;;  %v8008_v53 = vsub.s32 2, %v14441_v18 }
 0x915   : > { %7954 = vmatpush1.bf16.msra.mxu1 %v11416_v10  ;;  %v8012_v10 = vsub.s32 3, %v14441_v18 }
 0x916   : > { %7955 = vmatprep.subr.bf16.mxu1 %v11421_v39  ;;  %v8009_v39 = vrot.slane %v7996_v52, %v8008_v53 }
 0x919   : > { %7956 = vmatpush1.bf16.msra.mxu1 %v11419_v47  ;;  %v8013_v47 = vrot.slane %v7996_v52, %v8012_v10 }
 0x91a   : > { %7957 = vmatprep.subr.bf16.mxu1 %v11424_v43 }
 0x91d   : > { %7958 = vmatpush1.bf16.msra.mxu1 %v11422_v48 }
 0x91e   : > { %7959 = vmatprep.subr.bf16.mxu1 %v11427_v13 }
 0x921   : > { %7960 = vmatpush1.bf16.msra.mxu1 %v11425_v32 }
 0x922   : > { %7961 = vmatprep.subr.bf16.mxu1 %v11430_v5 }
 0x925   : > { %7962 = vmatpush1.bf16.msra.mxu1 %v11428_v9 }
 0x926   : > { %7963 = vmatprep.subr.bf16.mxu1 %v11433_v40 }
 0x929   : > { %7964 = vmatpush1.bf16.msra.mxu1 %v11431_v29 }
 0x92a   : > { %7965 = vmatprep.subr.bf16.mxu1 %v11436_v51 }
 0x92d   : > { %7966 = vmatpush1.bf16.msra.mxu1 %v11434_v56 }
 0x92e   : > { %7967 = vmatprep.subr.bf16.mxu1 %v11439_v0 }
 0x931   : > { %7968 = vmatpush1.bf16.msra.mxu1 %v11437_v33 }
 0x932   : > { %9893 = vmatprep.subr.msk.bf16.mxu1 %vm3170_vm2, %v9890_v38 }
 0x935   : > { %7970 = vmatpush1.bf16.msra.mxu1 %v7897_v22 }
 0x938   : > { %7978 = vmatmul.mubr.bf16.vlgmr.msra.gmra.mrb[40].mxu1 %v12935_v31  ;;  %v11456_v31 = vld [vmem:[%s14414_s7 + $0x78] sm:$0xff]  }
 0x939   : > { %9945 = vmatprep.subr.bf16.mxu0 %v11456_v31  ;;  %v9895_v31 = vld [vmem:[%s14415_s8] ss:$0 sm:$0xff] }
 0x93a   : > { %9946 = vmatpush3.bf16.msra.mxu0 %v11457_v19 }
 0x93b   : > { %9953 = vmatprep.subr.bf16.mxu0 %v11458_v62 }
 0x9d7   : > { %v7936_v46 = vpop.f32.mrb[44].mxu1 }
 0x9d8   : > { %v10015_v21 = vadd.f32 %v7936_v46, %v13173_v28  ;;  %v7938_v6 = vpop.f32.mrb[45].mxu1  ;;  %v11459_v28 = vld [vmem:[%s14414_s7 + $0x80] sm:$0xff]  }
 0x9d9   : > { %v10016_v36 = vadd.f32 %v7938_v6, %v13175_v49  ;;  %v7940_v20 = vpop.f32.mrb[46].mxu1  ;;  %v11460_v49 = vld [vmem:[%s14414_s7 + $0xc8] sm:$0xff]  }
 0x9da   : > { %v8018_v24 = vadd.f32 %v10015_v21, %v8001_v57  ;;  %v10017_v55 = vadd.f32 %v7940_v20, %v13177_v61  ;;  %v7942_v42 = vpop.f32.mrb[47].mxu1  ;;  %v11461_v61 = vld [vmem:[%s14414_s7 + $0x88] sm:$0xff]  }
 0x9db   : > { %v8019_v58 = vadd.f32 %v10016_v36, %v8005_v12  ;;  %v10018_v34 = vadd.f32 %v7942_v42, %v13182_v60  ;;  %v11462_v60 = vld [vmem:[%s14414_s7 + $0xd0] sm:$0xff]  }
 0x9dc   : > { %v8022_v23 = vadd.f32 %v10017_v55, %v8001_v57  ;;  %v8026_v1 = vmax.f32 %v8018_v24, 0.0 }
 0x9dd   : > { %v8023_v63 = vadd.f32 %v10018_v34, %v8005_v12  ;;  %v8027_v35 = vmax.f32 %v8019_v58, 0.0 }
 0x9de   : > { %v8030_v59 = vmax.f32 %v8022_v23, 0.0 }
 0x9df   : > { %v8031_v8 = vmax.f32 %v8023_v63, 0.0 }
 0x9e0   : > { %v8034_v25 = vpack.c.bf16 %v8030_v59, %v8026_v1 }
 0x9e1   : > { %v8035_v26 = vpack.c.bf16 %v8031_v8, %v8027_v35 }
 0x9e3   : > { %8337 = vmatprep.mubr.bf16.mxu0 %v8035_v26 }
 0x9e4   : > { %8338 = vmatmul.mubr.bf16.vlgmr.msra.gmra.mrb[140].mxu0 %v8034_v25 }
 0x9e5   : > { %9954 = vmatpush3.bf16.msra.mxu0 %v11459_v28 }
 0x9e6   : > { %9955 = vmatprep.subr.bf16.mxu0 %v11460_v49 }
 0x9e9   : > { %9956 = vmatpush3.bf16.msra.mxu0 %v11461_v61 }
 0x9ea   : > { %9957 = vmatprep.subr.bf16.mxu0 %v11462_v60 }
 0x9ed   : > { %9958 = vmatpush3.bf16.msra.mxu0 %v11463_v30 }
 0x9ee   : > { %9959 = vmatprep.subr.bf16.mxu0 %v11464_v4 }
 0x9f1   : > { %9960 = vmatpush3.bf16.msra.mxu0 %v11465_v7 }
 0x9f2   : > { %9961 = vmatprep.subr.bf16.mxu0 %v11466_v15 }
 0x9f5   : > { %9962 = vmatpush3.bf16.msra.mxu0 %v11467_v2 }
 0x9f6   : > { %9963 = vmatprep.subr.bf16.mxu0 %v11468_v41 }
 0x9f9   : > { %9964 = vmatpush3.bf16.msra.mxu0 %v11469_v17 }
 0x9fa   : > { %9965 = vmatprep.subr.bf16.mxu0 %v11470_v16 }
 0x9fd   : > { %9966 = vmatpush3.bf16.msra.mxu0 %v11471_v3 }
 0x9fe   : > { %10511 = vmatprep.subr.msk.bf16.mxu0 %vm8301_vm5, %v11472_v11 }
 0xa01   : > { %9968 = vmatpush3.bf16.msra.mxu0 %v11473_v50 }
 0xa0b   : > { %v7979_v43 = vpop.f32.mrb[40].mxu1 }
 0xa0c   : > { %v8020_v48 = vadd.f32 %v8009_v39, %v7979_v43  ;;  %v7981_v13 = vpop.f32.mrb[41].mxu1 }
 0xa0d   : > { %v8021_v32 = vadd.f32 %v8013_v47, %v7981_v13  ;;  %v7983_v5 = vpop.f32.mrb[42].mxu1 }
 0xa0e   : > { %v8024_v9 = vadd.f32 %v8009_v39, %v7983_v5  ;;  %v7985_v40 = vpop.f32.mrb[43].mxu1  ;;  %v8028_v51 = vmax.f32 %v8020_v48, 0.0 }
 0xa0f   : > { %v8025_v29 = vadd.f32 %v8013_v47, %v7985_v40  ;;  %v8029_v0 = vmax.f32 %v8021_v32, 0.0 }
 0xa10   : > { %v8032_v56 = vmax.f32 %v8024_v9, 0.0 }
 0xa11   : > { %v8033_v27 = vmax.f32 %v8025_v29, 0.0 }
 0xa12   : > { %v8036_v33 = vpack.c.bf16 %v8032_v56, %v8028_v51 }
 0xa13   : > { %v8037_v38 = vpack.c.bf16 %v8033_v27, %v8029_v0 }
 0xa15   : > { %9928 = vmatprep.mubr.msk.bf16.mxu0 %vm8297_vm6, %v8037_v38 }
 0xa16   : > { %8379 = vmatmul.mubr.bf16.vlgmr.msra.gmra.mrb[144].mxu0 %v8036_v33 }
 0xab7   : > { %v9947_v14 = vpop.f32.mrb[140].mxu0 }
 0xab8   : > { %v9948_v22 = vpop.f32.mrb[141].mxu0 }
 0xab9   : > { %v9949_v45 = vadd.f32 %v9948_v22, %v9947_v14  ;;  %v9950_v44 = vpop.f32.mrb[142].mxu0 }
 0xaba   : > { %v9951_v37 = vpop.f32.mrb[143].mxu0 }
 0xabb   : > { %v9952_v54 = vadd.f32 %v9951_v37, %v9950_v44  ;;  %v8340_v52 = vadd.f32 %v9949_v45, %v9895_v31 }
 0xabd   : > { %v8343_v21 = vadd.f32 %v9952_v54, %v9895_v31 }
 0xae9   : > { %v9969_v19 = vpop.f32.mrb[144].mxu0 }
 0xaea   : > { %v9970_v62 = vpop.f32.mrb[145].mxu0 }
 0xaeb   : > { %v9971_v57 = vadd.f32 %v9970_v62, %v9969_v19  ;;  %v9972_v46 = vpop.f32.mrb[146].mxu0 }
 0xaec   : > { %v9973_v12 = vpop.f32.mrb[147].mxu0 }
 0xaed   : > { %v8381_v6 = vadd.f32 %v9971_v57, %v8340_v52  ;;  %v9974_v36 = vadd.f32 %v9973_v12, %v9972_v46 }
 0xaef   : > { %v8384_v20 = vadd.f32 %v9974_v36, %v8343_v21  ;;  %v8388_v24 = vsel %vm8387_vm7, %v8381_v6, -inf }
 0xaf0   : > { %8389 = vmax.xlane.f32.xlu0 %v8388_v24 }
 0xaf1   : > { %v8391_v55 = vsel %vm8387_vm7, %v8384_v20, -inf }
 0xaf4   : > { %8392 = vmax.xlane.f32.xlu0 %v8391_v55 }
 0xb7d   : > { %v8390_v42 = vpop.xlane.xlu0 %8389 }
 0xb7e   : > { %v8394_v58 = vsub.f32 %v8381_v6, %v8390_v42 }
 0xb80   : > { %v8396_v34 = vmul.f32 1.442695, %v8394_v58 }
 0xb81   : > { %v8393_v23 = vpop.xlane.xlu0 %8392 }
 0xb82   : > { %11474 = vpow2.f32 %v8396_v34  ;;  %v8395_v63 = vsub.f32 %v8384_v20, %v8393_v23 }
 0xb84   : > { %v8398_v1 = vmul.f32 1.442695, %v8395_v63 }
 0xb86   : > { %11476 = vpow2.f32 %v8398_v1 }
 0xb8c   : > { %v11475_v59 = vpop.eup %11474 }
 0xb8d   : > { %v8400_v35 = vsel %vm8387_vm7, %v11475_v59, 0.0 }
 0xb8e   : > { %8401 = vadd.xlane.f32.xlu1 %v8400_v35 }
 0xb90   : > { %v11477_v8 = vpop.eup %11476 }
 0xb91   : > { %v8403_v25 = vsel %vm8387_vm7, %v11477_v8, 0.0 }
 0xb92   : > { %8404 = vadd.xlane.f32.xlu1 %v8403_v25 }
 0xc1b   : > { %v8402_v26 = vpop.xlane.xlu1 %8401 }
 0xc1c   : > { %11478 = vlog2.f32 %v8402_v26 }
 0xc1f   : > { %v8405_v28 = vpop.xlane.xlu1 %8404 }
 0xc20   : > { %11480 = vlog2.f32 %v8405_v28 }
 0xc26   : > { %v11479_v49 = vpop.eup %11478 }
 0xc27   : > { %v8407_v61 = vmul.f32 0.6931472, %v11479_v49 }
 0xc29   : > { %v8410_v60 = vadd.f32 %v8407_v61, %v8390_v42 }
 0xc2a   : > { %v11481_v30 = vpop.eup %11480 }
 0xc2b   : > { %v8412_v4 = vsub.f32 %v8381_v6, %v8410_v60  ;;  %v8409_v7 = vmul.f32 0.6931472, %v11481_v30 }
 0xc2d   : > { %8414 = vst.msk [vmem:[%s332_s28] sm:$0xff] %vm8387_vm7, %v8412_v4  ;;  %v8411_v15 = vadd.f32 %v8409_v7, %v8393_v23 }
 0xc2f   : > { %v8413_v2 = vsub.f32 %v8384_v20, %v8411_v15 }
 0xc31   : > { %8415 = vst.msk [vmem:[%s332_s28 + $0x8] sm:$0xff] %vm8387_vm7, %v8413_v2 }
 0xc32 PF: > { %s19_s30 = sadd.s32 1, %s11503_s30  }
 0xc33   : > { %p16_p5 = scmp.ge.s32.totalorder %s19_s30, 6  }
 0xc35   :  { %18 = sbr.rel (!%p16_p5) target bundleno = 1 (0x1), region = 102 }

</bundles_post_ra>
